<compile_context>
chip_gen: v7x
topology: tpu7x:2x2x1
jax: 0.10.0
libtpu: 0.0.40
codegen_flags: <defaults>
</compile_context>

<pallas_src>
import numpy as np
import jax
import jax.numpy as jnp
from jax.experimental import pallas as pl
from jax.experimental.pallas import tpu as pltpu

TB = 8  # batch tile; must be a multiple of the 8-row f32 sublane group


# ---------------------------------------------------------------------------
# Fused kernel: conv1 -> conv2 -> conv3 -> flatten -> Linear -> d head
# ---------------------------------------------------------------------------
def _disc_fused_kernel(x_ref, wb1_ref, cb1_ref, wb2_ref, cb2_ref,
                       wb3_ref, cb3_ref, wh_ref, bh_ref,
                       label_ref, d_ref, scr1, scr2):
    f32 = jnp.float32
    bf16 = jnp.bfloat16
    tb = x_ref.shape[1]

    def conv_rows(x, wb_ref, cb_ref):
        # x: (2*ho + 2, tb, K) with zero rows at top/bottom (H padding).
        # The stride-2/pad-1 conv along W and the Cin->Cout mixing are folded
        # into wb_ref[dy] (K = Win*Cin, N = Wout*Cout): one lane-dense GEMM per
        # H-tap dy.  Rows of the result are ordered (h_out, b), lanes (w_out, c).
        ho = (x.shape[0] - 2) // 2
        k = x.shape[-1]
        n = wb_ref.shape[-1]
        xr = x.reshape(ho + 1, 2, tb, k)          # leading-dim split only
        acc = jnp.zeros((ho * tb, n), f32)
        for dy in range(3):
            a, p = divmod(dy, 2)                  # padded row = 2*(h_idx + a) + p
            tap = xr[a:a + ho, p].reshape(ho * tb, k).astype(bf16)
            acc = acc + jnp.dot(tap, wb_ref[dy], preferred_element_type=f32)
        y = acc + cb_ref[...]
        return jnp.where(y > 0.0, y, 0.2 * y)     # LeakyReLU(0.2) in f32

    # Zero the H-padding border rows of the activation scratch.  Done every
    # grid step (4 cheap row stores) so it stays correct when the batch grid
    # axis is split across TensorCores ("parallel").
    nl = scr1.shape[-1]                           # 512 for every layer
    zrow = jnp.zeros((1, tb, nl), f32)
    scr1[0:1] = zrow
    scr1[scr1.shape[0] - 1:scr1.shape[0]] = zrow
    scr2[0:1] = zrow
    scr2[scr2.shape[0] - 1:scr2.shape[0]] = zrow

    # conv1: (34, tb, 32) -> (16, tb, 16*32); activations never leave VMEM.
    y1 = conv_rows(x_ref[...], wb1_ref, cb1_ref)
    scr1[1:scr1.shape[0] - 1] = y1.reshape(scr1.shape[0] - 2, tb, nl)

    # conv2: (18, tb, 512) -> (8, tb, 8*64)
    y2 = conv_rows(scr1[...], wb2_ref, cb2_ref)
    scr2[1:scr2.shape[0] - 1] = y2.reshape(scr2.shape[0] - 2, tb, nl)

    # conv3: (10, tb, 512) -> (4, tb, 4*128), kept as a value.
    y3 = conv_rows(scr2[...], wb3_ref, cb3_ref)

    # TODO(synk): nn.Dropout(0.4) is an identity here (eval-mode semantics).

    # Linear(2048 -> 10).  wh_ref[h] is the FC weight re-laid-out at init so the
    # natural (h, w, c) activation order is consumed directly -- no NCHW-flatten
    # transpose of activations.
    y3r = y3.reshape(4, tb, nl)
    acc = jnp.zeros((tb, 10), f32)
    for h in range(4):
        acc = acc + jnp.dot(y3r[h].astype(bf16), wh_ref[h],
                            preferred_element_type=f32)
    logits = acc + bh_ref[...]
    label_ref[...] = logits

    # d = z/(z+1), z = sum(exp(label))  ==  sigmoid(logsumexp(label)) (stable).
    m = jnp.max(logits, axis=-1, keepdims=True)
    lse = m + jnp.log(jnp.sum(jnp.exp(logits - m), axis=-1, keepdims=True))
    d_ref[...] = 1.0 / (1.0 + jnp.exp(-lse))


# ---------------------------------------------------------------------------
# One-time parameter re-layout (host side, at init)
# ---------------------------------------------------------------------------
def _banded_conv_weight(w_oihw, w_in):
    """Fold the stride-2/pad-1 conv along W plus Cin->Cout mixing into a
    (3, Win*Cin, Wout*Cout) banded matrix (one slab per H-tap dy)."""
    w = np.asarray(w_oihw, np.float32)
    c_out, c_in = w.shape[0], w.shape[1]
    w_out = w_in // 2
    wb = np.zeros((3, w_in * c_in, w_out * c_out), np.float32)
    for dy in range(3):
        for dx in range(3):
            for wo in range(w_out):
                wi = 2 * wo + dx - 1
                if 0 <= wi < w_in:
                    wb[dy, wi * c_in:(wi + 1) * c_in,
                       wo * c_out:(wo + 1) * c_out] = w[:, :, dy, dx].T
    return jnp.asarray(wb, jnp.bfloat16)


def prepare_params(params):
    """One-time re-layout of PyTorch-style parameters into kernel form:
    banded conv weights (bf16), W-tiled biases (f32), and the FC weight
    permuted into (h, w*128 + c, n) order to absorb the NCHW flatten."""
    wfc = np.asarray(params["wfc"], np.float32).reshape(10, 128, 4, 4)  # (n,c,h,w)
    wh = np.transpose(wfc, (2, 3, 1, 0)).reshape(4, 4 * 128, 10)        # (h, w*128+c, n)
    return {
        "wb1": _banded_conv_weight(params["w1"], 32),
        "cb1": jnp.tile(params["b1"], 16).reshape(1, 512).astype(jnp.float32),
        "wb2": _banded_conv_weight(params["w2"], 16),
        "cb2": jnp.tile(params["b2"], 8).reshape(1, 512).astype(jnp.float32),
        "wb3": _banded_conv_weight(params["w3"], 8),
        "cb3": jnp.tile(params["b3"], 4).reshape(1, 512).astype(jnp.float32),
        "wh": jnp.asarray(wh, jnp.bfloat16),
        "bh": jnp.asarray(params["bfc"], jnp.float32).reshape(1, 10),
    }


def init_params(key):
    ks = jax.random.split(key, 8)

    def u(k, shape, fan_in):
        bound = 1.0 / jnp.sqrt(jnp.float32(fan_in))
        return jax.random.uniform(k, shape, jnp.float32, -bound, bound)

    return {
        "w1": u(ks[0], (32, 1, 3, 3), 1 * 9),
        "b1": u(ks[1], (32,), 1 * 9),
        "w2": u(ks[2], (64, 32, 3, 3), 32 * 9),
        "b2": u(ks[3], (64,), 32 * 9),
        "w3": u(ks[4], (128, 64, 3, 3), 64 * 9),
        "b3": u(ks[5], (128,), 64 * 9),
        "wfc": u(ks[6], (10, 2048), 2048),   # PyTorch Linear weight layout (out, in)
        "bfc": u(ks[7], (10,), 2048),
    }


# ---------------------------------------------------------------------------
# Forward wrapper
# ---------------------------------------------------------------------------
@jax.jit
def discriminator_forward(kp, img_nchw):
    # img_nchw: (B, 1, 32, 32) float32, PyTorch NCHW.  Linear(2048,10) after
    # three stride-2 convs from 1 channel implies a 32x32 input.
    b = img_nchw.shape[0]
    bp = ((b + TB - 1) // TB) * TB
    x = img_nchw.reshape(b, 32, 32)
    x = jnp.transpose(x, (1, 0, 2))                 # (H=32, B, W=32)
    x = jnp.pad(x, ((1, 1), (0, bp - b), (0, 0)))   # H padding for conv1 + batch pad

    label, d = pl.pallas_call(
        _disc_fused_kernel,
        out_shape=(jax.ShapeDtypeStruct((bp, 10), jnp.float32),
                   jax.ShapeDtypeStruct((bp, 1), jnp.float32)),
        grid_spec=pltpu.PrefetchScalarGridSpec(
            num_scalar_prefetch=0,
            grid=(bp // TB,),
            in_specs=[
                pl.BlockSpec((34, TB, 32), lambda i: (0, i, 0)),    # image tile
                pl.BlockSpec((3, 32, 512), lambda i: (0, 0, 0)),    # conv1 banded W
                pl.BlockSpec((1, 512), lambda i: (0, 0)),           # conv1 bias
                pl.BlockSpec((3, 512, 512), lambda i: (0, 0, 0)),   # conv2 banded W
                pl.BlockSpec((1, 512), lambda i: (0, 0)),           # conv2 bias
                pl.BlockSpec((3, 512, 512), lambda i: (0, 0, 0)),   # conv3 banded W
                pl.BlockSpec((1, 512), lambda i: (0, 0)),           # conv3 bias
                pl.BlockSpec((4, 512, 10), lambda i: (0, 0, 0)),    # FC weight (permuted)
                pl.BlockSpec((1, 10), lambda i: (0, 0)),            # FC bias
            ],
            out_specs=(pl.BlockSpec((TB, 10), lambda i: (i, 0)),
                       pl.BlockSpec((TB, 1), lambda i: (i, 0))),
            scratch_shapes=[pltpu.VMEM((18, TB, 512), jnp.float32),   # conv1 out (H-padded)
                            pltpu.VMEM((10, TB, 512), jnp.float32)],  # conv2 out (H-padded)
        ),
        compiler_params=pltpu.CompilerParams(
            dimension_semantics=("parallel",),
            vmem_limit_bytes=32 * 1024 * 1024),
    )(x, kp["wb1"], kp["cb1"], kp["wb2"], kp["cb2"],
      kp["wb3"], kp["cb3"], kp["wh"], kp["bh"])
    return d[:b], label[:b]


# ---------------------------------------------------------------------------
# Pure-JAX f32 reference (exact PyTorch forward semantics) for validation
# ---------------------------------------------------------------------------
def reference_forward(params, img_nchw):
    x = img_nchw
    for w, bias in ((params["w1"], params["b1"]),
                    (params["w2"], params["b2"]),
                    (params["w3"], params["b3"])):
        x = jax.lax.conv_general_dilated(
            x, w, window_strides=(2, 2), padding=((1, 1), (1, 1)),
            dimension_numbers=("NCHW", "OIHW", "NCHW"))
        x = x + bias[None, :, None, None]
        x = jnp.where(x > 0.0, x, 0.2 * x)
    x = x.reshape(x.shape[0], -1)                       # NCHW flatten -> (B, 2048)
    label = x @ params["wfc"].T + params["bfc"]
    z = jnp.sum(jnp.exp(label), axis=-1, keepdims=True)
    return z / (z + 1.0), label


if __name__ == "__main__":
    key = jax.random.PRNGKey(0)
    pkey, xkey = jax.random.split(key)
    params = init_params(pkey)
    kparams = prepare_params(params)        # one-time weight re-layout
    img = jax.random.normal(xkey, (2, 1, 32, 32), dtype=jnp.float32)

    d_x, label = discriminator_forward(kparams, img)
    jax.block_until_ready((d_x, label))

    assert d_x.shape == (2, 1) and label.shape == (2, 10)
    assert bool(jnp.all(jnp.isfinite(d_x))) and bool(jnp.all(jnp.isfinite(label)))

    # Validate against the f32 XLA reference (kernel uses bf16 MXU inputs).
    d_ref, label_ref = reference_forward(params, img)
    np.testing.assert_allclose(np.asarray(label), np.asarray(label_ref), atol=2e-2, rtol=0)
    np.testing.assert_allclose(np.asarray(d_x), np.asarray(d_ref), atol=2e-2, rtol=0)
    print("KERNEL_OK")
</pallas_src>

<mosaic_0001>
module attributes {stable_mosaic.version = 11 : i64} {
  func.func @_disc_fused_kernel(%arg0: i32, %arg1: memref<34x8x32xf32, #tpu.memory_space<vmem>>, %arg2: memref<3x32x512xbf16, #tpu.memory_space<vmem>>, %arg3: memref<1x512xf32, #tpu.memory_space<vmem>>, %arg4: memref<3x512x512xbf16, #tpu.memory_space<vmem>>, %arg5: memref<1x512xf32, #tpu.memory_space<vmem>>, %arg6: memref<3x512x512xbf16, #tpu.memory_space<vmem>>, %arg7: memref<1x512xf32, #tpu.memory_space<vmem>>, %arg8: memref<4x512x10xbf16, #tpu.memory_space<vmem>>, %arg9: memref<1x10xf32, #tpu.memory_space<vmem>>, %arg10: memref<8x10xf32, #tpu.memory_space<vmem>>, %arg11: memref<8x1xf32, #tpu.memory_space<vmem>>, %arg12: memref<18x8x512xf32, #tpu.memory_space<vmem>>, %arg13: memref<10x8x512xf32, #tpu.memory_space<vmem>>) attributes {dimension_semantics = [#tpu.dimension_semantics<parallel>], iteration_bounds = array<i64: 1>, scalar_prefetch = 0 : i64, scratch_operands = 2 : i64, tpu.core_type = #tpu.core_type<tc>, window_params = [{transform_indices = @transform_0, window_bounds = array<i64: 34, 8, 32>}, {pipeline_mode = #tpu.pipeline_mode<synchronous>, transform_indices = @transform_1, window_bounds = array<i64: 3, 32, 512>}, {pipeline_mode = #tpu.pipeline_mode<synchronous>, transform_indices = @transform_2, window_bounds = array<i64: 1, 512>}, {pipeline_mode = #tpu.pipeline_mode<synchronous>, transform_indices = @transform_3, window_bounds = array<i64: 3, 512, 512>}, {pipeline_mode = #tpu.pipeline_mode<synchronous>, transform_indices = @transform_4, window_bounds = array<i64: 1, 512>}, {pipeline_mode = #tpu.pipeline_mode<synchronous>, transform_indices = @transform_5, window_bounds = array<i64: 3, 512, 512>}, {pipeline_mode = #tpu.pipeline_mode<synchronous>, transform_indices = @transform_6, window_bounds = array<i64: 1, 512>}, {pipeline_mode = #tpu.pipeline_mode<synchronous>, transform_indices = @transform_7, window_bounds = array<i64: 4, 512, 10>}, {pipeline_mode = #tpu.pipeline_mode<synchronous>, transform_indices = @transform_8, window_bounds = array<i64: 1, 10>}, {transform_indices = @transform_9, window_bounds = array<i64: 8, 10>}, {transform_indices = @transform_10, window_bounds = array<i64: 8, 1>}]} {
    %cst = arith.constant 0.000000e+00 : f32
    %0 = vector.broadcast %cst : f32 to vector<1x8x512xf32>
    %c0 = arith.constant 0 : index
    %c0_0 = arith.constant 0 : index
    %c0_1 = arith.constant 0 : index
    %1 = vector.load %arg12[%c0, %c0_0, %c0_1] : memref<18x8x512xf32, #tpu.memory_space<vmem>>, vector<1x8x512xf32>
    tpu.vector_store %arg12[%c0, %c0_0, %c0_1], %0 {strides = array<i32>} : memref<18x8x512xf32, #tpu.memory_space<vmem>>, vector<1x8x512xf32>,
    %c17 = arith.constant 17 : index
    %c0_2 = arith.constant 0 : index
    %c0_3 = arith.constant 0 : index
    %2 = vector.load %arg12[%c17, %c0_2, %c0_3] : memref<18x8x512xf32, #tpu.memory_space<vmem>>, vector<1x8x512xf32>
    tpu.vector_store %arg12[%c17, %c0_2, %c0_3], %0 {strides = array<i32>} : memref<18x8x512xf32, #tpu.memory_space<vmem>>, vector<1x8x512xf32>,
    %c0_4 = arith.constant 0 : index
    %c0_5 = arith.constant 0 : index
    %c0_6 = arith.constant 0 : index
    %3 = vector.load %arg13[%c0_4, %c0_5, %c0_6] : memref<10x8x512xf32, #tpu.memory_space<vmem>>, vector<1x8x512xf32>
    tpu.vector_store %arg13[%c0_4, %c0_5, %c0_6], %0 {strides = array<i32>} : memref<10x8x512xf32, #tpu.memory_space<vmem>>, vector<1x8x512xf32>,
    %c9 = arith.constant 9 : index
    %c0_7 = arith.constant 0 : index
    %c0_8 = arith.constant 0 : index
    %4 = vector.load %arg13[%c9, %c0_7, %c0_8] : memref<10x8x512xf32, #tpu.memory_space<vmem>>, vector<1x8x512xf32>
    tpu.vector_store %arg13[%c9, %c0_7, %c0_8], %0 {strides = array<i32>} : memref<10x8x512xf32, #tpu.memory_space<vmem>>, vector<1x8x512xf32>,
    %c0_9 = arith.constant 0 : index
    %c0_10 = arith.constant 0 : index
    %c0_11 = arith.constant 0 : index
    %5 = vector.load %arg1[%c0_9, %c0_10, %c0_11] : memref<34x8x32xf32, #tpu.memory_space<vmem>>, vector<34x8x32xf32>
    %6 = vector.shape_cast %5 : vector<34x8x32xf32> to vector<17x2x8x32xf32>
    %cst_12 = arith.constant 0.000000e+00 : f32
    %7 = vector.broadcast %cst_12 : f32 to vector<128x512xf32>
    %8 = vector.extract_strided_slice %6 {offsets = [0, 0, 0, 0], sizes = [16, 1, 8, 32], strides = [1, 1, 1, 1]} : vector<17x2x8x32xf32> to vector<16x1x8x32xf32>
    %9 = vector.shape_cast %8 : vector<16x1x8x32xf32> to vector<16x8x32xf32>
    %10 = vector.shape_cast %9 : vector<16x8x32xf32> to vector<128x32xf32>
    %11 = arith.truncf %10 : vector<128x32xf32> to vector<128x32xbf16>
    %c0_13 = arith.constant 0 : index
    %c0_14 = arith.constant 0 : index
    %c0_15 = arith.constant 0 : index
    %12 = vector.load %arg2[%c0_13, %c0_14, %c0_15] : memref<3x32x512xbf16, #tpu.memory_space<vmem>>, vector<1x32x512xbf16>
    %13 = vector.shape_cast %12 : vector<1x32x512xbf16> to vector<32x512xbf16>
    %cst_16 = arith.constant dense<0.000000e+00> : vector<128x512xf32>
    %14 = tpu.matmul %11, %13, %cst_16 {dimension_numbers = #tpu.dot_dimension_numbers<[1], [0], [0], [1], [0, 0, 1, 1], [], []>} : vector<128x32xbf16>, vector<32x512xbf16>, vector<128x512xf32> -> vector<128x512xf32>
    %15 = arith.addf %7, %14 : vector<128x512xf32>
    %16 = vector.extract_strided_slice %6 {offsets = [0, 1, 0, 0], sizes = [16, 1, 8, 32], strides = [1, 1, 1, 1]} : vector<17x2x8x32xf32> to vector<16x1x8x32xf32>
    %17 = vector.shape_cast %16 : vector<16x1x8x32xf32> to vector<16x8x32xf32>
    %18 = vector.shape_cast %17 : vector<16x8x32xf32> to vector<128x32xf32>
    %19 = arith.truncf %18 : vector<128x32xf32> to vector<128x32xbf16>
    %c1 = arith.constant 1 : index
    %c0_17 = arith.constant 0 : index
    %c0_18 = arith.constant 0 : index
    %20 = vector.load %arg2[%c1, %c0_17, %c0_18] : memref<3x32x512xbf16, #tpu.memory_space<vmem>>, vector<1x32x512xbf16>
    %21 = vector.shape_cast %20 : vector<1x32x512xbf16> to vector<32x512xbf16>
    %cst_19 = arith.constant dense<0.000000e+00> : vector<128x512xf32>
    %22 = tpu.matmul %19, %21, %cst_19 {dimension_numbers = #tpu.dot_dimension_numbers<[1], [0], [0], [1], [0, 0, 1, 1], [], []>} : vector<128x32xbf16>, vector<32x512xbf16>, vector<128x512xf32> -> vector<128x512xf32>
    %23 = arith.addf %15, %22 : vector<128x512xf32>
    %24 = vector.extract_strided_slice %6 {offsets = [1, 0, 0, 0], sizes = [16, 1, 8, 32], strides = [1, 1, 1, 1]} : vector<17x2x8x32xf32> to vector<16x1x8x32xf32>
    %25 = vector.shape_cast %24 : vector<16x1x8x32xf32> to vector<16x8x32xf32>
    %26 = vector.shape_cast %25 : vector<16x8x32xf32> to vector<128x32xf32>
    %27 = arith.truncf %26 : vector<128x32xf32> to vector<128x32xbf16>
    %c2 = arith.constant 2 : index
    %c0_20 = arith.constant 0 : index
    %c0_21 = arith.constant 0 : index
    %28 = vector.load %arg2[%c2, %c0_20, %c0_21] : memref<3x32x512xbf16, #tpu.memory_space<vmem>>, vector<1x32x512xbf16>
    %29 = vector.shape_cast %28 : vector<1x32x512xbf16> to vector<32x512xbf16>
    %cst_22 = arith.constant dense<0.000000e+00> : vector<128x512xf32>
    %30 = tpu.matmul %27, %29, %cst_22 {dimension_numbers = #tpu.dot_dimension_numbers<[1], [0], [0], [1], [0, 0, 1, 1], [], []>} : vector<128x32xbf16>, vector<32x512xbf16>, vector<128x512xf32> -> vector<128x512xf32>
    %31 = arith.addf %23, %30 : vector<128x512xf32>
    %c0_23 = arith.constant 0 : index
    %c0_24 = arith.constant 0 : index
    %32 = vector.load %arg3[%c0_23, %c0_24] : memref<1x512xf32, #tpu.memory_space<vmem>>, vector<1x512xf32>
    %33 = vector.broadcast %32 : vector<1x512xf32> to vector<128x512xf32>
    %34 = arith.addf %31, %33 : vector<128x512xf32>
    %cst_25 = arith.constant 0.000000e+00 : f32
    %35 = vector.broadcast %cst_25 : f32 to vector<128x512xf32>
    %36 = arith.cmpf ogt, %34, %35 : vector<128x512xf32>
    %cst_26 = arith.constant 2.000000e-01 : f32
    %37 = vector.broadcast %cst_26 : f32 to vector<128x512xf32>
    %38 = arith.mulf %37, %34 : vector<128x512xf32>
    %39 = arith.select %36, %34, %38 : vector<128x512xi1>, vector<128x512xf32>
    %40 = vector.shape_cast %39 : vector<128x512xf32> to vector<16x8x512xf32>
    %c1_27 = arith.constant 1 : index
    %c0_28 = arith.constant 0 : index
    %c0_29 = arith.constant 0 : index
    %41 = vector.load %arg12[%c1_27, %c0_28, %c0_29] : memref<18x8x512xf32, #tpu.memory_space<vmem>>, vector<16x8x512xf32>
    tpu.vector_store %arg12[%c1_27, %c0_28, %c0_29], %40 {strides = array<i32>} : memref<18x8x512xf32, #tpu.memory_space<vmem>>, vector<16x8x512xf32>,
    %c0_30 = arith.constant 0 : index
    %c0_31 = arith.constant 0 : index
    %c0_32 = arith.constant 0 : index
    %42 = vector.load %arg12[%c0_30, %c0_31, %c0_32] : memref<18x8x512xf32, #tpu.memory_space<vmem>>, vector<18x8x512xf32>
    %43 = vector.shape_cast %42 : vector<18x8x512xf32> to vector<9x2x8x512xf32>
    %cst_33 = arith.constant 0.000000e+00 : f32
    %44 = vector.broadcast %cst_33 : f32 to vector<64x512xf32>
    %45 = vector.extract_strided_slice %43 {offsets = [0, 0, 0, 0], sizes = [8, 1, 8, 512], strides = [1, 1, 1, 1]} : vector<9x2x8x512xf32> to vector<8x1x8x512xf32>
    %46 = vector.shape_cast %45 : vector<8x1x8x512xf32> to vector<8x8x512xf32>
    %47 = vector.shape_cast %46 : vector<8x8x512xf32> to vector<64x512xf32>
    %48 = arith.truncf %47 : vector<64x512xf32> to vector<64x512xbf16>
    %c0_34 = arith.constant 0 : index
    %c0_35 = arith.constant 0 : index
    %c0_36 = arith.constant 0 : index
    %49 = vector.load %arg4[%c0_34, %c0_35, %c0_36] : memref<3x512x512xbf16, #tpu.memory_space<vmem>>, vector<1x512x512xbf16>
    %50 = vector.shape_cast %49 : vector<1x512x512xbf16> to vector<512x512xbf16>
    %cst_37 = arith.constant dense<0.000000e+00> : vector<64x512xf32>
    %51 = tpu.matmul %48, %50, %cst_37 {dimension_numbers = #tpu.dot_dimension_numbers<[1], [0], [0], [1], [0, 0, 1, 1], [], []>} : vector<64x512xbf16>, vector<512x512xbf16>, vector<64x512xf32> -> vector<64x512xf32>
    %52 = arith.addf %44, %51 : vector<64x512xf32>
    %53 = vector.extract_strided_slice %43 {offsets = [0, 1, 0, 0], sizes = [8, 1, 8, 512], strides = [1, 1, 1, 1]} : vector<9x2x8x512xf32> to vector<8x1x8x512xf32>
    %54 = vector.shape_cast %53 : vector<8x1x8x512xf32> to vector<8x8x512xf32>
    %55 = vector.shape_cast %54 : vector<8x8x512xf32> to vector<64x512xf32>
    %56 = arith.truncf %55 : vector<64x512xf32> to vector<64x512xbf16>
    %c1_38 = arith.constant 1 : index
    %c0_39 = arith.constant 0 : index
    %c0_40 = arith.constant 0 : index
    %57 = vector.load %arg4[%c1_38, %c0_39, %c0_40] : memref<3x512x512xbf16, #tpu.memory_space<vmem>>, vector<1x512x512xbf16>
    %58 = vector.shape_cast %57 : vector<1x512x512xbf16> to vector<512x512xbf16>
    %cst_41 = arith.constant dense<0.000000e+00> : vector<64x512xf32>
    %59 = tpu.matmul %56, %58, %cst_41 {dimension_numbers = #tpu.dot_dimension_numbers<[1], [0], [0], [1], [0, 0, 1, 1], [], []>} : vector<64x512xbf16>, vector<512x512xbf16>, vector<64x512xf32> -> vector<64x512xf32>
    %60 = arith.addf %52, %59 : vector<64x512xf32>
    %61 = vector.extract_strided_slice %43 {offsets = [1, 0, 0, 0], sizes = [8, 1, 8, 512], strides = [1, 1, 1, 1]} : vector<9x2x8x512xf32> to vector<8x1x8x512xf32>
    %62 = vector.shape_cast %61 : vector<8x1x8x512xf32> to vector<8x8x512xf32>
    %63 = vector.shape_cast %62 : vector<8x8x512xf32> to vector<64x512xf32>
    %64 = arith.truncf %63 : vector<64x512xf32> to vector<64x512xbf16>
    %c2_42 = arith.constant 2 : index
    %c0_43 = arith.constant 0 : index
    %c0_44 = arith.constant 0 : index
    %65 = vector.load %arg4[%c2_42, %c0_43, %c0_44] : memref<3x512x512xbf16, #tpu.memory_space<vmem>>, vector<1x512x512xbf16>
    %66 = vector.shape_cast %65 : vector<1x512x512xbf16> to vector<512x512xbf16>
    %cst_45 = arith.constant dense<0.000000e+00> : vector<64x512xf32>
    %67 = tpu.matmul %64, %66, %cst_45 {dimension_numbers = #tpu.dot_dimension_numbers<[1], [0], [0], [1], [0, 0, 1, 1], [], []>} : vector<64x512xbf16>, vector<512x512xbf16>, vector<64x512xf32> -> vector<64x512xf32>
    %68 = arith.addf %60, %67 : vector<64x512xf32>
    %c0_46 = arith.constant 0 : index
    %c0_47 = arith.constant 0 : index
    %69 = vector.load %arg5[%c0_46, %c0_47] : memref<1x512xf32, #tpu.memory_space<vmem>>, vector<1x512xf32>
    %70 = vector.broadcast %69 : vector<1x512xf32> to vector<64x512xf32>
    %71 = arith.addf %68, %70 : vector<64x512xf32>
    %cst_48 = arith.constant 0.000000e+00 : f32
    %72 = vector.broadcast %cst_48 : f32 to vector<64x512xf32>
    %73 = arith.cmpf ogt, %71, %72 : vector<64x512xf32>
    %cst_49 = arith.constant 2.000000e-01 : f32
    %74 = vector.broadcast %cst_49 : f32 to vector<64x512xf32>
    %75 = arith.mulf %74, %71 : vector<64x512xf32>
    %76 = arith.select %73, %71, %75 : vector<64x512xi1>, vector<64x512xf32>
    %77 = vector.shape_cast %76 : vector<64x512xf32> to vector<8x8x512xf32>
    %c1_50 = arith.constant 1 : index
    %c0_51 = arith.constant 0 : index
    %c0_52 = arith.constant 0 : index
    %78 = vector.load %arg13[%c1_50, %c0_51, %c0_52] : memref<10x8x512xf32, #tpu.memory_space<vmem>>, vector<8x8x512xf32>
    tpu.vector_store %arg13[%c1_50, %c0_51, %c0_52], %77 {strides = array<i32>} : memref<10x8x512xf32, #tpu.memory_space<vmem>>, vector<8x8x512xf32>,
    %c0_53 = arith.constant 0 : index
    %c0_54 = arith.constant 0 : index
    %c0_55 = arith.constant 0 : index
    %79 = vector.load %arg13[%c0_53, %c0_54, %c0_55] : memref<10x8x512xf32, #tpu.memory_space<vmem>>, vector<10x8x512xf32>
    %80 = vector.shape_cast %79 : vector<10x8x512xf32> to vector<5x2x8x512xf32>
    %cst_56 = arith.constant 0.000000e+00 : f32
    %81 = vector.broadcast %cst_56 : f32 to vector<32x512xf32>
    %82 = vector.extract_strided_slice %80 {offsets = [0, 0, 0, 0], sizes = [4, 1, 8, 512], strides = [1, 1, 1, 1]} : vector<5x2x8x512xf32> to vector<4x1x8x512xf32>
    %83 = vector.shape_cast %82 : vector<4x1x8x512xf32> to vector<4x8x512xf32>
    %84 = vector.shape_cast %83 : vector<4x8x512xf32> to vector<32x512xf32>
    %85 = arith.truncf %84 : vector<32x512xf32> to vector<32x512xbf16>
    %c0_57 = arith.constant 0 : index
    %c0_58 = arith.constant 0 : index
    %c0_59 = arith.constant 0 : index
    %86 = vector.load %arg6[%c0_57, %c0_58, %c0_59] : memref<3x512x512xbf16, #tpu.memory_space<vmem>>, vector<1x512x512xbf16>
    %87 = vector.shape_cast %86 : vector<1x512x512xbf16> to vector<512x512xbf16>
    %cst_60 = arith.constant dense<0.000000e+00> : vector<32x512xf32>
    %88 = tpu.matmul %85, %87, %cst_60 {dimension_numbers = #tpu.dot_dimension_numbers<[1], [0], [0], [1], [0, 0, 1, 1], [], []>} : vector<32x512xbf16>, vector<512x512xbf16>, vector<32x512xf32> -> vector<32x512xf32>
    %89 = arith.addf %81, %88 : vector<32x512xf32>
    %90 = vector.extract_strided_slice %80 {offsets = [0, 1, 0, 0], sizes = [4, 1, 8, 512], strides = [1, 1, 1, 1]} : vector<5x2x8x512xf32> to vector<4x1x8x512xf32>
    %91 = vector.shape_cast %90 : vector<4x1x8x512xf32> to vector<4x8x512xf32>
    %92 = vector.shape_cast %91 : vector<4x8x512xf32> to vector<32x512xf32>
    %93 = arith.truncf %92 : vector<32x512xf32> to vector<32x512xbf16>
    %c1_61 = arith.constant 1 : index
    %c0_62 = arith.constant 0 : index
    %c0_63 = arith.constant 0 : index
    %94 = vector.load %arg6[%c1_61, %c0_62, %c0_63] : memref<3x512x512xbf16, #tpu.memory_space<vmem>>, vector<1x512x512xbf16>
    %95 = vector.shape_cast %94 : vector<1x512x512xbf16> to vector<512x512xbf16>
    %cst_64 = arith.constant dense<0.000000e+00> : vector<32x512xf32>
    %96 = tpu.matmul %93, %95, %cst_64 {dimension_numbers = #tpu.dot_dimension_numbers<[1], [0], [0], [1], [0, 0, 1, 1], [], []>} : vector<32x512xbf16>, vector<512x512xbf16>, vector<32x512xf32> -> vector<32x512xf32>
    %97 = arith.addf %89, %96 : vector<32x512xf32>
    %98 = vector.extract_strided_slice %80 {offsets = [1, 0, 0, 0], sizes = [4, 1, 8, 512], strides = [1, 1, 1, 1]} : vector<5x2x8x512xf32> to vector<4x1x8x512xf32>
    %99 = vector.shape_cast %98 : vector<4x1x8x512xf32> to vector<4x8x512xf32>
    %100 = vector.shape_cast %99 : vector<4x8x512xf32> to vector<32x512xf32>
    %101 = arith.truncf %100 : vector<32x512xf32> to vector<32x512xbf16>
    %c2_65 = arith.constant 2 : index
    %c0_66 = arith.constant 0 : index
    %c0_67 = arith.constant 0 : index
    %102 = vector.load %arg6[%c2_65, %c0_66, %c0_67] : memref<3x512x512xbf16, #tpu.memory_space<vmem>>, vector<1x512x512xbf16>
    %103 = vector.shape_cast %102 : vector<1x512x512xbf16> to vector<512x512xbf16>
    %cst_68 = arith.constant dense<0.000000e+00> : vector<32x512xf32>
    %104 = tpu.matmul %101, %103, %cst_68 {dimension_numbers = #tpu.dot_dimension_numbers<[1], [0], [0], [1], [0, 0, 1, 1], [], []>} : vector<32x512xbf16>, vector<512x512xbf16>, vector<32x512xf32> -> vector<32x512xf32>
    %105 = arith.addf %97, %104 : vector<32x512xf32>
    %c0_69 = arith.constant 0 : index
    %c0_70 = arith.constant 0 : index
    %106 = vector.load %arg7[%c0_69, %c0_70] : memref<1x512xf32, #tpu.memory_space<vmem>>, vector<1x512xf32>
    %107 = vector.broadcast %106 : vector<1x512xf32> to vector<32x512xf32>
    %108 = arith.addf %105, %107 : vector<32x512xf32>
    %cst_71 = arith.constant 0.000000e+00 : f32
    %109 = vector.broadcast %cst_71 : f32 to vector<32x512xf32>
    %110 = arith.cmpf ogt, %108, %109 : vector<32x512xf32>
    %cst_72 = arith.constant 2.000000e-01 : f32
    %111 = vector.broadcast %cst_72 : f32 to vector<32x512xf32>
    %112 = arith.mulf %111, %108 : vector<32x512xf32>
    %113 = arith.select %110, %108, %112 : vector<32x512xi1>, vector<32x512xf32>
    %114 = vector.shape_cast %113 : vector<32x512xf32> to vector<4x8x512xf32>
    %cst_73 = arith.constant 0.000000e+00 : f32
    %115 = vector.broadcast %cst_73 : f32 to vector<8x10xf32>
    %116 = vector.extract_strided_slice %114 {offsets = [0, 0, 0], sizes = [1, 8, 512], strides = [1, 1, 1]} : vector<4x8x512xf32> to vector<1x8x512xf32>
    %117 = vector.shape_cast %116 : vector<1x8x512xf32> to vector<8x512xf32>
    %118 = arith.truncf %117 : vector<8x512xf32> to vector<8x512xbf16>
    %c0_74 = arith.constant 0 : index
    %c0_75 = arith.constant 0 : index
    %c0_76 = arith.constant 0 : index
    %119 = vector.load %arg8[%c0_74, %c0_75, %c0_76] : memref<4x512x10xbf16, #tpu.memory_space<vmem>>, vector<1x512x10xbf16>
    %120 = vector.shape_cast %119 : vector<1x512x10xbf16> to vector<512x10xbf16>
    %cst_77 = arith.constant dense<0.000000e+00> : vector<8x10xf32>
    %121 = tpu.matmul %118, %120, %cst_77 {dimension_numbers = #tpu.dot_dimension_numbers<[1], [0], [0], [1], [0, 0, 1, 1], [], []>} : vector<8x512xbf16>, vector<512x10xbf16>, vector<8x10xf32> -> vector<8x10xf32>
    %122 = arith.addf %115, %121 : vector<8x10xf32>
    %123 = vector.extract_strided_slice %114 {offsets = [1, 0, 0], sizes = [1, 8, 512], strides = [1, 1, 1]} : vector<4x8x512xf32> to vector<1x8x512xf32>
    %124 = vector.shape_cast %123 : vector<1x8x512xf32> to vector<8x512xf32>
    %125 = arith.truncf %124 : vector<8x512xf32> to vector<8x512xbf16>
    %c1_78 = arith.constant 1 : index
    %c0_79 = arith.constant 0 : index
    %c0_80 = arith.constant 0 : index
    %126 = vector.load %arg8[%c1_78, %c0_79, %c0_80] : memref<4x512x10xbf16, #tpu.memory_space<vmem>>, vector<1x512x10xbf16>
    %127 = vector.shape_cast %126 : vector<1x512x10xbf16> to vector<512x10xbf16>
    %cst_81 = arith.constant dense<0.000000e+00> : vector<8x10xf32>
    %128 = tpu.matmul %125, %127, %cst_81 {dimension_numbers = #tpu.dot_dimension_numbers<[1], [0], [0], [1], [0, 0, 1, 1], [], []>} : vector<8x512xbf16>, vector<512x10xbf16>, vector<8x10xf32> -> vector<8x10xf32>
    %129 = arith.addf %122, %128 : vector<8x10xf32>
    %130 = vector.extract_strided_slice %114 {offsets = [2, 0, 0], sizes = [1, 8, 512], strides = [1, 1, 1]} : vector<4x8x512xf32> to vector<1x8x512xf32>
    %131 = vector.shape_cast %130 : vector<1x8x512xf32> to vector<8x512xf32>
    %132 = arith.truncf %131 : vector<8x512xf32> to vector<8x512xbf16>
    %c2_82 = arith.constant 2 : index
    %c0_83 = arith.constant 0 : index
    %c0_84 = arith.constant 0 : index
    %133 = vector.load %arg8[%c2_82, %c0_83, %c0_84] : memref<4x512x10xbf16, #tpu.memory_space<vmem>>, vector<1x512x10xbf16>
    %134 = vector.shape_cast %133 : vector<1x512x10xbf16> to vector<512x10xbf16>
    %cst_85 = arith.constant dense<0.000000e+00> : vector<8x10xf32>
    %135 = tpu.matmul %132, %134, %cst_85 {dimension_numbers = #tpu.dot_dimension_numbers<[1], [0], [0], [1], [0, 0, 1, 1], [], []>} : vector<8x512xbf16>, vector<512x10xbf16>, vector<8x10xf32> -> vector<8x10xf32>
    %136 = arith.addf %129, %135 : vector<8x10xf32>
    %137 = vector.extract_strided_slice %114 {offsets = [3, 0, 0], sizes = [1, 8, 512], strides = [1, 1, 1]} : vector<4x8x512xf32> to vector<1x8x512xf32>
    %138 = vector.shape_cast %137 : vector<1x8x512xf32> to vector<8x512xf32>
    %139 = arith.truncf %138 : vector<8x512xf32> to vector<8x512xbf16>
    %c3 = arith.constant 3 : index
    %c0_86 = arith.constant 0 : index
    %c0_87 = arith.constant 0 : index
    %140 = vector.load %arg8[%c3, %c0_86, %c0_87] : memref<4x512x10xbf16, #tpu.memory_space<vmem>>, vector<1x512x10xbf16>
    %141 = vector.shape_cast %140 : vector<1x512x10xbf16> to vector<512x10xbf16>
    %cst_88 = arith.constant dense<0.000000e+00> : vector<8x10xf32>
    %142 = tpu.matmul %139, %141, %cst_88 {dimension_numbers = #tpu.dot_dimension_numbers<[1], [0], [0], [1], [0, 0, 1, 1], [], []>} : vector<8x512xbf16>, vector<512x10xbf16>, vector<8x10xf32> -> vector<8x10xf32>
    %143 = arith.addf %136, %142 : vector<8x10xf32>
    %c0_89 = arith.constant 0 : index
    %c0_90 = arith.constant 0 : index
    %144 = vector.load %arg9[%c0_89, %c0_90] : memref<1x10xf32, #tpu.memory_space<vmem>>, vector<1x10xf32>
    %145 = vector.broadcast %144 : vector<1x10xf32> to vector<8x10xf32>
    %146 = arith.addf %143, %145 : vector<8x10xf32>
    %c0_91 = arith.constant 0 : index
    %c0_92 = arith.constant 0 : index
    %147 = vector.load %arg10[%c0_91, %c0_92] : memref<8x10xf32, #tpu.memory_space<vmem>>, vector<8x10xf32>
    tpu.vector_store %arg10[%c0_91, %c0_92], %146 {strides = array<i32>} : memref<8x10xf32, #tpu.memory_space<vmem>>, vector<8x10xf32>,
    %cst_93 = arith.constant dense<0xFF800000> : vector<8xf32>
    %148 = vector.multi_reduction <maximumf>, %146, %cst_93 [1] : vector<8x10xf32> to vector<8xf32>
    %149 = vector.shape_cast %148 : vector<8xf32> to vector<8x1xf32>
    %150 = vector.broadcast %149 : vector<8x1xf32> to vector<8x10xf32>
    %151 = arith.subf %146, %150 : vector<8x10xf32>
    %152 = math.exp %151 : vector<8x10xf32>
    %cst_94 = arith.constant dense<0.000000e+00> : vector<8xf32>
    %153 = vector.multi_reduction <add>, %152, %cst_94 [1] : vector<8x10xf32> to vector<8xf32>
    %154 = vector.shape_cast %153 : vector<8xf32> to vector<8x1xf32>
    %155 = math.log %154 : vector<8x1xf32>
    %156 = arith.addf %149, %155 : vector<8x1xf32>
    %cst_95 = arith.constant 0.000000e+00 : f32
    %157 = vector.broadcast %cst_95 : f32 to vector<8x1xf32>
    %158 = arith.subf %157, %156 : vector<8x1xf32>
    %159 = math.exp %158 : vector<8x1xf32>
    %cst_96 = arith.constant 1.000000e+00 : f32
    %160 = vector.broadcast %cst_96 : f32 to vector<8x1xf32>
    %161 = arith.addf %160, %159 : vector<8x1xf32>
    %cst_97 = arith.constant 1.000000e+00 : f32
    %162 = vector.broadcast %cst_97 : f32 to vector<8x1xf32>
    %163 = arith.divf %162, %161 : vector<8x1xf32>
    %c0_98 = arith.constant 0 : index
    %c0_99 = arith.constant 0 : index
    %164 = vector.load %arg11[%c0_98, %c0_99] : memref<8x1xf32, #tpu.memory_space<vmem>>, vector<8x1xf32>
    tpu.vector_store %arg11[%c0_98, %c0_99], %163 {strides = array<i32>} : memref<8x1xf32, #tpu.memory_space<vmem>>, vector<8x1xf32>,
    return
  }
  func.func @transform_0(%arg0: i32) -> (i32, i32, i32) {
    %c0_i32 = arith.constant 0 : i32
    %c0_i32_0 = arith.constant 0 : i32
    %c0_i32_1 = arith.constant 0 : i32
    return %c0_i32, %arg0, %c0_i32_0 : i32, i32, i32
  }
  func.func @transform_1(%arg0: i32) -> (i32, i32, i32) {
    %c0_i32 = arith.constant 0 : i32
    %c0_i32_0 = arith.constant 0 : i32
    %c0_i32_1 = arith.constant 0 : i32
    %c0_i32_2 = arith.constant 0 : i32
    return %c0_i32, %c0_i32_0, %c0_i32_1 : i32, i32, i32
  }
  func.func @transform_2(%arg0: i32) -> (i32, i32) {
    %c0_i32 = arith.constant 0 : i32
    %c0_i32_0 = arith.constant 0 : i32
    %c0_i32_1 = arith.constant 0 : i32
    return %c0_i32, %c0_i32_0 : i32, i32
  }
  func.func @transform_3(%arg0: i32) -> (i32, i32, i32) {
    %c0_i32 = arith.constant 0 : i32
    %c0_i32_0 = arith.constant 0 : i32
    %c0_i32_1 = arith.constant 0 : i32
    %c0_i32_2 = arith.constant 0 : i32
    return %c0_i32, %c0_i32_0, %c0_i32_1 : i32, i32, i32
  }
  func.func @transform_4(%arg0: i32) -> (i32, i32) {
    %c0_i32 = arith.constant 0 : i32
    %c0_i32_0 = arith.constant 0 : i32
    %c0_i32_1 = arith.constant 0 : i32
    return %c0_i32, %c0_i32_0 : i32, i32
  }
  func.func @transform_5(%arg0: i32) -> (i32, i32, i32) {
    %c0_i32 = arith.constant 0 : i32
    %c0_i32_0 = arith.constant 0 : i32
    %c0_i32_1 = arith.constant 0 : i32
    %c0_i32_2 = arith.constant 0 : i32
    return %c0_i32, %c0_i32_0, %c0_i32_1 : i32, i32, i32
  }
  func.func @transform_6(%arg0: i32) -> (i32, i32) {
    %c0_i32 = arith.constant 0 : i32
    %c0_i32_0 = arith.constant 0 : i32
    %c0_i32_1 = arith.constant 0 : i32
    return %c0_i32, %c0_i32_0 : i32, i32
  }
  func.func @transform_7(%arg0: i32) -> (i32, i32, i32) {
    %c0_i32 = arith.constant 0 : i32
    %c0_i32_0 = arith.constant 0 : i32
    %c0_i32_1 = arith.constant 0 : i32
    %c0_i32_2 = arith.constant 0 : i32
    return %c0_i32, %c0_i32_0, %c0_i32_1 : i32, i32, i32
  }
  func.func @transform_8(%arg0: i32) -> (i32, i32) {
    %c0_i32 = arith.constant 0 : i32
    %c0_i32_0 = arith.constant 0 : i32
    %c0_i32_1 = arith.constant 0 : i32
    return %c0_i32, %c0_i32_0 : i32, i32
  }
  func.func @transform_9(%arg0: i32) -> (i32, i32) {
    %c0_i32 = arith.constant 0 : i32
    %c0_i32_0 = arith.constant 0 : i32
    return %arg0, %c0_i32 : i32, i32
  }
  func.func @transform_10(%arg0: i32) -> (i32, i32) {
    %c0_i32 = arith.constant 0 : i32
    %c0_i32_0 = arith.constant 0 : i32
    return %arg0, %c0_i32 : i32, i32
  }
}

</mosaic_0001>

<bundles_post_ra>
// kernel: discriminator_forward.1
= control target key start
LH: loop header
LB: loop body
LE: loop exit
PB: predicated region body
PF: predicated region fallthrough
CT: control target
= control target key end

     0   :  { %16 = vsyncpa [#allocation5], 0  ;;  %s14555_s0 = inlined_call_operand.vmem [shape: f32[34,8,32], index: 0, kind: input, shape index: {}]   ;;  %s14556_s1 = inlined_call_operand.hbm [shape: bf16[3,32,512], index: 1, kind: input, shape index: {}]   ;;  %s14557_s2 = inlined_call_operand.hbm [shape: f32[1,512], index: 2, kind: input, shape index: {}]   ;;  %s14558_s3 = inlined_call_operand.hbm [shape: bf16[3,512,512], index: 3, kind: input, shape index: {}]   ;;  %s14559_s4 = inlined_call_operand.hbm [shape: f32[1,512], index: 4, kind: input, shape index: {}]   ;;  %s14560_s5 = inlined_call_operand.hbm [shape: bf16[3,512,512], index: 5, kind: input, shape index: {}]   ;;  %s14561_s6 = inlined_call_operand.hbm [shape: f32[1,512], index: 6, kind: input, shape index: {}]   ;;  %s14562_s7 = inlined_call_operand.vmem [shape: bf16[4,512,10], index: 7, kind: input, shape index: {}]   ;;  %s14563_s8 = inlined_call_operand.hbm [shape: f32[1,10], index: 8, kind: input, shape index: {}]   ;;  %s14564_s9 = inlined_call_operand.vmem [shape: f32[8,10], index: 9, kind: output, shape index: {0}]   ;;  %s14565_s10 = inlined_call_operand.vmem [shape: f32[8,1], index: 10, kind: output, shape index: {1}]  }
   0x1   :  { %17 = vsyncpa [#allocation7], 0 }
   0x2   :  { %18 = vsyncpa [#allocation10], 0 }
   0x3   :  { %19 = vsyncpa [#allocation13], 0  ;;  %s12727_s13 = smov [#allocation6]   ;;  %s12728_s15 = smov [#allocation9]  }
   0x4   :  { %s40_s14 = sshll.u32 %s12727_s13, 4  ;;  %s62_s16 = sshll.u32 %s12728_s15, 4  ;;  %s41_s14 = int_to_ptr.vmem [resolvable:$true] %s40_s14  ;;  %s63_s16 = int_to_ptr.vmem [resolvable:$true] %s62_s16 }
   0x5   :  { %s12565_s19 = scalar_lea.hbm %s14557_s2, 64 }
   0x6   :  { %p12566_p0 = scmp.ne.s32.totalorder %s14557_s2, %s12565_s19  ;;  %p12569_p1 = scmp.lt.u32.totalorder %s12565_s19, %s14557_s2 }
   0x8   :  { %p12571_p2 = pnand %p12569_p1, %p12566_p0 }
   0xa   :  { %12574 = shalt.err (!%p12571_p2)
}
   0xb   :  { %s12575_s24 = scalar_lea.vmem %s41_s14, 64  ;;  %p12580_p4 = scmp.lt.s32.totalorder %s41_s14, %s41_s14 }
   0xc   :  { %p12576_p3 = scmp.ne.s32.totalorder %s41_s14, %s12575_s24  ;;  %p12581_p5 = scmp.lt.s32.totalorder %s12575_s24, %s12575_s24 }
   0xe   :  { %p12582_p6 = por %p12581_p5, %p12580_p4 }
  0x10   :  { %p12583_p7 = pnand %p12582_p6, %p12576_p3 }
  0x12   :  { %12586 = shalt.err (!%p12583_p7)
}
  0x13   :  { %43 = dma.hbm_to_vmem [thread:$0]  %s14557_s2, 64, %s41_s14, [#allocation7]  }
  0x14   :  { %s12587_s29 = scalar_lea.hbm %s14559_s4, 64 }
  0x15   :  { %p12588_p8 = scmp.ne.s32.totalorder %s14559_s4, %s12587_s29  ;;  %p12591_p9 = scmp.lt.u32.totalorder %s12587_s29, %s14559_s4 }
  0x17   :  { %p12593_p10 = pnand %p12591_p9, %p12588_p8 }
  0x19   :  { %12596 = shalt.err (!%p12593_p10)
}
  0x1a   :  { %s12597_s15 = scalar_lea.vmem %s63_s16, 64  ;;  %p12602_p12 = scmp.lt.s32.totalorder %s63_s16, %s63_s16 }
  0x1b   :  { %p12598_p11 = scmp.ne.s32.totalorder %s63_s16, %s12597_s15  ;;  %p12603_p13 = scmp.lt.s32.totalorder %s12597_s15, %s12597_s15 }
  0x1d   :  { %p12604_p0 = por %p12603_p13, %p12602_p12 }
  0x1f   :  { %p12605_p1 = pnand %p12604_p0, %p12598_p11 }
  0x21   :  { %12608 = shalt.err (!%p12605_p1)
}
  0x22   :  { %65 = dma.hbm_to_vmem [thread:$0]  %s14559_s4, 64, %s63_s16, [#allocation10]  }
  0x23   :  { %s12729_s17 = smov [#allocation12]   ;;  %s12730_s19 = smov [#allocation4]  }
  0x24   :  { %s84_s18 = sshll.u32 %s12729_s17, 4  ;;  %s27_s20 = sshll.u32 %s12730_s19, 4  ;;  %s85_s18 = int_to_ptr.vmem [resolvable:$true] %s84_s18  ;;  %s12817_s20 = int_to_ptr.vmem [resolvable:$true] %s27_s20 }
  0x25   :  { %s12609_s23 = scalar_lea.hbm %s14561_s6, 64 }
  0x26   :  { %p12610_p2 = scmp.ne.s32.totalorder %s14561_s6, %s12609_s23  ;;  %p12613_p3 = scmp.lt.u32.totalorder %s12609_s23, %s14561_s6 }
  0x28   :  { %p12615_p4 = pnand %p12613_p3, %p12610_p2 }
  0x2a   :  { %12618 = shalt.err (!%p12615_p4)
}
  0x2b   :  { %s12619_s4 = scalar_lea.vmem %s85_s18, 64  ;;  %p12624_p6 = scmp.lt.s32.totalorder %s85_s18, %s85_s18 }
  0x2c   :  { %p12620_p5 = scmp.ne.s32.totalorder %s85_s18, %s12619_s4  ;;  %p12625_p7 = scmp.lt.s32.totalorder %s12619_s4, %s12619_s4 }
  0x2e   :  { %p12626_p8 = por %p12625_p7, %p12624_p6 }
  0x30   :  { %p12627_p9 = pnand %p12626_p8, %p12620_p5 }
  0x32   :  { %12630 = shalt.err (!%p12627_p9)
}
  0x33   :  { %87 = dma.hbm_to_vmem [thread:$0]  %s14561_s6, 64, %s85_s18, [#allocation13]  }
  0x34   :  { %s12631_s11 = scalar_lea.hbm %s14556_s1, 3072 }
  0x35   :  { %p12632_p10 = scmp.ne.s32.totalorder %s14556_s1, %s12631_s11  ;;  %p12635_p11 = scmp.lt.u32.totalorder %s12631_s11, %s14556_s1 }
  0x37   :  { %p12637_p12 = pnand %p12635_p11, %p12632_p10 }
  0x39   :  { %12640 = shalt.err (!%p12637_p12)
}
  0x3a   :  { %s12641_s14 = scalar_lea.vmem %s12817_s20, 3072  ;;  %p12646_p0 = scmp.lt.s32.totalorder %s12817_s20, %s12817_s20 }
  0x3b   :  { %p12642_p13 = scmp.ne.s32.totalorder %s12817_s20, %s12641_s14  ;;  %p12647_p1 = scmp.lt.s32.totalorder %s12641_s14, %s12641_s14 }
  0x3d   :  { %p12648_p2 = por %p12647_p1, %p12646_p0 }
  0x3f   :  { %p12649_p3 = pnand %p12648_p2, %p12642_p13 }
  0x41   :  { %12652 = shalt.err (!%p12649_p3)
}
  0x42   :  { %s12731_s6 = smov 256   ;;  %s12732_s17 = smov 16  }
  0x43   :  { %33 = dma.hbm_to_vmem [thread:$0]  %s14556_s1, 3072, %s12817_s20, [#allocation5], %s12731_s6, %s12731_s6, %s12732_s17  }
  0x44   :  { %s12733_s21 = smov [#allocation8]   ;;  %s12734_s23 = smov [#allocation11]  }
  0x45   :  { %s49_s22 = sshll.u32 %s12733_s21, 4  ;;  %s71_s24 = sshll.u32 %s12734_s23, 4  ;;  %s50_s22 = int_to_ptr.vmem [resolvable:$true] %s49_s22  ;;  %s12851_s24 = int_to_ptr.vmem [resolvable:$true] %s71_s24 }
  0x46   :  { %s12653_s27 = scalar_lea.hbm %s14558_s3, 49152 }
  0x47   :  { %p12654_p4 = scmp.ne.s32.totalorder %s14558_s3, %s12653_s27  ;;  %p12657_p5 = scmp.lt.u32.totalorder %s12653_s27, %s14558_s3 }
  0x49   :  { %p12659_p6 = pnand %p12657_p5, %p12654_p4 }
  0x4b   :  { %12662 = shalt.err (!%p12659_p6)
}
  0x4c   :  { %s12663_s1 = scalar_lea.vmem %s50_s22, 49152  ;;  %p12668_p8 = scmp.lt.s32.totalorder %s50_s22, %s50_s22 }
  0x4d   :  { %p12664_p7 = scmp.ne.s32.totalorder %s50_s22, %s12663_s1  ;;  %p12669_p9 = scmp.lt.s32.totalorder %s12663_s1, %s12663_s1 }
  0x4f   :  { %p12670_p10 = por %p12669_p9, %p12668_p8 }
  0x51   :  { %p12671_p11 = pnand %p12670_p10, %p12664_p7 }
  0x53   :  { %12674 = shalt.err (!%p12671_p11)
}
  0x54   :  { %55 = dma.hbm_to_vmem [thread:$0]  %s14558_s3, 49152, %s50_s22, [#allocation7], %s12731_s6, %s12731_s6, %s12732_s17  }
  0x55   :  { %s12675_s13 = scalar_lea.hbm %s14560_s5, 49152 }
  0x56   :  { %p12676_p12 = scmp.ne.s32.totalorder %s14560_s5, %s12675_s13  ;;  %p12679_p13 = scmp.lt.u32.totalorder %s12675_s13, %s14560_s5 }
  0x58   :  { %p12681_p0 = pnand %p12679_p13, %p12676_p12 }
  0x5a   :  { %12684 = shalt.err (!%p12681_p0)
}
  0x5b   :  { %s12685_s19 = scalar_lea.vmem %s12851_s24, 49152  ;;  %p12690_p2 = scmp.lt.s32.totalorder %s12851_s24, %s12851_s24 }
  0x5c   :  { %p12686_p1 = scmp.ne.s32.totalorder %s12851_s24, %s12685_s19  ;;  %p12691_p3 = scmp.lt.s32.totalorder %s12685_s19, %s12685_s19 }
  0x5e   :  { %p12692_p4 = por %p12691_p3, %p12690_p2 }
  0x60   :  { %p12693_p5 = pnand %p12692_p4, %p12686_p1 }
  0x62   :  { %12696 = shalt.err (!%p12693_p5)
}
  0x63   :  { %77 = dma.hbm_to_vmem [thread:$0]  %s14560_s5, 49152, %s12851_s24, [#allocation10], %s12731_s6, %s12731_s6, %s12732_s17  }
  0x64   :  { %s12735_s22 = smov [#allocation14]   ;;  %s12697_s27 = scalar_lea.hbm %s14563_s8, 16 }
  0x65   :  { %s96_s23 = sshll.u32 %s12735_s22, 4  ;;  %p12698_p6 = scmp.ne.s32.totalorder %s14563_s8, %s12697_s27  ;;  %s97_s23 = int_to_ptr.vmem [resolvable:$true] %s96_s23 }
  0x66   :  { %p12701_p7 = scmp.lt.u32.totalorder %s12697_s27, %s14563_s8 }
  0x68   :  { %p12703_p8 = pnand %p12701_p7, %p12698_p6 }
  0x6a   :  { %12706 = shalt.err (!%p12703_p8)
}
  0x6b   :  { %s12707_s1 = scalar_lea.vmem %s97_s23, 16  ;;  %s12711_s5 = scalar_lea.vmem %s97_s23, 32 }
  0x6c   :  { %p12708_p9 = scmp.ne.s32.totalorder %s97_s23, %s12707_s1  ;;  %p12712_p10 = scmp.lt.s32.totalorder %s97_s23, %s97_s23 }
  0x6d   :  { %p12713_p11 = scmp.lt.s32.totalorder %s12711_s5, %s12707_s1 }
  0x6f   :  { %p12714_p12 = por %p12713_p11, %p12712_p10 }
  0x71   :  { %p12715_p13 = pnand %p12714_p12, %p12708_p9 }
  0x73   :  { %12718 = shalt.err (!%p12715_p13)
}
  0x74   :  { %99 = dma.hbm_to_vmem [thread:$0]  %s14563_s8, 16, %s97_s23, [#allocation13]  }
  0x75   :  { %12719 = dma.done.wait [#allocation5], 3072  }
  0x76   :  { %12720 = vsyncadd [#allocation5], 4294964224 }
  0x77   :  { %12721 = dma.done.wait [#allocation7], 49216  }
  0x78   :  { %12722 = vsyncadd [#allocation7], 4294918080 }
  0x79   :  { %12723 = dma.done.wait [#allocation10], 49216  }
  0x7a   :  { %12724 = vsyncadd [#allocation10], 4294918080 }
  0x7b   :  { %12725 = dma.done.wait [#allocation13], 80  }
  0x7c   :  { %12726 = vsyncadd [#allocation13], 4294967216  ;;  %v12736_v0 = vmov 0   ;;  %v11241_v1 = vld [vmem:[#allocation4 + $0x44] ss:$16 sps:$4 sm:$0xff]   ;;  %v141_v9 = vld [vmem:[%s14555_s0 + $0x8] sm:$0xff] }
  0x7d   :  { %303 = vmatprep.mubr.bf16.mxu0 %v12736_v0  ;;  %416 = vmatprep.mubr.bf16.mxu1 %v12736_v0  ;;  %v11243_v2 = vld [vmem:[#allocation4 + $0x4c] ss:$16 sps:$4 sm:$0xff]   ;;  %v11245_v3 = vld [vmem:[#allocation4 + $0x40] ss:$16 sps:$4 sm:$0xff]   ;;  %v11246_v4 = vld [vmem:[#allocation4 + $0x48] ss:$16 sps:$4 sm:$0xff]  }
  0x7e   :  { %271 = vmatprep.subr.bf16.mxu0 %v11241_v1  ;;  %384 = vmatprep.subr.bf16.mxu1 %v11243_v2  ;;  %v11247_v5 = vld [vmem:[#allocation4 + $0x64] ss:$16 sps:$4 sm:$0xff]   ;;  %v11249_v6 = vld [vmem:[#allocation4 + $0x6c] ss:$16 sps:$4 sm:$0xff]   ;;  %v11251_v7 = vld [vmem:[#allocation4 + $0x60] ss:$16 sps:$4 sm:$0xff]  }
  0x7f   :  { %272 = vmatpush1.bf16.msra.mxu0 %v11245_v3  ;;  %385 = vmatpush1.bf16.msra.mxu1 %v11246_v4  ;;  %v11252_v8 = vld [vmem:[#allocation4 + $0x68] ss:$16 sps:$4 sm:$0xff]   ;;  %v11255_v12 = vld [vmem:[#allocation4 + $0x4] ss:$16 sps:$4 sm:$0xff]   ;;  %vm246_vm0 = vcmask 261120  }
  0x80   :  { %273 = vmatprep.subr.bf16.mxu0 %v11247_v5  ;;  %v143_v10 = vld [vmem:[%s14555_s0 + $0x18] sm:$0xff]  ;;  %386 = vmatprep.subr.bf16.mxu1 %v11249_v6  ;;  %v11253_v13 = vld [vmem:[#allocation4] ss:$16 sps:$4 sm:$0xff]   ;;  %v11258_v14 = vld [vmem:[#allocation4 + $0x24] ss:$16 sps:$4 sm:$0xff]  }
  0x81   :  { %v189_v11 = vpack.c.bf16 %v143_v10, %v141_v9  ;;  %v145_v15 = vld [vmem:[%s14555_s0 + $0x28] sm:$0xff]  ;;  %v147_v16 = vld [vmem:[%s14555_s0 + $0x38] sm:$0xff]  ;;  %v11256_v17 = vld [vmem:[#allocation4 + $0x20] ss:$16 sps:$4 sm:$0xff]  }
  0x82   :  { %v11259_v18 = vld [vmem:[#allocation4 + $0x8] ss:$16 sps:$4 sm:$0xff]   ;;  %v11261_v19 = vld [vmem:[#allocation4 + $0xc] ss:$16 sps:$4 sm:$0xff]   ;;  %v190_v20 = vpack.c.bf16 %v147_v16, %v145_v15  ;;  %v11267_v23 = vld [vmem:[#allocation4 + $0x84] ss:$16 sps:$4 sm:$0xff]  }
  0x83   :  { %274 = vmatpush1.bf16.msra.mxu0 %v11251_v7  ;;  %387 = vmatpush1.bf16.msra.mxu1 %v11252_v8  ;;  %v11264_v21 = vld [vmem:[#allocation4 + $0x2c] ss:$16 sps:$4 sm:$0xff]   ;;  %v11262_v22 = vld [vmem:[#allocation4 + $0x28] ss:$16 sps:$4 sm:$0xff]   ;;  %v140_v43 = vld [vmem:[%s14555_s0] sm:$0xff] }
  0x84   :  { %561 = vmatprep.subr.bf16.mxu0 %v11255_v12  ;;  %674 = vmatprep.subr.bf16.mxu1 %v11261_v19  ;;  %v149_v24 = vld [vmem:[%s14555_s0 + $0x48] sm:$0xff]  ;;  %v151_v25 = vld [vmem:[%s14555_s0 + $0x58] sm:$0xff]  ;;  %v12988_v44 = vld [vmem:[%s14555_s0 + $0x10] sm:$0xff] }
  0x85   :  { %v191_v26 = vpack.c.bf16 %v151_v25, %v149_v24  ;;  %v11273_v27 = vld [vmem:[#allocation4 + $0x8c] ss:$16 sps:$4 sm:$0xff]   ;;  %v173_v45 = vpack.c.bf16 %v12988_v44, %v140_v43  ;;  %v11265_v46 = vld [vmem:[#allocation4 + $0x80] ss:$16 sps:$4 sm:$0xff]   ;;  %v11270_v47 = vld [vmem:[#allocation4 + $0xa4] ss:$16 sps:$4 sm:$0xff]  }
  0x86   :  { %9533 = vmatmul.mubr.msk.bf16.vlgmr.msra.gmra.mrb[0].mxu0 %vm246_vm0, %v189_v11  ;;  %9541 = vmatmul.mubr.msk.bf16.vlgmr.msra.gmra.mrb[0].mxu1 %vm246_vm0, %v189_v11  ;;  %v153_v28 = vld [vmem:[%s14555_s0 + $0x68] sm:$0xff]  ;;  %v155_v29 = vld [vmem:[%s14555_s0 + $0x78] sm:$0xff]  ;;  %v144_v50 = vld [vmem:[%s14555_s0 + $0x20] sm:$0xff] }
  0x87   :  { %562 = vmatpush1.bf16.msra.mxu0 %v11253_v13  ;;  %313 = vmatprep.mubr.bf16.mxu0 %v12736_v0  ;;  %v192_v30 = vpack.c.bf16 %v155_v29, %v153_v28  ;;  %v157_v31 = vld [vmem:[%s14555_s0 + $0x88] sm:$0xff]  ;;  %v159_v32 = vld [vmem:[%s14555_s0 + $0x98] sm:$0xff]  ;;  %v13000_v51 = vld [vmem:[%s14555_s0 + $0x30] sm:$0xff]  ;;  %v787_v12 = vpack.c.bf16 %v144_v50, %v12988_v44 }
  0x88   :  { %426 = vmatprep.mubr.bf16.mxu1 %v12736_v0  ;;  %563 = vmatprep.subr.bf16.mxu0 %v11258_v14  ;;  %v193_v33 = vpack.c.bf16 %v159_v32, %v157_v31  ;;  %v161_v34 = vld [vmem:[%s14555_s0 + $0xa8] sm:$0xff]  ;;  %v163_v35 = vld [vmem:[%s14555_s0 + $0xb8] sm:$0xff]  ;;  %v11268_v52 = vld [vmem:[#allocation4 + $0xa0] ss:$16 sps:$4 sm:$0xff]   ;;  %v174_v55 = vpack.c.bf16 %v13000_v51, %v144_v50 }
  0x89   :  { %675 = vmatpush1.bf16.msra.mxu1 %v11259_v18  ;;  %v194_v36 = vpack.c.bf16 %v163_v35, %v161_v34  ;;  %v165_v37 = vld [vmem:[%s14555_s0 + $0xc8] sm:$0xff]  ;;  %v167_v38 = vld [vmem:[%s14555_s0 + $0xd8] sm:$0xff]  ;;  %v11282_v56 = vld [vmem:[#allocation8 + $0x40c] ss:$16 sps:$4 sm:$0xff]  }
  0x8a   :  { %676 = vmatprep.subr.bf16.mxu1 %v11264_v21  ;;  %v195_v39 = vpack.c.bf16 %v167_v38, %v165_v37  ;;  %v169_v40 = vld [vmem:[%s14555_s0 + $0xe8] sm:$0xff]  ;;  %v171_v41 = vld [vmem:[%s14555_s0 + $0xf8] sm:$0xff]  ;;  %v13007_v57 = vld [vmem:[%s14555_s0 + $0x40] sm:$0xff] }
  0x8b   :  { %564 = vmatpush1.bf16.msra.mxu0 %v11256_v17  ;;  %v196_v42 = vpack.c.bf16 %v171_v41, %v169_v40  ;;  %v11271_v48 = vld [vmem:[#allocation4 + $0x88] ss:$16 sps:$4 sm:$0xff]   ;;  %v11276_v49 = vld [vmem:[#allocation4 + $0xac] ss:$16 sps:$4 sm:$0xff]   ;;  %v13012_v58 = vld [vmem:[%s14555_s0 + $0x50] sm:$0xff]  ;;  %v788_v21 = vpack.c.bf16 %v13007_v57, %v13000_v51 }
  0x8c   :  { %868 = vmatprep.subr.bf16.mxu0 %v11267_v23  ;;  %v11279_v53 = vld [vmem:[#allocation8 + $0x404] ss:$16 sps:$4 sm:$0xff]   ;;  %v175_v59 = vpack.c.bf16 %v13012_v58, %v13007_v57  ;;  %v13023_v60 = vld [vmem:[%s14555_s0 + $0x60] sm:$0xff]  ;;  %v13028_v61 = vld [vmem:[%s14555_s0 + $0x70] sm:$0xff] }
  0x8d   :  { %677 = vmatpush1.bf16.msra.mxu1 %v11262_v22  ;;  %v11274_v54 = vld [vmem:[#allocation4 + $0xa8] ss:$16 sps:$4 sm:$0xff]   ;;  %v176_v62 = vpack.c.bf16 %v13028_v61, %v13023_v60  ;;  %v13039_v63 = vld [vmem:[%s14555_s0 + $0x80] sm:$0xff]  ;;  %v13044_v1 = vld [vmem:[%s14555_s0 + $0x90] sm:$0xff] }
  0x8e   :  { %9534 = vmatmul.mubr.msk.bf16.gmra.mrb[4].mxu0 %vm246_vm0, %v190_v20  ;;  %9542 = vmatmul.mubr.msk.bf16.gmra.mrb[4].mxu1 %vm246_vm0, %v190_v20  ;;  %v177_v2 = vpack.c.bf16 %v13044_v1, %v13039_v63  ;;  %v13055_v3 = vld [vmem:[%s14555_s0 + $0xa0] sm:$0xff]  ;;  %v13060_v4 = vld [vmem:[%s14555_s0 + $0xb0] sm:$0xff]  ;;  %v11280_v14 = vld [vmem:[#allocation8 + $0x408] ss:$16 sps:$4 sm:$0xff]  }
  0x8f   :  { %323 = vmatprep.mubr.bf16.mxu0 %v12736_v0  ;;  %436 = vmatprep.mubr.bf16.mxu1 %v12736_v0  ;;  %v178_v5 = vpack.c.bf16 %v13060_v4, %v13055_v3  ;;  %v13071_v6 = vld [vmem:[%s14555_s0 + $0xc0] sm:$0xff]  ;;  %v13076_v7 = vld [vmem:[%s14555_s0 + $0xd0] sm:$0xff]  ;;  %v11285_v15 = vld [vmem:[#allocation8 + $0x424] ss:$16 sps:$4 sm:$0xff]  }
  0x90   :  { %981 = vmatprep.subr.bf16.mxu1 %v11273_v27  ;;  %v179_v8 = vpack.c.bf16 %v13076_v7, %v13071_v6  ;;  %v13087_v9 = vld [vmem:[%s14555_s0 + $0xe0] sm:$0xff]  ;;  %v13092_v10 = vld [vmem:[%s14555_s0 + $0xf0] sm:$0xff]  ;;  %v11286_v18 = vld [vmem:[#allocation8 + $0x428] ss:$16 sps:$4 sm:$0xff]   ;;  %v792_v57 = vpack.c.bf16 %v13071_v6, %v13060_v4 }
  0x91   :  { %v180_v11 = vpack.c.bf16 %v13092_v10, %v13087_v9  ;;  %v11277_v13 = vld [vmem:[#allocation8 + $0x400] ss:$16 sps:$4 sm:$0xff]   ;;  %v11288_v16 = vld [vmem:[#allocation8 + $0x42c] ss:$16 sps:$4 sm:$0xff]   ;;  %v11291_v19 = vld [vmem:[#allocation8 + $0x444] ss:$16 sps:$4 sm:$0xff]  }
  0x92   :  { %v11283_v17 = vld [vmem:[#allocation8 + $0x420] ss:$16 sps:$4 sm:$0xff]   ;;  %v11294_v20 = vld [vmem:[#allocation8 + $0x44c] ss:$16 sps:$4 sm:$0xff]   ;;  %v11292_v23 = vld [vmem:[#allocation8 + $0x448] ss:$16 sps:$4 sm:$0xff]  }
  0x93   :  { %v11289_v22 = vld [vmem:[#allocation8 + $0x440] ss:$16 sps:$4 sm:$0xff]   ;;  %v11297_v24 = vld [vmem:[#allocation8 + $0x464] ss:$16 sps:$4 sm:$0xff]   ;;  %v11300_v25 = vld [vmem:[#allocation8 + $0x46c] ss:$16 sps:$4 sm:$0xff]  }
  0x94   :  { %v11298_v27 = vld [vmem:[#allocation8 + $0x468] ss:$16 sps:$4 sm:$0xff]   ;;  %v11303_v28 = vld [vmem:[#allocation8 + $0x484] ss:$16 sps:$4 sm:$0xff]   ;;  %v11306_v29 = vld [vmem:[#allocation8 + $0x48c] ss:$16 sps:$4 sm:$0xff]  }
  0x95   :  { %v11301_v31 = vld [vmem:[#allocation8 + $0x480] ss:$16 sps:$4 sm:$0xff]   ;;  %v11304_v32 = vld [vmem:[#allocation8 + $0x488] ss:$16 sps:$4 sm:$0xff]   ;;  %v11312_v34 = vld [vmem:[#allocation8 + $0x4ac] ss:$16 sps:$4 sm:$0xff]  }
  0x96   :  { %9535 = vmatmul.mubr.msk.bf16.gmra.mrb[8].mxu0 %vm246_vm0, %v191_v26  ;;  %9543 = vmatmul.mubr.msk.bf16.gmra.mrb[8].mxu1 %vm246_vm0, %v191_v26  ;;  %v11295_v26 = vld [vmem:[#allocation8 + $0x460] ss:$16 sps:$4 sm:$0xff]   ;;  %v11315_v37 = vld [vmem:[#allocation8 + $0x4c4] ss:$16 sps:$4 sm:$0xff]   ;;  %v11318_v38 = vld [vmem:[#allocation8 + $0x4cc] ss:$16 sps:$4 sm:$0xff]  }
  0x97   :  { %333 = vmatprep.mubr.bf16.mxu0 %v12736_v0  ;;  %446 = vmatprep.mubr.bf16.mxu1 %v12736_v0  ;;  %v11307_v35 = vld [vmem:[#allocation8 + $0x4a0] ss:$16 sps:$4 sm:$0xff]   ;;  %v11316_v41 = vld [vmem:[#allocation8 + $0x4c8] ss:$16 sps:$4 sm:$0xff]   ;;  %v11324_v43 = vld [vmem:[#allocation8 + $0x4ec] ss:$16 sps:$4 sm:$0xff]  }
  0x98   :  { %v11313_v40 = vld [vmem:[#allocation8 + $0x4c0] ss:$16 sps:$4 sm:$0xff]   ;;  %v11328_v50 = vld [vmem:[#allocation8 + $0x508] ss:$16 sps:$4 sm:$0xff]   ;;  %v11333_v51 = vld [vmem:[#allocation8 + $0x524] ss:$16 sps:$4 sm:$0xff]  }
  0x99   :  { %v11319_v44 = vld [vmem:[#allocation8 + $0x4e0] ss:$16 sps:$4 sm:$0xff]   ;;  %v11351_v4 = vld [vmem:[#allocation8 + $0x584] ss:$16 sps:$4 sm:$0xff]  }
  0x9a   :  { %v11349_v6 = vld [vmem:[#allocation8 + $0x580] ss:$16 sps:$4 sm:$0xff]  }
  0x9e   :  { %9536 = vmatmul.mubr.msk.bf16.gmra.mrb[12].mxu0 %vm246_vm0, %v192_v30  ;;  %9544 = vmatmul.mubr.msk.bf16.gmra.mrb[12].mxu1 %vm246_vm0, %v192_v30  ;;  %v789_v30 = vpack.c.bf16 %v13023_v60, %v13012_v58  ;;  %v11337_v58 = vld [vmem:[#allocation8 + $0x540] ss:$16 sps:$4 sm:$0xff]   ;;  %v11345_v60 = vld [vmem:[#allocation8 + $0x564] ss:$16 sps:$4 sm:$0xff]  }
  0x9f   :  { %343 = vmatprep.mubr.bf16.mxu0 %v12736_v0  ;;  %456 = vmatprep.mubr.bf16.mxu1 %v12736_v0 }
  0xa6   :  { %9537 = vmatmul.mubr.msk.bf16.gmra.mrb[16].mxu0 %vm246_vm0, %v193_v33  ;;  %9545 = vmatmul.mubr.msk.bf16.gmra.mrb[16].mxu1 %vm246_vm0, %v193_v33  ;;  %v11309_v33 = vld [vmem:[#allocation8 + $0x4a4] ss:$16 sps:$4 sm:$0xff]  }
  0xa7   :  { %353 = vmatprep.mubr.bf16.mxu0 %v12736_v0  ;;  %466 = vmatprep.mubr.bf16.mxu1 %v12736_v0 }
  0xae   :  { %9538 = vmatmul.mubr.msk.bf16.gmra.mrb[20].mxu0 %vm246_vm0, %v194_v36  ;;  %9546 = vmatmul.mubr.msk.bf16.gmra.mrb[20].mxu1 %vm246_vm0, %v194_v36  ;;  %v11310_v36 = vld [vmem:[#allocation8 + $0x4a8] ss:$16 sps:$4 sm:$0xff]  }
  0xaf   :  { %363 = vmatprep.mubr.bf16.mxu0 %v12736_v0  ;;  %476 = vmatprep.mubr.bf16.mxu1 %v12736_v0 }
  0xb6   :  { %9539 = vmatmul.mubr.msk.bf16.gmra.mrb[24].mxu0 %vm246_vm0, %v195_v39  ;;  %9547 = vmatmul.mubr.msk.bf16.gmra.mrb[24].mxu1 %vm246_vm0, %v195_v39  ;;  %v790_v39 = vpack.c.bf16 %v13039_v63, %v13028_v61  ;;  %v11348_v61 = vld [vmem:[#allocation8 + $0x56c] ss:$16 sps:$4 sm:$0xff]   ;;  %v11346_v63 = vld [vmem:[#allocation8 + $0x568] ss:$16 sps:$4 sm:$0xff]  }
  0xb7   :  { %373 = vmatprep.mubr.bf16.mxu0 %v12736_v0  ;;  %486 = vmatprep.mubr.bf16.mxu1 %v12736_v0 }
  0xbe   :  { %9540 = vmatmul.mubr.msk.bf16.gmra.mrb[28].mxu0 %vm246_vm0, %v196_v42  ;;  %9548 = vmatmul.mubr.msk.bf16.gmra.mrb[28].mxu1 %vm246_vm0, %v196_v42  ;;  %v11321_v42 = vld [vmem:[#allocation8 + $0x4e4] ss:$16 sps:$4 sm:$0xff]  }
  0xbf   :  { %593 = vmatprep.mubr.bf16.mxu0 %v12736_v0  ;;  %706 = vmatprep.mubr.bf16.mxu1 %v12736_v0 }
  0xc6   :  { %9557 = vmatmul.mubr.msk.bf16.vlgmr.msra.gmra.mrb[0].mxu0 %vm246_vm0, %v173_v45  ;;  %9565 = vmatmul.mubr.msk.bf16.vlgmr.msra.gmra.mrb[0].mxu1 %vm246_vm0, %v173_v45  ;;  %v11322_v45 = vld [vmem:[#allocation8 + $0x4e8] ss:$16 sps:$4 sm:$0xff]  }
  0xc7   :  { %869 = vmatpush1.bf16.msra.mxu0 %v11265_v46  ;;  %603 = vmatprep.mubr.bf16.mxu0 %v12736_v0  ;;  %v11327_v46 = vld [vmem:[#allocation8 + $0x504] ss:$16 sps:$4 sm:$0xff]  }
  0xc8   :  { %716 = vmatprep.mubr.bf16.mxu1 %v12736_v0  ;;  %870 = vmatprep.subr.bf16.mxu0 %v11270_v47  ;;  %v11330_v47 = vld [vmem:[#allocation8 + $0x50c] ss:$16 sps:$4 sm:$0xff]  }
  0xc9   :  { %982 = vmatpush1.bf16.msra.mxu1 %v11271_v48  ;;  %v791_v48 = vpack.c.bf16 %v13055_v3, %v13044_v1  ;;  %v793_v1 = vpack.c.bf16 %v13087_v9, %v13076_v7  ;;  %v11352_v7 = vld [vmem:[#allocation8 + $0x588] ss:$16 sps:$4 sm:$0xff]   ;;  %v11360_v9 = vld [vmem:[#allocation8 + $0x5ac] ss:$16 sps:$4 sm:$0xff]  }
  0xca   :  { %983 = vmatprep.subr.bf16.mxu1 %v11276_v49  ;;  %v11325_v49 = vld [vmem:[#allocation8 + $0x500] ss:$16 sps:$4 sm:$0xff]  }
  0xcb   :  { %871 = vmatpush1.bf16.msra.mxu0 %v11268_v52  ;;  %v11336_v52 = vld [vmem:[#allocation8 + $0x52c] ss:$16 sps:$4 sm:$0xff]  }
  0xcc   :  { %2498 = vmatprep.subr.bf16.mxu0 %v11279_v53  ;;  %v11331_v53 = vld [vmem:[#allocation8 + $0x520] ss:$16 sps:$4 sm:$0xff]  }
  0xcd   :  { %984 = vmatpush1.bf16.msra.mxu1 %v11274_v54  ;;  %v11334_v54 = vld [vmem:[#allocation8 + $0x528] ss:$16 sps:$4 sm:$0xff]  }
  0xce   :  { %9558 = vmatmul.mubr.msk.bf16.gmra.mrb[4].mxu0 %vm246_vm0, %v174_v55  ;;  %9566 = vmatmul.mubr.msk.bf16.gmra.mrb[4].mxu1 %vm246_vm0, %v174_v55  ;;  %v11339_v55 = vld [vmem:[#allocation8 + $0x544] ss:$16 sps:$4 sm:$0xff]  }
  0xcf   :  { %613 = vmatprep.mubr.bf16.mxu0 %v12736_v0  ;;  %726 = vmatprep.mubr.bf16.mxu1 %v12736_v0 }
  0xd0   :  { %2644 = vmatprep.subr.bf16.mxu1 %v11282_v56  ;;  %v11342_v56 = vld [vmem:[#allocation8 + $0x54c] ss:$16 sps:$4 sm:$0xff]  }
  0xd6   :  { %9559 = vmatmul.mubr.msk.bf16.gmra.mrb[8].mxu0 %vm246_vm0, %v175_v59  ;;  %9567 = vmatmul.mubr.msk.bf16.gmra.mrb[8].mxu1 %vm246_vm0, %v175_v59  ;;  %v11340_v59 = vld [vmem:[#allocation8 + $0x548] ss:$16 sps:$4 sm:$0xff]  }
  0xd7   :  { %623 = vmatprep.mubr.bf16.mxu0 %v12736_v0  ;;  %736 = vmatprep.mubr.bf16.mxu1 %v12736_v0 }
  0xde   :  { %9560 = vmatmul.mubr.msk.bf16.gmra.mrb[12].mxu0 %vm246_vm0, %v176_v62  ;;  %9568 = vmatmul.mubr.msk.bf16.gmra.mrb[12].mxu1 %vm246_vm0, %v176_v62  ;;  %v11343_v62 = vld [vmem:[#allocation8 + $0x560] ss:$16 sps:$4 sm:$0xff]  }
  0xdf   :  { %633 = vmatprep.mubr.bf16.mxu0 %v12736_v0  ;;  %746 = vmatprep.mubr.bf16.mxu1 %v12736_v0 }
  0xe6   :  { %9561 = vmatmul.mubr.msk.bf16.gmra.mrb[16].mxu0 %vm246_vm0, %v177_v2  ;;  %9569 = vmatmul.mubr.msk.bf16.gmra.mrb[16].mxu1 %vm246_vm0, %v177_v2  ;;  %v172_v2 = vld [vmem:[%s14555_s0 + $0x100] sm:$0xff] }
  0xe7   :  { %643 = vmatprep.mubr.bf16.mxu0 %v12736_v0  ;;  %756 = vmatprep.mubr.bf16.mxu1 %v12736_v0  ;;  %v794_v3 = vpack.c.bf16 %v172_v2, %v13092_v10  ;;  %v11366_v10 = vld [vmem:[#allocation8 + $0x5cc] ss:$16 sps:$4 sm:$0xff]  }
  0xee   :  { %9562 = vmatmul.mubr.msk.bf16.gmra.mrb[20].mxu0 %vm246_vm0, %v178_v5  ;;  %9570 = vmatmul.mubr.msk.bf16.gmra.mrb[20].mxu1 %vm246_vm0, %v178_v5  ;;  %v11354_v5 = vld [vmem:[#allocation8 + $0x58c] ss:$16 sps:$4 sm:$0xff]  }
  0xef   :  { %653 = vmatprep.mubr.bf16.mxu0 %v12736_v0  ;;  %766 = vmatprep.mubr.bf16.mxu1 %v12736_v0 }
  0xf6   :  { %9563 = vmatmul.mubr.msk.bf16.gmra.mrb[24].mxu0 %vm246_vm0, %v179_v8  ;;  %9571 = vmatmul.mubr.msk.bf16.gmra.mrb[24].mxu1 %vm246_vm0, %v179_v8  ;;  %v11357_v8 = vld [vmem:[#allocation8 + $0x5a4] ss:$16 sps:$4 sm:$0xff]  }
  0xf7   :  { %663 = vmatprep.mubr.bf16.mxu0 %v12736_v0  ;;  %776 = vmatprep.mubr.bf16.mxu1 %v12736_v0 }
  0xfe   :  { %9564 = vmatmul.mubr.msk.bf16.gmra.mrb[28].mxu0 %vm246_vm0, %v180_v11  ;;  %9572 = vmatmul.mubr.msk.bf16.gmra.mrb[28].mxu1 %vm246_vm0, %v180_v11  ;;  %v11355_v11 = vld [vmem:[#allocation8 + $0x5a0] ss:$16 sps:$4 sm:$0xff]  }
  0xff   :  { %900 = vmatprep.mubr.bf16.mxu0 %v12736_v0  ;;  %1013 = vmatprep.mubr.bf16.mxu1 %v12736_v0 }
 0x106   :  { %9581 = vmatmul.mubr.msk.bf16.vlgmr.msra.gmra.mrb[0].mxu0 %vm246_vm0, %v787_v12  ;;  %9589 = vmatmul.mubr.msk.bf16.vlgmr.msra.gmra.mrb[0].mxu1 %vm246_vm0, %v787_v12  ;;  %v11358_v12 = vld [vmem:[#allocation8 + $0x5a8] ss:$16 sps:$4 sm:$0xff]  }
 0x107   :  { %910 = vmatprep.mubr.bf16.mxu0 %v12736_v0  ;;  %1023 = vmatprep.mubr.bf16.mxu1 %v12736_v0 }
 0x108   :  { %2499 = vmatpush1.bf16.msra.mxu0 %v11277_v13  ;;  %2645 = vmatpush1.bf16.msra.mxu1 %v11280_v14  ;;  %v11361_v13 = vld [vmem:[#allocation8 + $0x5c0] ss:$16 sps:$4 sm:$0xff]   ;;  %v11364_v14 = vld [vmem:[#allocation8 + $0x5c8] ss:$16 sps:$4 sm:$0xff]  }
 0x109   :  { %2500 = vmatprep.subr.bf16.mxu0 %v11285_v15  ;;  %2646 = vmatprep.subr.bf16.mxu1 %v11288_v16  ;;  %v11369_v15 = vld [vmem:[#allocation8 + $0x5e4] ss:$16 sps:$4 sm:$0xff]   ;;  %v11372_v16 = vld [vmem:[#allocation8 + $0x5ec] ss:$16 sps:$4 sm:$0xff]  }
 0x10c   :  { %2501 = vmatpush1.bf16.msra.mxu0 %v11283_v17  ;;  %2647 = vmatpush1.bf16.msra.mxu1 %v11286_v18  ;;  %v11367_v17 = vld [vmem:[#allocation8 + $0x5e0] ss:$16 sps:$4 sm:$0xff]   ;;  %v11370_v18 = vld [vmem:[#allocation8 + $0x5e8] ss:$16 sps:$4 sm:$0xff]  }
 0x10d   :  { %2502 = vmatprep.subr.bf16.mxu0 %v11291_v19  ;;  %2648 = vmatprep.subr.bf16.mxu1 %v11294_v20  ;;  %v11375_v19 = vld [vmem:[#allocation8 + $0x604] ss:$16 sps:$4 sm:$0xff]   ;;  %v11378_v20 = vld [vmem:[#allocation8 + $0x60c] ss:$16 sps:$4 sm:$0xff]  }
 0x10e   :  { %9582 = vmatmul.mubr.msk.bf16.gmra.mrb[4].mxu0 %vm246_vm0, %v788_v21  ;;  %9590 = vmatmul.mubr.msk.bf16.gmra.mrb[4].mxu1 %vm246_vm0, %v788_v21  ;;  %v1160_v21 = vlaneseq }
 0x10f   :  { %920 = vmatprep.mubr.bf16.mxu0 %v12736_v0  ;;  %1033 = vmatprep.mubr.bf16.mxu1 %v12736_v0 }
 0x110   :  { %2503 = vmatpush1.bf16.msra.mxu0 %v11289_v22  ;;  %2649 = vmatpush1.bf16.msra.mxu1 %v11292_v23  ;;  %v1161_v22 = vshrl.u32 %v1160_v21, 7  ;;  %v1158_v23 = vld [vmem:[#allocation6] sm:$0xf]  ;;  %v11376_v21 = vld [vmem:[#allocation8 + $0x608] ss:$16 sps:$4 sm:$0xff]  }
 0x111   :  { %2504 = vmatprep.subr.bf16.mxu0 %v11297_v24  ;;  %2650 = vmatprep.subr.bf16.mxu1 %v11300_v25 }
 0x112   :  { %v13151_v24 = vsub.s32 0, %v1161_v22  ;;  %v13153_v25 = vsub.s32 2, %v1161_v22 }
 0x114   :  { %2505 = vmatpush1.bf16.msra.mxu0 %v11295_v26  ;;  %2651 = vmatpush1.bf16.msra.mxu1 %v11298_v27  ;;  %14588 = vst [vmem:[#allocation19_spill] sm:$0xff] %v13151_v24  ;;  %14589 = vst [vmem:[#allocation20_spill] sm:$0xff] %v13153_v25  ;;  %v13156_v26 = vrot.slane %v1158_v23, %v13153_v25  ;;  %v13158_v27 = vsub.s32 1, %v1161_v22 }
 0x115   :  { %2506 = vmatprep.subr.bf16.mxu0 %v11303_v28  ;;  %2652 = vmatprep.subr.bf16.mxu1 %v11306_v29  ;;  %v13160_v28 = vsub.s32 3, %v1161_v22  ;;  %v13163_v29 = vrot.slane %v1158_v23, %v13151_v24  ;;  %v11424_v24 = vld [vmem:[#allocation8 + $0x708] ss:$16 sps:$4 sm:$0xff]  }
 0x116   :  { %9583 = vmatmul.mubr.msk.bf16.gmra.mrb[8].mxu0 %vm246_vm0, %v789_v30  ;;  %9591 = vmatmul.mubr.msk.bf16.gmra.mrb[8].mxu1 %vm246_vm0, %v789_v30  ;;  %14590 = vst [vmem:[#allocation21_spill] sm:$0xff] %v13158_v27 }
 0x117   :  { %930 = vmatprep.mubr.bf16.mxu0 %v12736_v0  ;;  %1043 = vmatprep.mubr.bf16.mxu1 %v12736_v0  ;;  %14591 = vst [vmem:[#allocation22_spill] sm:$0xff] %v13160_v28 }
 0x118   :  { %2507 = vmatpush1.bf16.msra.mxu0 %v11301_v31  ;;  %2653 = vmatpush1.bf16.msra.mxu1 %v11304_v32 }
 0x119   :  { %2508 = vmatprep.subr.bf16.mxu0 %v11309_v33  ;;  %2654 = vmatprep.subr.bf16.mxu1 %v11312_v34  ;;  %v13167_v34 = vrot.slane %v1158_v23, %v13158_v27 }
 0x11c   :  { %2509 = vmatpush1.bf16.msra.mxu0 %v11307_v35  ;;  %2655 = vmatpush1.bf16.msra.mxu1 %v11310_v36  ;;  %v13170_v36 = vrot.slane %v1158_v23, %v13160_v28 }
 0x11d   :  { %2510 = vmatprep.subr.bf16.mxu0 %v11315_v37  ;;  %2656 = vmatprep.subr.bf16.mxu1 %v11318_v38 }
 0x11e   :  { %9584 = vmatmul.mubr.msk.bf16.gmra.mrb[12].mxu0 %vm246_vm0, %v790_v39  ;;  %9592 = vmatmul.mubr.msk.bf16.gmra.mrb[12].mxu1 %vm246_vm0, %v790_v39 }
 0x11f   :  { %940 = vmatprep.mubr.bf16.mxu0 %v12736_v0  ;;  %1053 = vmatprep.mubr.bf16.mxu1 %v12736_v0 }
 0x120   :  { %2511 = vmatpush1.bf16.msra.mxu0 %v11313_v40  ;;  %2657 = vmatpush1.bf16.msra.mxu1 %v11316_v41 }
 0x121   :  { %2512 = vmatprep.subr.bf16.mxu0 %v11321_v42  ;;  %2658 = vmatprep.subr.bf16.mxu1 %v11324_v43 }
 0x124   :  { %2513 = vmatpush1.bf16.msra.mxu0 %v11319_v44  ;;  %2659 = vmatpush1.bf16.msra.mxu1 %v11322_v45 }
 0x125   :  { %2514 = vmatprep.subr.bf16.mxu0 %v11327_v46  ;;  %2660 = vmatprep.subr.bf16.mxu1 %v11330_v47 }
 0x126   :  { %9585 = vmatmul.mubr.msk.bf16.gmra.mrb[16].mxu0 %vm246_vm0, %v791_v48  ;;  %9593 = vmatmul.mubr.msk.bf16.gmra.mrb[16].mxu1 %vm246_vm0, %v791_v48 }
 0x127   :  { %950 = vmatprep.mubr.bf16.mxu0 %v12736_v0  ;;  %1063 = vmatprep.mubr.bf16.mxu1 %v12736_v0 }
 0x128   :  { %2515 = vmatpush1.bf16.msra.mxu0 %v11325_v49  ;;  %2661 = vmatpush1.bf16.msra.mxu1 %v11328_v50 }
 0x129   :  { %2516 = vmatprep.subr.bf16.mxu0 %v11333_v51  ;;  %2662 = vmatprep.subr.bf16.mxu1 %v11336_v52 }
 0x12c   :  { %2517 = vmatpush1.bf16.msra.mxu0 %v11331_v53  ;;  %2663 = vmatpush1.bf16.msra.mxu1 %v11334_v54 }
 0x12d   :  { %2518 = vmatprep.subr.bf16.mxu0 %v11339_v55  ;;  %2664 = vmatprep.subr.bf16.mxu1 %v11342_v56 }
 0x12e   :  { %9586 = vmatmul.mubr.msk.bf16.gmra.mrb[20].mxu0 %vm246_vm0, %v792_v57  ;;  %9594 = vmatmul.mubr.msk.bf16.gmra.mrb[20].mxu1 %vm246_vm0, %v792_v57 }
 0x12f   :  { %960 = vmatprep.mubr.bf16.mxu0 %v12736_v0  ;;  %1073 = vmatprep.mubr.bf16.mxu1 %v12736_v0 }
 0x130   :  { %2519 = vmatpush1.bf16.msra.mxu0 %v11337_v58  ;;  %2665 = vmatpush1.bf16.msra.mxu1 %v11340_v59 }
 0x131   :  { %2520 = vmatprep.subr.bf16.mxu0 %v11345_v60  ;;  %2666 = vmatprep.subr.bf16.mxu1 %v11348_v61 }
 0x134   :  { %2521 = vmatpush1.bf16.msra.mxu0 %v11343_v62  ;;  %2667 = vmatpush1.bf16.msra.mxu1 %v11346_v63 }
 0x135   :  { %2522 = vmatprep.subr.bf16.mxu0 %v11351_v4  ;;  %2668 = vmatprep.subr.bf16.mxu1 %v11354_v5 }
 0x136   :  { %9587 = vmatmul.mubr.msk.bf16.gmra.mrb[24].mxu0 %vm246_vm0, %v793_v1  ;;  %9595 = vmatmul.mubr.msk.bf16.gmra.mrb[24].mxu1 %vm246_vm0, %v793_v1 }
 0x137   :  { %970 = vmatprep.mubr.bf16.mxu0 %v12736_v0  ;;  %1083 = vmatprep.mubr.bf16.mxu1 %v12736_v0  ;;  %v11363_v0 = vld [vmem:[#allocation8 + $0x5c4] ss:$16 sps:$4 sm:$0xff]  }
 0x138   :  { %2523 = vmatpush1.bf16.msra.mxu0 %v11349_v6  ;;  %2669 = vmatpush1.bf16.msra.mxu1 %v11352_v7 }
 0x139   :  { %2524 = vmatprep.subr.bf16.mxu0 %v11357_v8  ;;  %2670 = vmatprep.subr.bf16.mxu1 %v11360_v9 }
 0x13c   :  { %2525 = vmatpush1.bf16.msra.mxu0 %v11355_v11  ;;  %2671 = vmatpush1.bf16.msra.mxu1 %v11358_v12 }
 0x13d   :  { %2526 = vmatprep.subr.bf16.mxu0 %v11363_v0  ;;  %2672 = vmatprep.subr.bf16.mxu1 %v11366_v10 }
 0x13e   :  { %9588 = vmatmul.mubr.msk.bf16.gmra.mrb[28].mxu0 %vm246_vm0, %v794_v3  ;;  %9596 = vmatmul.mubr.msk.bf16.gmra.mrb[28].mxu1 %vm246_vm0, %v794_v3 }
 0x140   :  { %2527 = vmatpush1.bf16.msra.mxu0 %v11361_v13  ;;  %2673 = vmatpush1.bf16.msra.mxu1 %v11364_v14 }
 0x141   :  { %2528 = vmatprep.subr.bf16.mxu0 %v11369_v15  ;;  %2674 = vmatprep.subr.bf16.mxu1 %v11372_v16 }
 0x144   :  { %2529 = vmatpush1.bf16.msra.mxu0 %v11367_v17  ;;  %2675 = vmatpush1.bf16.msra.mxu1 %v11370_v18 }
 0x145   :  { %2571 = vmatprep.subr.bf16.mxu0 %v11375_v19  ;;  %2717 = vmatprep.subr.bf16.mxu1 %v11378_v20  ;;  %v11373_v20 = vld [vmem:[#allocation8 + $0x600] ss:$16 sps:$4 sm:$0xff]  }
 0x1d9   :  { %v902_v30 = vpop.f32.mrb[0].mxu0  ;;  %v1015_v31 = vpop.f32.mrb[0].mxu1 }
 0x1da   :  { %v1182_v32 = vadd.f32 %v13156_v26, %v1015_v31  ;;  %v904_v33 = vpop.f32.mrb[1].mxu0  ;;  %v1017_v35 = vpop.f32.mrb[1].mxu1  ;;  %v1180_v39 = vadd.f32 %v13163_v29, %v902_v30 }
 0x1db   :  { %v906_v37 = vpop.f32.mrb[2].mxu0  ;;  %v1019_v38 = vpop.f32.mrb[2].mxu1  ;;  %v1181_v40 = vadd.f32 %v13167_v34, %v904_v33  ;;  %v1183_v41 = vadd.f32 %v13170_v36, %v1017_v35 }
 0x1dc   :  { %v1184_v42 = vadd.f32 %v13163_v29, %v906_v37  ;;  %v13177_v43 = vadd.f32 %v13156_v26, %v1019_v38  ;;  %v908_v44 = vpop.f32.mrb[3].mxu0  ;;  %v1021_v45 = vpop.f32.mrb[3].mxu1  ;;  %v1308_v48 = vmul.f32 0.2, %v1180_v39  ;;  %v1310_v49 = vmul.f32 0.2, %v1182_v32 }
 0x1dd   :  { %v13180_v46 = vadd.f32 %v13167_v34, %v908_v44  ;;  %v13183_v47 = vadd.f32 %v13170_v36, %v1021_v45  ;;  %vm1244_vm1 = vcmp.gt.f32.partialorder %v1180_v39, 0.0  ;;  %vm1246_vm2 = vcmp.gt.f32.partialorder %v1182_v32, 0.0  ;;  %v11381_v38 = vld [vmem:[#allocation8 + $0x624] ss:$16 sps:$4 sm:$0xff]  }
 0x1de   :  { %14592 = vst [vmem:[#allocation23_spill] sm:$0xff] %v13177_v43  ;;  %vm1245_vm3 = vcmp.gt.f32.partialorder %v1181_v40, 0.0  ;;  %v1309_v50 = vmul.f32 0.2, %v1181_v40  ;;  %vm1247_vm4 = vcmp.gt.f32.partialorder %v1183_v41, 0.0  ;;  %v1372_v59 = vsel %vm1244_vm1, %v1180_v39, %v1308_v48 }
 0x1df   :  { %v1311_v53 = vmul.f32 0.2, %v1183_v41  ;;  %v1312_v54 = vmul.f32 0.2, %v1184_v42  ;;  %v1374_v60 = vsel %vm1246_vm2, %v1182_v32, %v1310_v49  ;;  %vm1248_vm9 = vcmp.gt.f32.partialorder %v1184_v42, 0.0 }
 0x1e0   :  { %v1373_v16 = vsel %vm1245_vm3, %v1181_v40, %v1309_v50  ;;  %v11384_v39 = vld [vmem:[#allocation8 + $0x62c] ss:$16 sps:$4 sm:$0xff]   ;;  %vm1249_vm1 = vcmp.gt.f32.partialorder %v13180_v46, 0.0 }
 0x1e1   :  { %v912_v51 = vpop.f32.mrb[4].mxu0  ;;  %v1025_v52 = vpop.f32.mrb[4].mxu1  ;;  %v1375_v22 = vsel %vm1247_vm4, %v1183_v41, %v1311_v53  ;;  %v13207_v31 = vsel %vm1248_vm9, %v1184_v42, %v1312_v54 }
 0x1e2   :  { %v1188_v55 = vadd.f32 %v13163_v29, %v912_v51  ;;  %v1190_v56 = vadd.f32 %v13156_v26, %v1025_v52  ;;  %v914_v57 = vpop.f32.mrb[5].mxu0  ;;  %v1027_v58 = vpop.f32.mrb[5].mxu1  ;;  %14595 = vst [vmem:[#allocation26_spill] sm:$0xff] %v13207_v31  ;;  %v11379_v51 = vld [vmem:[#allocation8 + $0x620] ss:$16 sps:$4 sm:$0xff]  }
 0x1e3   :  { %v1189_v61 = vadd.f32 %v13167_v34, %v914_v57  ;;  %v1191_v62 = vadd.f32 %v13170_v36, %v1027_v58  ;;  %v916_v63 = vpop.f32.mrb[6].mxu0  ;;  %v1029_v1 = vpop.f32.mrb[6].mxu1  ;;  %v11382_v52 = vld [vmem:[#allocation8 + $0x628] ss:$16 sps:$4 sm:$0xff]   ;;  %v11387_v57 = vld [vmem:[#allocation8 + $0x644] ss:$16 sps:$4 sm:$0xff]  }
 0x1e4   :  { %vm1252_vm5 = vcmp.gt.f32.partialorder %v1188_v55, 0.0  ;;  %v1316_v2 = vmul.f32 0.2, %v1188_v55  ;;  %vm1254_vm6 = vcmp.gt.f32.partialorder %v1190_v56, 0.0  ;;  %v1318_v3 = vmul.f32 0.2, %v1190_v56 }
 0x1e5   :  { %vm1253_vm7 = vcmp.gt.f32.partialorder %v1189_v61, 0.0  ;;  %v1317_v4 = vmul.f32 0.2, %v1189_v61  ;;  %vm1255_vm8 = vcmp.gt.f32.partialorder %v1191_v62, 0.0  ;;  %v1319_v5 = vmul.f32 0.2, %v1191_v62 }
 0x1e6   :  { %v1380_v6 = vsel %vm1252_vm5, %v1188_v55, %v1316_v2  ;;  %v1382_v7 = vsel %vm1254_vm6, %v1190_v56, %v1318_v3  ;;  %v1192_v8 = vadd.f32 %v13163_v29, %v916_v63  ;;  %v13191_v9 = vadd.f32 %v13156_v26, %v1029_v1  ;;  %v918_v11 = vpop.f32.mrb[7].mxu0  ;;  %v1031_v12 = vpop.f32.mrb[7].mxu1  ;;  %v11390_v58 = vld [vmem:[#allocation8 + $0x64c] ss:$16 sps:$4 sm:$0xff]   ;;  %v11385_v2 = vld [vmem:[#allocation8 + $0x640] ss:$16 sps:$4 sm:$0xff]  }
 0x1e7   :  { %v1713_v0 = vpack.c.bf16 %v1380_v6, %v1372_v59  ;;  %v13193_v10 = vpack.c.bf16 %v1382_v7, %v1374_v60  ;;  %v13196_v13 = vadd.f32 %v13167_v34, %v918_v11  ;;  %v13199_v14 = vadd.f32 %v13170_v36, %v1031_v12  ;;  %v11388_v3 = vld [vmem:[#allocation8 + $0x648] ss:$16 sps:$4 sm:$0xff]   ;;  %v11393_v7 = vld [vmem:[#allocation8 + $0x664] ss:$16 sps:$4 sm:$0xff]  }
 0x1e8   :  { %vm1256_vm10 = vcmp.gt.f32.partialorder %v1192_v8, 0.0  ;;  %v1320_v15 = vmul.f32 0.2, %v1192_v8  ;;  %v1381_v19 = vsel %vm1253_vm7, %v1189_v61, %v1317_v4  ;;  %v1383_v23 = vsel %vm1255_vm8, %v1191_v62, %v1319_v5 }
 0x1e9   :  { %14593 = vst [vmem:[#allocation24_spill] sm:$0xff] %v13193_v10  ;;  %v922_v17 = vpop.f32.mrb[8].mxu0  ;;  %v1035_v18 = vpop.f32.mrb[8].mxu1  ;;  %v1714_v37 = vpack.c.bf16 %v1381_v19, %v1373_v16  ;;  %v13214_v40 = vpack.c.bf16 %v1383_v23, %v1375_v22  ;;  %vm1257_vm2 = vcmp.gt.f32.partialorder %v13196_v13, 0.0  ;;  %v11432_v10 = vld [vmem:[#allocation8 + $0x72c] ss:$16 sps:$4 sm:$0xff]  }
 0x1ea   :  { %v13205_v30 = vsel %vm1256_vm10, %v1192_v8, %v1320_v15  ;;  %v13210_v32 = vadd.f32 %v13156_v26, %v1035_v18  ;;  %v924_v33 = vpop.f32.mrb[9].mxu0  ;;  %v13212_v35 = vpop.f32.mrb[9].mxu1  ;;  %v1196_v59 = vadd.f32 %v13163_v29, %v922_v17  ;;  %v11396_v8 = vld [vmem:[#allocation8 + $0x66c] ss:$16 sps:$4 sm:$0xff]  }
 0x1eb   :  { %14594 = vst [vmem:[#allocation25_spill] sm:$0xff] %v13205_v30  ;;  %v926_v44 = vpop.f32.mrb[10].mxu0  ;;  %v1039_v45 = vpop.f32.mrb[10].mxu1  ;;  %v13218_v41 = vpack.c.bf16 %v13205_v30, %v13207_v31  ;;  %2530 = vmatprep.mubr.bf16.mxu0 %v1714_v37  ;;  %2676 = vmatprep.mubr.bf16.mxu1 %v1714_v37  ;;  %v1197_v60 = vadd.f32 %v13167_v34, %v924_v33  ;;  %v11444_v30 = vld [vmem:[#allocation8 + $0x76c] ss:$16 sps:$4 sm:$0xff]  }
 0x1ec   :  { %2531 = vmatmul.mubr.bf16.vlgmr.msra.gmra.mrb[32].mxu0 %v1713_v0  ;;  %2677 = vmatmul.mubr.bf16.vlgmr.msra.gmra.mrb[32].mxu1 %v1713_v0  ;;  %v13221_v42 = vadd.f32 %v13163_v29, %v926_v44  ;;  %v13224_v48 = vadd.f32 %v13156_v26, %v1039_v45  ;;  %v928_v49 = vpop.f32.mrb[11].mxu0  ;;  %v1041_v50 = vpop.f32.mrb[11].mxu1  ;;  %v1324_v11 = vmul.f32 0.2, %v1196_v59  ;;  %v11391_v0 = vld [vmem:[#allocation8 + $0x660] ss:$16 sps:$4 sm:$0xff]  }
 0x1ed   :  { %14596 = vst [vmem:[#allocation27_spill] sm:$0xff] %v13218_v41  ;;  %2572 = vmatpush1.bf16.msra.mxu0 %v11373_v20  ;;  %2718 = vmatpush1.bf16.msra.mxu1 %v11376_v21  ;;  %v13227_v53 = vadd.f32 %v13167_v34, %v928_v49  ;;  %v13230_v54 = vadd.f32 %v13170_v36, %v1041_v50  ;;  %v1325_v15 = vmul.f32 0.2, %v1197_v60  ;;  %vm1260_vm13 = vcmp.gt.f32.partialorder %v1196_v59, 0.0  ;;  %v11394_v21 = vld [vmem:[#allocation8 + $0x668] ss:$16 sps:$4 sm:$0xff]  }
 0x1ee   :  { %2573 = vmatprep.subr.bf16.mxu0 %v11381_v38  ;;  %2719 = vmatprep.subr.bf16.mxu1 %v11384_v39  ;;  %vm1261_vm14 = vcmp.gt.f32.partialorder %v1197_v60, 0.0  ;;  %v11399_v39 = vld [vmem:[#allocation8 + $0x684] ss:$16 sps:$4 sm:$0xff]   ;;  %v11402_v44 = vld [vmem:[#allocation8 + $0x68c] ss:$16 sps:$4 sm:$0xff]   ;;  %v1199_v49 = vadd.f32 %v13170_v36, %v13212_v35  ;;  %vm1262_vm7 = vcmp.gt.f32.partialorder %v13210_v32, 0.0 }
 0x1ef   :  { %v1389_v50 = vsel %vm1261_vm14, %v1197_v60, %v1325_v15  ;;  %v11429_v41 = vld [vmem:[#allocation8 + $0x724] ss:$16 sps:$4 sm:$0xff]   ;;  %vm1265_vm14 = vcmp.gt.f32.partialorder %v13227_v53, 0.0 }
 0x1f0   :  { %vm1263_vm15 = vcmp.gt.f32.partialorder %v1199_v49, 0.0 }
 0x1f1   :  { %v932_v55 = vpop.f32.mrb[12].mxu0  ;;  %v1045_v56 = vpop.f32.mrb[12].mxu1  ;;  %2574 = vmatpush1.bf16.msra.mxu0 %v11379_v51  ;;  %2720 = vmatpush1.bf16.msra.mxu1 %v11382_v52  ;;  %v1388_v51 = vsel %vm1260_vm13, %v1196_v59, %v1324_v11  ;;  %v11408_v59 = vld [vmem:[#allocation8 + $0x6ac] ss:$16 sps:$4 sm:$0xff]  }
 0x1f2   :  { %v1204_v61 = vadd.f32 %v13163_v29, %v932_v55  ;;  %v13236_v62 = vadd.f32 %v13156_v26, %v1045_v56  ;;  %v934_v63 = vpop.f32.mrb[13].mxu0  ;;  %v1047_v1 = vpop.f32.mrb[13].mxu1  ;;  %2575 = vmatprep.subr.bf16.mxu0 %v11387_v57  ;;  %2721 = vmatprep.subr.bf16.mxu1 %v11390_v58 }
 0x1f3   :  { %v1205_v4 = vadd.f32 %v13167_v34, %v934_v63  ;;  %v936_v5 = vpop.f32.mrb[14].mxu0  ;;  %v1049_v6 = vpop.f32.mrb[14].mxu1  ;;  %v1207_v52 = vadd.f32 %v13170_v36, %v1047_v1  ;;  %v11397_v63 = vld [vmem:[#allocation8 + $0x680] ss:$16 sps:$4 sm:$0xff]  }
 0x1f4   :  { %v1332_v12 = vmul.f32 0.2, %v1204_v61  ;;  %vm1268_vm11 = vcmp.gt.f32.partialorder %v1204_v61, 0.0  ;;  %v13240_v17 = vadd.f32 %v13163_v29, %v936_v5  ;;  %v13243_v18 = vadd.f32 %v13156_v26, %v1049_v6  ;;  %v938_v19 = vpop.f32.mrb[15].mxu0  ;;  %v1051_v20 = vpop.f32.mrb[15].mxu1 }
 0x1f5   :  { %vm1269_vm12 = vcmp.gt.f32.partialorder %v1205_v4, 0.0  ;;  %v1333_v16 = vmul.f32 0.2, %v1205_v4  ;;  %2576 = vmatpush1.bf16.msra.mxu0 %v11385_v2  ;;  %2722 = vmatpush1.bf16.msra.mxu1 %v11388_v3  ;;  %v13246_v22 = vadd.f32 %v13167_v34, %v938_v19  ;;  %v13249_v23 = vadd.f32 %v13170_v36, %v1051_v20  ;;  %v11405_v3 = vld [vmem:[#allocation8 + $0x6a4] ss:$16 sps:$4 sm:$0xff]  }
 0x1f6   :  { %14597 = vst [vmem:[#allocation28_spill] sm:$0xff] %v13240_v17  ;;  %2577 = vmatprep.subr.bf16.mxu0 %v11393_v7  ;;  %2723 = vmatprep.subr.bf16.mxu1 %v11396_v8  ;;  %v1396_v45 = vsel %vm1268_vm11, %v1204_v61, %v1332_v12  ;;  %v11400_v61 = vld [vmem:[#allocation8 + $0x688] ss:$16 sps:$4 sm:$0xff]   ;;  %v11403_v1 = vld [vmem:[#allocation8 + $0x6a0] ss:$16 sps:$4 sm:$0xff]   ;;  %vm1271_vm0 = vcmp.gt.f32.partialorder %v1207_v52, 0.0 }
 0x1f7   :  { %14598 = vst [vmem:[#allocation29_spill] sm:$0xff] %v13246_v22  ;;  %v1397_v38 = vsel %vm1269_vm12, %v1205_v4, %v1333_v16  ;;  %v1717_v60 = vpack.c.bf16 %v1396_v45, %v1388_v51  ;;  %v11406_v4 = vld [vmem:[#allocation8 + $0x6a8] ss:$16 sps:$4 sm:$0xff]   ;;  %v1327_v5 = vmul.f32 0.2, %v1199_v49  ;;  %vm1270_vm8 = vcmp.gt.f32.partialorder %v13236_v62, 0.0 }
 0x1f8   :  { %v1718_v58 = vpack.c.bf16 %v1397_v38, %v1389_v50  ;;  %v11411_v6 = vld [vmem:[#allocation8 + $0x6c4] ss:$16 sps:$4 sm:$0xff]   ;;  %v11414_v7 = vld [vmem:[#allocation8 + $0x6cc] ss:$16 sps:$4 sm:$0xff]   ;;  %v1335_v8 = vmul.f32 0.2, %v1207_v52 }
 0x1f9   :  { %v942_v33 = vpop.f32.mrb[16].mxu0  ;;  %v1055_v37 = vpop.f32.mrb[16].mxu1  ;;  %2578 = vmatpush1.bf16.msra.mxu0 %v11391_v0  ;;  %2724 = vmatpush1.bf16.msra.mxu1 %v11394_v21  ;;  %v1313_v16 = vmul.f32 0.2, %v13180_v46  ;;  %v1321_v38 = vmul.f32 0.2, %v13196_v13  ;;  %v1391_v51 = vsel %vm1263_vm15, %v1199_v49, %v1327_v5 }
 0x1fa   :  { %v13259_v55 = vadd.f32 %v13156_v26, %v1055_v37  ;;  %v944_v56 = vpop.f32.mrb[17].mxu0  ;;  %v13261_v57 = vpop.f32.mrb[17].mxu1  ;;  %2579 = vmatprep.subr.bf16.mxu0 %v11399_v39  ;;  %2725 = vmatprep.subr.bf16.mxu1 %v11402_v44  ;;  %v13280_v39 = vadd.f32 %v13163_v29, %v942_v33  ;;  %v11409_v45 = vld [vmem:[#allocation8 + $0x6c0] ss:$16 sps:$4 sm:$0xff]   ;;  %v11412_v50 = vld [vmem:[#allocation8 + $0x6c8] ss:$16 sps:$4 sm:$0xff]  }
 0x1fb   :  { %v946_v35 = vpop.f32.mrb[18].mxu0  ;;  %v1059_v2 = vpop.f32.mrb[18].mxu1  ;;  %2540 = vmatprep.mubr.bf16.mxu0 %v1718_v58  ;;  %2686 = vmatprep.mubr.bf16.mxu1 %v1718_v58  ;;  %v1213_v44 = vadd.f32 %v13167_v34, %v944_v56  ;;  %v13285_v58 = vmul.f32 0.2, %v13183_v47  ;;  %v11417_v33 = vld [vmem:[#allocation8 + $0x6e4] ss:$16 sps:$4 sm:$0xff]   ;;  %v1399_v56 = vsel %vm1271_vm0, %v1207_v52, %v1335_v8  ;;  %v13303_v5 = vsel %vm1249_vm1, %v13180_v46, %v1313_v16 }
 0x1fc   :  { %2541 = vmatmul.mubr.bf16.gmra.mrb[36].mxu0 %v1717_v60  ;;  %2687 = vmatmul.mubr.bf16.gmra.mrb[36].mxu1 %v1717_v60  ;;  %v13264_v11 = vadd.f32 %v13163_v29, %v946_v35  ;;  %v13267_v12 = vadd.f32 %v13156_v26, %v1059_v2  ;;  %v948_v0 = vpop.f32.mrb[19].mxu0  ;;  %v1061_v15 = vpop.f32.mrb[19].mxu1  ;;  %v13295_v60 = vmul.f32 0.2, %v13191_v9  ;;  %14603 = vst [vmem:[#allocation34_spill] sm:$0xff] %v13303_v5  ;;  %vm1276_vm6 = vcmp.gt.f32.partialorder %v13280_v39, 0.0 }
 0x1fd   :  { %2580 = vmatpush1.bf16.msra.mxu0 %v11397_v63  ;;  %2726 = vmatpush1.bf16.msra.mxu1 %v11400_v61  ;;  %v13271_v19 = vadd.f32 %v13167_v34, %v948_v0  ;;  %v13274_v20 = vadd.f32 %v13170_v36, %v1061_v15  ;;  %14600 = vst [vmem:[#allocation31_spill] sm:$0xff] %v13285_v58  ;;  %v13306_v0 = vmul.f32 0.2, %v13199_v14  ;;  %v1326_v52 = vmul.f32 0.2, %v13210_v32 }
 0x1fe   :  { %2581 = vmatprep.subr.bf16.mxu0 %v11405_v3  ;;  %2727 = vmatprep.subr.bf16.mxu1 %v11408_v59  ;;  %14601 = vst [vmem:[#allocation32_spill] sm:$0xff] %v13295_v60  ;;  %v11415_v15 = vld [vmem:[#allocation8 + $0x6e0] ss:$16 sps:$4 sm:$0xff]   ;;  %v1340_v46 = vmul.f32 0.2, %v13280_v39  ;;  %vm1277_vm5 = vcmp.gt.f32.partialorder %v1213_v44, 0.0 }
 0x1ff   :  { %14599 = vst [vmem:[#allocation30_spill] sm:$0xff] %v13271_v19  ;;  %14604 = vst [vmem:[#allocation35_spill] sm:$0xff] %v13306_v0  ;;  %v11438_v5 = vld [vmem:[#allocation8 + $0x74c] ss:$16 sps:$4 sm:$0xff]   ;;  %vm1278_vm10 = vcmp.gt.f32.partialorder %v13259_v55, 0.0  ;;  %vm1264_vm0 = vcmp.gt.f32.partialorder %v13221_v42, 0.0 }
 0x201   :  { %v952_v21 = vpop.f32.mrb[20].mxu0  ;;  %v1065_v37 = vpop.f32.mrb[20].mxu1  ;;  %2582 = vmatpush1.bf16.msra.mxu0 %v11403_v1  ;;  %2728 = vmatpush1.bf16.msra.mxu1 %v11406_v4  ;;  %v11420_v1 = vld [vmem:[#allocation8 + $0x6ec] ss:$16 sps:$4 sm:$0xff]   ;;  %v13298_v4 = vpack.c.bf16 %v1399_v56, %v1391_v51  ;;  %v11423_v51 = vld [vmem:[#allocation8 + $0x704] ss:$16 sps:$4 sm:$0xff]  }
 0x202   :  { %v1220_v63 = vadd.f32 %v13163_v29, %v952_v21  ;;  %v13289_v61 = vadd.f32 %v13156_v26, %v1065_v37  ;;  %v954_v35 = vpop.f32.mrb[21].mxu0  ;;  %v13291_v2 = vpop.f32.mrb[21].mxu1  ;;  %2583 = vmatprep.subr.bf16.mxu0 %v11411_v6  ;;  %2729 = vmatprep.subr.bf16.mxu1 %v11414_v7  ;;  %v11418_v21 = vld [vmem:[#allocation8 + $0x6e8] ss:$16 sps:$4 sm:$0xff]   ;;  %v13312_v6 = vsel %vm1257_vm2, %v13196_v13, %v1321_v38  ;;  %v1341_v7 = vmul.f32 0.2, %v1213_v44 }
 0x203   :  { %v1221_v49 = vadd.f32 %v13167_v34, %v954_v35  ;;  %v956_v3 = vpop.f32.mrb[22].mxu0  ;;  %v1069_v59 = vpop.f32.mrb[22].mxu1  ;;  %14602 = vst [vmem:[#allocation33_spill] sm:$0xff] %v13298_v4  ;;  %v1404_v4 = vsel %vm1276_vm6, %v13280_v39, %v1340_v46  ;;  %v13370_v39 = vmul.f32 0.2, %v13246_v22 }
 0x204   :  { %v1348_v8 = vmul.f32 0.2, %v1220_v63  ;;  %vm1284_vm3 = vcmp.gt.f32.partialorder %v1220_v63, 0.0  ;;  %v13316_v16 = vadd.f32 %v13163_v29, %v956_v3  ;;  %v13319_v35 = vadd.f32 %v13156_v26, %v1069_v59  ;;  %v958_v56 = vpop.f32.mrb[23].mxu0  ;;  %v1071_v28 = vpop.f32.mrb[23].mxu1 }
 0x205   :  { %vm1285_vm4 = vcmp.gt.f32.partialorder %v1221_v49, 0.0  ;;  %v1349_v37 = vmul.f32 0.2, %v1221_v49  ;;  %2584 = vmatpush1.bf16.msra.mxu0 %v11409_v45  ;;  %2730 = vmatpush1.bf16.msra.mxu1 %v11412_v50  ;;  %v13323_v13 = vadd.f32 %v13167_v34, %v958_v56  ;;  %v13326_v38 = vadd.f32 %v13170_v36, %v1071_v28  ;;  %v11426_v59 = vld [vmem:[#allocation8 + $0x70c] ss:$16 sps:$4 sm:$0xff]   ;;  %14609 = vst [vmem:[#allocation40_spill] sm:$0xff] %v13370_v39 }
 0x206   :  { %2585 = vmatprep.subr.bf16.mxu0 %v11417_v33  ;;  %2731 = vmatprep.subr.bf16.mxu1 %v11420_v1  ;;  %v13331_v45 = vmul.f32 0.2, %v13221_v42  ;;  %v13334_v50 = vmul.f32 0.2, %v13224_v48  ;;  %v11421_v56 = vld [vmem:[#allocation8 + $0x700] ss:$16 sps:$4 sm:$0xff]   ;;  %v1412_v28 = vsel %vm1284_vm3, %v1220_v63, %v1348_v8 }
 0x207   :  { %v1413_v25 = vsel %vm1285_vm4, %v1221_v49, %v1349_v37  ;;  %v13338_v33 = vmul.f32 0.2, %v13227_v53  ;;  %v13341_v1 = vmul.f32 0.2, %v13230_v54  ;;  %v13345_v49 = vadd.f32 %v13170_v36, %v13261_v57  ;;  %v11439_v39 = vld [vmem:[#allocation8 + $0x760] ss:$16 sps:$4 sm:$0xff]  }
 0x208   :  { %14605 = vst [vmem:[#allocation36_spill] sm:$0xff] %v13334_v50  ;;  %v1405_v37 = vsel %vm1277_vm5, %v1213_v44, %v1341_v7  ;;  %v13356_v57 = vmul.f32 0.2, %v13236_v62  ;;  %v13359_v44 = vmul.f32 0.2, %v13240_v17  ;;  %v1721_v7 = vpack.c.bf16 %v1412_v28, %v1404_v4 }
 0x209   :  { %v962_v27 = vpop.f32.mrb[24].mxu0  ;;  %v1075_v3 = vpop.f32.mrb[24].mxu1  ;;  %14606 = vst [vmem:[#allocation37_spill] sm:$0xff] %v13341_v1  ;;  %2586 = vmatpush1.bf16.msra.mxu0 %v11415_v15  ;;  %2732 = vmatpush1.bf16.msra.mxu1 %v11418_v21  ;;  %v1722_v31 = vpack.c.bf16 %v1413_v25, %v1405_v37  ;;  %v13364_v25 = vsel %vm1262_vm7, %v13210_v32, %v1326_v52  ;;  %v13373_v46 = vmul.f32 0.2, %v13249_v23  ;;  %vm1279_vm9 = vcmp.gt.f32.partialorder %v13345_v49, 0.0 }
 0x20a   :  { %v13350_v43 = vadd.f32 %v13156_v26, %v1075_v3  ;;  %v964_v63 = vpop.f32.mrb[25].mxu0  ;;  %v1077_v8 = vpop.f32.mrb[25].mxu1  ;;  %14607 = vst [vmem:[#allocation38_spill] sm:$0xff] %v13359_v44  ;;  %2587 = vmatprep.subr.bf16.mxu0 %v11423_v51  ;;  %2733 = vmatprep.subr.bf16.mxu1 %v11426_v59  ;;  %v13367_v3 = vmul.f32 0.2, %v13243_v18  ;;  %v13377_v51 = vadd.f32 %v13170_v36, %v13291_v2  ;;  %vm1286_vm11 = vcmp.gt.f32.partialorder %v13289_v61, 0.0 }
 0x20b   :  { %v966_v15 = vpop.f32.mrb[26].mxu0  ;;  %v1079_v21 = vpop.f32.mrb[26].mxu1  ;;  %14610 = vst [vmem:[#allocation41_spill] sm:$0xff] %v13373_v46  ;;  %2550 = vmatprep.mubr.bf16.mxu0 %v1722_v31  ;;  %2696 = vmatprep.mubr.bf16.mxu1 %v1722_v31  ;;  %v11427_v4 = vld [vmem:[#allocation8 + $0x720] ss:$16 sps:$4 sm:$0xff]   ;;  %v13389_v37 = vadd.f32 %v13163_v29, %v962_v27  ;;  %v13439_v44 = vadd.f32 %v13170_v36, %v1077_v8  ;;  %vm1275_vm4 = vcmp.gt.f32.partialorder %v13249_v23, 0.0 }
 0x20c   :  { %14608 = vst [vmem:[#allocation39_spill] sm:$0xff] %v13367_v3  ;;  %v11430_v59 = vld [vmem:[#allocation8 + $0x728] ss:$16 sps:$4 sm:$0xff]   ;;  %v13380_v32 = vmul.f32 0.2, %v13259_v55  ;;  %2551 = vmatmul.mubr.bf16.gmra.mrb[40].mxu0 %v1721_v7  ;;  %2697 = vmatmul.mubr.bf16.gmra.mrb[40].mxu1 %v1721_v7  ;;  %v13398_v46 = vadd.f32 %v13163_v29, %v966_v15  ;;  %v13401_v50 = vadd.f32 %v13156_v26, %v1079_v21  ;;  %v968_v27 = vpop.f32.mrb[27].mxu0 }
 0x20d   :  { %v13383_v52 = vmul.f32 0.2, %v13345_v49  ;;  %v13386_v28 = vmul.f32 0.2, %v13264_v11  ;;  %v11435_v2 = vld [vmem:[#allocation8 + $0x744] ss:$16 sps:$4 sm:$0xff]   ;;  %2588 = vmatpush1.bf16.msra.mxu0 %v11421_v56  ;;  %2734 = vmatpush1.bf16.msra.mxu1 %v11424_v24  ;;  %v13411_v1 = vadd.f32 %v13167_v34, %v968_v27 }
 0x20e   :  { %v13392_v31 = vmul.f32 0.2, %v13267_v12  ;;  %v13395_v3 = vmul.f32 0.2, %v13271_v19  ;;  %v1081_v60 = vpop.f32.mrb[27].mxu1  ;;  %2589 = vmatprep.subr.bf16.mxu0 %v11429_v41  ;;  %2735 = vmatprep.subr.bf16.mxu1 %v11432_v10  ;;  %vm1287_vm12 = vcmp.gt.f32.partialorder %v13377_v51, 0.0  ;;  %v13429_v41 = vadd.f32 %v13167_v34, %v964_v63 }
 0x20f   :  { %14611 = vst [vmem:[#allocation42_spill] sm:$0xff] %v13386_v28  ;;  %v13405_v7 = vmul.f32 0.2, %v13274_v20  ;;  %v13414_v15 = vadd.f32 %v13170_v36, %v1081_v60  ;;  %v13420_v21 = vmul.f32 0.2, %v13377_v51  ;;  %vm1292_vm13 = vcmp.gt.f32.partialorder %v13389_v37, 0.0 }
 0x210   :  { %14612 = vst [vmem:[#allocation43_spill] sm:$0xff] %v13392_v31  ;;  %14613 = vst [vmem:[#allocation44_spill] sm:$0xff] %v13395_v3  ;;  %v13408_v31 = vmul.f32 0.2, %v13289_v61  ;;  %v13426_v27 = vmul.f32 0.2, %v13319_v35 }
 0x211   :  { %14614 = vst [vmem:[#allocation45_spill] sm:$0xff] %v13405_v7  ;;  %v972_v56 = vpop.f32.mrb[28].mxu0  ;;  %v1085_v24 = vpop.f32.mrb[28].mxu1  ;;  %v13423_v7 = vmul.f32 0.2, %v13316_v16  ;;  %2590 = vmatpush1.bf16.msra.mxu0 %v11427_v4  ;;  %2736 = vmatpush1.bf16.msra.mxu1 %v11430_v59  ;;  %vm1294_vm15 = vcmp.gt.f32.partialorder %v13350_v43, 0.0 }
 0x212   :  { %14616 = vst [vmem:[#allocation47_spill] sm:$0xff] %v13426_v27  ;;  %v11433_v10 = vld [vmem:[#allocation8 + $0x740] ss:$16 sps:$4 sm:$0xff]   ;;  %v11436_v60 = vld [vmem:[#allocation8 + $0x748] ss:$16 sps:$4 sm:$0xff]   ;;  %v1236_v63 = vadd.f32 %v13163_v29, %v972_v56  ;;  %v13444_v27 = vadd.f32 %v13156_v26, %v1085_v24  ;;  %v974_v3 = vpop.f32.mrb[29].mxu0  ;;  %2591 = vmatprep.subr.bf16.mxu0 %v11435_v2  ;;  %2737 = vmatprep.subr.bf16.mxu1 %v11438_v5 }
 0x213   :  { %14615 = vst [vmem:[#allocation46_spill] sm:$0xff] %v13423_v7  ;;  %v13432_v0 = vmul.f32 0.2, %v13323_v13  ;;  %v13435_v58 = vmul.f32 0.2, %v13326_v38  ;;  %v1237_v4 = vadd.f32 %v13167_v34, %v974_v3  ;;  %v976_v59 = vpop.f32.mrb[30].mxu0 }
 0x214   :  { %v1356_v28 = vmul.f32 0.2, %v13389_v37  ;;  %v11441_v7 = vld [vmem:[#allocation8 + $0x764] ss:$16 sps:$4 sm:$0xff]   ;;  %v13453_v8 = vmul.f32 0.2, %v13350_v43  ;;  %v13475_v2 = vadd.f32 %v13163_v29, %v976_v59 }
 0x215   :  { %14617 = vst [vmem:[#allocation48_spill] sm:$0xff] %v13432_v0  ;;  %14618 = vst [vmem:[#allocation49_spill] sm:$0xff] %v13435_v58  ;;  %v1087_v0 = vpop.f32.mrb[29].mxu1  ;;  %v1398_v58 = vsel %vm1270_vm8, %v13236_v62, %v13356_v57  ;;  %vm1293_vm2 = vcmp.gt.f32.partialorder %v13429_v41, 0.0  ;;  %v1357_v62 = vmul.f32 0.2, %v13429_v41  ;;  %2592 = vmatpush1.bf16.msra.mxu0 %v11433_v10  ;;  %2738 = vmatpush1.bf16.msra.mxu1 %v11436_v60 }
 0x216   :  { %v1089_v56 = vpop.f32.mrb[30].mxu1  ;;  %v13457_v24 = vpack.c.bf16 %v1398_v58, %v13364_v25  ;;  %vm1300_vm3 = vcmp.gt.f32.partialorder %v1236_v63, 0.0  ;;  %v1364_v57 = vmul.f32 0.2, %v1236_v63  ;;  %vm1301_vm6 = vcmp.gt.f32.partialorder %v1237_v4, 0.0  ;;  %2593 = vmatprep.subr.bf16.mxu0 %v11441_v7  ;;  %2739 = vmatprep.subr.bf16.mxu1 %v11444_v30 }
 0x217   :  { %v1365_v5 = vmul.f32 0.2, %v1237_v4  ;;  %v13466_v58 = vadd.f32 %v13170_v36, %v1087_v0  ;;  %v11442_v25 = vld [vmem:[#allocation8 + $0x768] ss:$16 sps:$4 sm:$0xff]   ;;  %v1420_v3 = vsel %vm1292_vm13, %v13389_v37, %v1356_v28  ;;  %vm1295_vm1 = vcmp.gt.f32.partialorder %v13439_v44, 0.0  ;;  %v978_v0 = vpop.f32.mrb[31].mxu0 }
 0x218   :  { %14619 = vst [vmem:[#allocation50_spill] sm:$0xff] %v13457_v24  ;;  %v13478_v24 = vadd.f32 %v13156_v26, %v1089_v56  ;;  %v1091_v17 = vpop.f32.mrb[31].mxu1  ;;  %v11447_v19 = vld [vmem:[#allocation8 + $0x784] ss:$16 sps:$4 sm:$0xff]   ;;  %v1428_v22 = vsel %vm1300_vm3, %v1236_v63, %v1364_v57  ;;  %v1359_v28 = vmul.f32 0.2, %v13439_v44  ;;  %v13484_v37 = vadd.f32 %v13167_v34, %v978_v0 }
 0x219   :  { %v13487_v29 = vadd.f32 %v13170_v36, %v1091_v17  ;;  %v1429_v26 = vsel %vm1301_vm6, %v1237_v4, %v1365_v5  ;;  %v11450_v10 = vld [vmem:[#allocation8 + $0x78c] ss:$16 sps:$4 sm:$0xff]   ;;  %v13494_v60 = vmul.f32 0.2, %v13398_v46  ;;  %v13497_v34 = vmul.f32 0.2, %v13401_v50  ;;  %2594 = vmatpush1.bf16.msra.mxu0 %v11439_v39  ;;  %2740 = vmatpush1.bf16.msra.mxu1 %v11442_v25 }
 0x21a   :  { %v13500_v36 = vmul.f32 0.2, %v13411_v1  ;;  %v1421_v30 = vsel %vm1293_vm2, %v13429_v41, %v1357_v62  ;;  %v11445_v17 = vld [vmem:[#allocation8 + $0x780] ss:$16 sps:$4 sm:$0xff]   ;;  %vm1267_vm3 = vcmp.gt.f32.partialorder %v13230_v54, 0.0  ;;  %vm1297_vm7 = vcmp.gt.f32.partialorder %v13411_v1, 0.0  ;;  %2595 = vmatprep.subr.bf16.mxu0 %v11447_v19  ;;  %2741 = vmatprep.subr.bf16.mxu1 %v11450_v10 }
 0x21b   :  { %vm1302_vm13 = vcmp.gt.f32.partialorder %v13444_v27, 0.0  ;;  %v1366_v7 = vmul.f32 0.2, %v13444_v27  ;;  %v1367_v63 = vmul.f32 0.2, %v13466_v58  ;;  %vm1303_vm5 = vcmp.gt.f32.partialorder %v13466_v58, 0.0 }
 0x21c   :  { %v1726_v41 = vpack.c.bf16 %v1429_v26, %v1421_v30  ;;  %v11448_v4 = vld [vmem:[#allocation8 + $0x788] ss:$16 sps:$4 sm:$0xff]   ;;  %v1725_v59 = vpack.c.bf16 %v1428_v22, %v1420_v3  ;;  %v11453_v56 = vld [vmem:[#allocation8 + $0x7a4] ss:$16 sps:$4 sm:$0xff]   ;;  %v1407_v62 = vsel %vm1279_vm9, %v13345_v49, %v13383_v52  ;;  %vm1274_vm2 = vcmp.gt.f32.partialorder %v13243_v18, 0.0 }
 0x21d   :  { %vm1282_vm8 = vcmp.gt.f32.partialorder %v13267_v12, 0.0  ;;  %vm1283_vm6 = vcmp.gt.f32.partialorder %v13274_v20, 0.0  ;;  %v13522_v57 = vmul.f32 0.2, %v13414_v15  ;;  %v1415_v22 = vsel %vm1287_vm12, %v13377_v51, %v13420_v21  ;;  %v11451_v52 = vld [vmem:[#allocation8 + $0x7a0] ss:$16 sps:$4 sm:$0xff]   ;;  %2596 = vmatpush1.bf16.msra.mxu0 %v11445_v17  ;;  %2742 = vmatpush1.bf16.msra.mxu1 %v11448_v4 }
 0x21e   :  { %v1406_v49 = vsel %vm1278_vm10, %v13259_v55, %v13380_v32  ;;  %v1414_v39 = vsel %vm1286_vm11, %v13289_v61, %v13408_v31  ;;  %vm1291_vm9 = vcmp.gt.f32.partialorder %v13326_v38, 0.0  ;;  %v13538_v19 = vmul.f32 0.2, %v13475_v2  ;;  %2560 = vmatprep.mubr.bf16.mxu0 %v1726_v41  ;;  %2706 = vmatprep.mubr.bf16.mxu1 %v1726_v41  ;;  %v11454_v5 = vld [vmem:[#allocation8 + $0x7a8] ss:$16 sps:$4 sm:$0xff]  }
 0x21f   :  { %v11456_v51 = vld [vmem:[#allocation8 + $0x7ac] ss:$16 sps:$4 sm:$0xff]   ;;  %v13540_v21 = vpack.c.bf16 %v1415_v22, %v1407_v62  ;;  %v13542_v25 = vpack.c.bf16 %v1414_v39, %v1406_v49  ;;  %v1423_v55 = vsel %vm1295_vm1, %v13439_v44, %v1359_v28  ;;  %vm1290_vm10 = vcmp.gt.f32.partialorder %v13319_v35, 0.0  ;;  %2561 = vmatmul.mubr.bf16.gmra.mrb[44].mxu0 %v1725_v59  ;;  %2707 = vmatmul.mubr.bf16.gmra.mrb[44].mxu1 %v1725_v59  ;;  %v11459_v32 = vld [vmem:[#allocation8 + $0x7c4] ss:$16 sps:$4 sm:$0xff]  }
 0x220   :  { %vm1298_vm11 = vcmp.gt.f32.partialorder %v13401_v50, 0.0  ;;  %vm1299_vm12 = vcmp.gt.f32.partialorder %v13414_v15, 0.0  ;;  %v13551_v61 = vmul.f32 0.2, %v13478_v24  ;;  %v11462_v31 = vld [vmem:[#allocation8 + $0x7cc] ss:$16 sps:$4 sm:$0xff]   ;;  %v1431_v3 = vsel %vm1303_vm5, %v13466_v58, %v1367_v63  ;;  %2603 = vmatprep.mubr.bf16.mxu0 %v13214_v40  ;;  %2749 = vmatprep.mubr.bf16.mxu1 %v13214_v40 }
 0x221   :  { %v1422_v44 = vsel %vm1294_vm15, %v13350_v43, %v13453_v8  ;;  %v1430_v0 = vsel %vm1302_vm13, %v13444_v27, %v1366_v7  ;;  %v13563_v28 = vpack.c.bf16 %v1431_v3, %v1423_v55  ;;  %v13571_v58 = vsel %vm1265_vm14, %v13227_v53, %v13338_v33  ;;  %v14620_v8 = vld [vmem:[#allocation40_spill] sm:$0xff]  ;;  %v14621_v10 = vld [vmem:[#allocation29_spill] sm:$0xff]  ;;  %2597 = vmatprep.subr.bf16.mxu0 %v11453_v56  ;;  %v14625_v41 = vld [vmem:[#allocation30_spill] sm:$0xff] }
 0x222   :  { %v13565_v26 = vpack.c.bf16 %v1430_v0, %v1422_v44  ;;  %vm1305_vm1 = vcmp.gt.f32.partialorder %v13484_v37, 0.0  ;;  %v13578_v43 = vpack.c.bf16 %v13571_v58, %v13312_v6  ;;  %v1392_v27 = vsel %vm1264_vm0, %v13221_v42, %v13331_v45  ;;  %2743 = vmatprep.subr.bf16.mxu1 %v11456_v51  ;;  %v11457_v40 = vld [vmem:[#allocation8 + $0x7c0] ss:$16 sps:$4 sm:$0xff]   ;;  %v11460_v30 = vld [vmem:[#allocation8 + $0x7c8] ss:$16 sps:$4 sm:$0xff]   ;;  %2598 = vmatpush1.bf16.msra.mxu0 %v11451_v52 }
 0x223   :  { %vm14622_vm14 = vcmp.gt.f32.partialorder %v14621_v10, 0.0  ;;  %vm1304_vm15 = vcmp.gt.f32.partialorder %v13475_v2, 0.0  ;;  %v13590_v33 = vmul.f32 0.2, %v13484_v37  ;;  %v14623_v17 = vld [vmem:[#allocation25_spill] sm:$0xff]  ;;  %v14624_v63 = vld [vmem:[#allocation44_spill] sm:$0xff]  ;;  %v1425_v3 = vsel %vm1297_vm7, %v13411_v1, %v13500_v36  ;;  %2744 = vmatpush1.bf16.msra.mxu1 %v11454_v5  ;;  %2599 = vmatprep.subr.bf16.mxu0 %v11459_v32 }
 0x224   :  { %v1401_v53 = vsel %vm14622_vm14, %v14621_v10, %v14620_v8  ;;  %v13593_v7 = vpack.c.bf16 %v1392_v27, %v14623_v17  ;;  %vm14626_vm0 = vcmp.gt.f32.partialorder %v14625_v41, 0.0  ;;  %v14627_v45 = vld [vmem:[#allocation38_spill] sm:$0xff]  ;;  %v14628_v4 = vld [vmem:[#allocation28_spill] sm:$0xff]  ;;  %v11468_v22 = vld [vmem:[#allocation8 + $0x7ec] ss:$16 sps:$4 sm:$0xff]   ;;  %vm14631_vm13 = vcmp.gt.f32.partialorder %v13264_v11, 0.0  ;;  %2745 = vmatprep.subr.bf16.mxu1 %v11462_v31 }
 0x225   :  { %v1409_v42 = vsel %vm14626_vm0, %v14625_v41, %v14624_v63  ;;  %vm14629_vm5 = vcmp.gt.f32.partialorder %v14628_v4, 0.0  ;;  %v11465_v62 = vld [vmem:[#allocation8 + $0x7e4] ss:$16 sps:$4 sm:$0xff]   ;;  %vm14633_vm14 = vcmp.gt.f32.partialorder %v13323_v13, 0.0  ;;  %vm14637_vm7 = vcmp.gt.f32.partialorder %v13316_v16, 0.0  ;;  %v14639_v52 = vld [vmem:[#allocation35_spill] sm:$0xff] }
 0x226   :  { %v1400_v59 = vsel %vm14629_vm5, %v14628_v4, %v14627_v45  ;;  %v13603_v49 = vpack.c.bf16 %v1409_v42, %v1401_v53  ;;  %v14630_v56 = vld [vmem:[#allocation42_spill] sm:$0xff]  ;;  %v14632_v51 = vld [vmem:[#allocation48_spill] sm:$0xff]  ;;  %vm1307_vm5 = vcmp.gt.f32.partialorder %v13487_v29, 0.0  ;;  %vm14640_vm0 = vcmp.gt.f32.partialorder %v13199_v14, 0.0  ;;  %v14641_v32 = vld [vmem:[#allocation37_spill] sm:$0xff]  ;;  %2600 = vmatpush1.bf16.msra.mxu0 %v11457_v40 }
 0x227   :  { %v1408_v39 = vsel %vm14631_vm13, %v13264_v11, %v14630_v56  ;;  %v1417_v55 = vsel %vm14633_vm14, %v13323_v13, %v14632_v51  ;;  %v14634_v11 = vld [vmem:[#allocation31_spill] sm:$0xff]  ;;  %vm14635_vm13 = vcmp.gt.f32.partialorder %v13183_v47, 0.0  ;;  %v14636_v8 = vld [vmem:[#allocation46_spill] sm:$0xff]  ;;  %vm14638_vm14 = vcmp.gt.f32.partialorder %v13398_v46, 0.0  ;;  %2746 = vmatpush1.bf16.msra.mxu1 %v11460_v30  ;;  %v14647_v51 = vld [vmem:[#allocation45_spill] sm:$0xff]  ;;  %2601 = vmatprep.subr.bf16.mxu0 %v11465_v62 }
 0x228   :  { %v13619_v44 = vpack.c.bf16 %v1408_v39, %v1400_v59  ;;  %v13621_v0 = vpack.c.bf16 %v1425_v3, %v1417_v55  ;;  %v13627_v13 = vsel %vm14635_vm13, %v13183_v47, %v14634_v11  ;;  %v1416_v1 = vsel %vm14637_vm7, %v13316_v16, %v14636_v8  ;;  %v11463_v10 = vld [vmem:[#allocation8 + $0x7e0] ss:$16 sps:$4 sm:$0xff]   ;;  %v11466_v47 = vld [vmem:[#allocation8 + $0x7e8] ss:$16 sps:$4 sm:$0xff]   ;;  %v11471_v41 = vld [vmem:[#allocation8 + $0x4] ss:$16 sps:$4 sm:$0xff]   ;;  %2747 = vmatprep.subr.bf16.mxu1 %v11468_v22 }
 0x229   :  { %v1424_v36 = vsel %vm14638_vm14, %v13398_v46, %v13494_v60  ;;  %v1387_v5 = vsel %vm14640_vm0, %v13199_v14, %v14639_v52  ;;  %v1395_v31 = vsel %vm1267_vm3, %v13230_v54, %v14641_v32  ;;  %v14642_v16 = vld [vmem:[#allocation32_spill] sm:$0xff]  ;;  %vm14643_vm13 = vcmp.gt.f32.partialorder %v13191_v9, 0.0  ;;  %v11474_v45 = vld [vmem:[#allocation8 + $0xc] ss:$16 sps:$4 sm:$0xff]   ;;  %v14652_v22 = vld [vmem:[#allocation34_spill] sm:$0xff] }
 0x22a   :  { %v13641_v17 = vpack.c.bf16 %v1424_v36, %v1416_v1  ;;  %v13651_v63 = vsel %vm14643_vm13, %v13191_v9, %v14642_v16  ;;  %v14644_v46 = vld [vmem:[#allocation36_spill] sm:$0xff]  ;;  %vm14645_vm7 = vcmp.gt.f32.partialorder %v13224_v48, 0.0  ;;  %v1371_v60 = vmul.f32 0.2, %v13487_v29  ;;  %v14646_v54 = vld [vmem:[#allocation41_spill] sm:$0xff]  ;;  %v14648_v11 = vld [vmem:[#allocation39_spill] sm:$0xff]  ;;  %2602 = vmatpush1.bf16.msra.mxu0 %v11463_v10 }
 0x22b   :  { %v1394_v14 = vsel %vm14645_vm7, %v13224_v48, %v14644_v46  ;;  %v13658_v4 = vpack.c.bf16 %v1395_v31, %v1387_v5  ;;  %v1403_v9 = vsel %vm1275_vm4, %v13249_v23, %v14646_v54  ;;  %v1411_v48 = vsel %vm1283_vm6, %v13274_v20, %v14647_v51  ;;  %v14649_v52 = vld [vmem:[#allocation43_spill] sm:$0xff]  ;;  %v14650_v30 = vld [vmem:[#allocation49_spill] sm:$0xff]  ;;  %2748 = vmatpush1.bf16.msra.mxu1 %v11466_v47  ;;  %v11483_v10 = vld [vmem:[#allocation8 + $0x44] ss:$16 sps:$4 sm:$0xff]  }
 0x22c   :  { %v13661_v56 = vpack.c.bf16 %v1394_v14, %v13651_v63  ;;  %v1402_v8 = vsel %vm1274_vm2, %v13243_v18, %v14648_v11  ;;  %v1410_v32 = vsel %vm1282_vm8, %v13267_v12, %v14649_v52  ;;  %v13679_v23 = vpack.c.bf16 %v1411_v48, %v1403_v9  ;;  %v14651_v16 = vld [vmem:[#allocation47_spill] sm:$0xff]  ;;  %3430 = vmatprep.subr.bf16.mxu0 %v11471_v41 }
 0x22d   :  { %v13681_v40 = vpack.c.bf16 %v1410_v32, %v1402_v8  ;;  %v1419_v20 = vsel %vm1291_vm9, %v13326_v38, %v14650_v30  ;;  %v1427_v18 = vsel %vm1299_vm12, %v13414_v15, %v13522_v57  ;;  %v1418_v12 = vsel %vm1290_vm10, %v13319_v35, %v14651_v16  ;;  %v11469_v38 = vld [vmem:[#allocation8] ss:$16 sps:$4 sm:$0xff]   ;;  %v11472_v54 = vld [vmem:[#allocation8 + $0x8] ss:$16 sps:$4 sm:$0xff]   ;;  %v11477_v35 = vld [vmem:[#allocation8 + $0x24] ss:$16 sps:$4 sm:$0xff]   ;;  %3576 = vmatprep.subr.bf16.mxu1 %v11474_v45 }
 0x22e   :  { %v1426_v62 = vsel %vm1298_vm11, %v13401_v50, %v13497_v34  ;;  %v13701_v46 = vpack.c.bf16 %v13312_v6, %v14652_v22  ;;  %v13703_v51 = vpack.c.bf16 %v1427_v18, %v1419_v20  ;;  %v13708_v15 = vpack.c.bf16 %v1401_v53, %v13571_v58  ;;  %v11480_v52 = vld [vmem:[#allocation8 + $0x2c] ss:$16 sps:$4 sm:$0xff]   ;;  %v11481_v47 = vld [vmem:[#allocation8 + $0x40] ss:$16 sps:$4 sm:$0xff]   ;;  %v11490_v41 = vld [vmem:[#allocation8 + $0x68] ss:$16 sps:$4 sm:$0xff]  }
 0x22f   :  { %v13705_v11 = vpack.c.bf16 %v1426_v62, %v1418_v12  ;;  %v13710_v57 = vpack.c.bf16 %v1400_v59, %v1392_v27  ;;  %v13712_v50 = vpack.c.bf16 %v1417_v55, %v1409_v42  ;;  %v13714_v34 = vpack.c.bf16 %v1416_v1, %v1408_v39  ;;  %v14655_v55 = vld [vmem:[#allocation33_spill] sm:$0xff]  ;;  %v11495_v45 = vld [vmem:[#allocation8 + $0x84] ss:$16 sps:$4 sm:$0xff]  }
 0x230   :  { %v1433_v6 = vsel %vm1305_vm1, %v13484_v37, %v13590_v33  ;;  %v1432_v58 = vsel %vm1304_vm15, %v13475_v2, %v13538_v19  ;;  %v13727_v27 = vpack.c.bf16 %v1387_v5, %v13627_v13  ;;  %v13731_v42 = vpack.c.bf16 %v1403_v9, %v1395_v31  ;;  %v14653_v37 = vld [vmem:[#allocation24_spill] sm:$0xff]  ;;  %v11498_v9 = vld [vmem:[#allocation8 + $0x8c] ss:$16 sps:$4 sm:$0xff]  }
 0x231   :  { %v13720_v30 = vpack.c.bf16 %v1433_v6, %v1425_v3  ;;  %v13729_v53 = vpack.c.bf16 %v1432_v58, %v1424_v36  ;;  %v13733_v59 = vpack.c.bf16 %v1402_v8, %v1394_v14  ;;  %v13735_v39 = vpack.c.bf16 %v1419_v20, %v1411_v48  ;;  %2604 = vmatmul.mubr.bf16.vlgmr.msra.gmra.mrb[32].mxu0 %v14653_v37  ;;  %v11475_v36 = vld [vmem:[#allocation8 + $0x20] ss:$16 sps:$4 sm:$0xff]   ;;  %v11478_v5 = vld [vmem:[#allocation8 + $0x28] ss:$16 sps:$4 sm:$0xff]   ;;  %v11489_v14 = vld [vmem:[#allocation8 + $0x64] ss:$16 sps:$4 sm:$0xff]  }
 0x232   :  { %2750 = vmatmul.mubr.bf16.vlgmr.msra.gmra.mrb[32].mxu1 %v14653_v37  ;;  %v13739_v33 = vpack.c.bf16 %v1418_v12, %v1410_v32  ;;  %v1435_v2 = vsel %vm1307_vm5, %v13487_v29, %v1371_v60  ;;  %vm14654_vm4 = vcmp.gt.f32.partialorder %v13478_v24, 0.0  ;;  %2613 = vmatprep.mubr.bf16.mxu0 %v14655_v55  ;;  %v11486_v29 = vld [vmem:[#allocation8 + $0x4c] ss:$16 sps:$4 sm:$0xff]   ;;  %v11484_v31 = vld [vmem:[#allocation8 + $0x48] ss:$16 sps:$4 sm:$0xff]  }
 0x233   :  { %v1434_v19 = vsel %vm14654_vm4, %v13478_v24, %v13551_v61  ;;  %2759 = vmatprep.mubr.bf16.mxu1 %v14655_v55  ;;  %v13750_v3 = vpack.c.bf16 %v1435_v2, %v1427_v18  ;;  %3431 = vmatpush1.bf16.msra.mxu0 %v11469_v38  ;;  %v11492_v24 = vld [vmem:[#allocation8 + $0x6c] ss:$16 sps:$4 sm:$0xff]   ;;  %v14656_v61 = vld [vmem:[#allocation50_spill] sm:$0xff] }
 0x234   :  { %v13752_v1 = vpack.c.bf16 %v1434_v19, %v1426_v62  ;;  %3577 = vmatpush1.bf16.msra.mxu1 %v11472_v54  ;;  %3432 = vmatprep.subr.bf16.mxu0 %v11477_v35  ;;  %v11487_v60 = vld [vmem:[#allocation8 + $0x60] ss:$16 sps:$4 sm:$0xff]   ;;  %v11496_v8 = vld [vmem:[#allocation8 + $0x88] ss:$16 sps:$4 sm:$0xff]   ;;  %v11501_v32 = vld [vmem:[#allocation8 + $0xa4] ss:$16 sps:$4 sm:$0xff]  }
 0x235   :  { %3578 = vmatprep.subr.bf16.mxu1 %v11480_v52  ;;  %v11493_v48 = vld [vmem:[#allocation8 + $0x80] ss:$16 sps:$4 sm:$0xff]   ;;  %v11504_v20 = vld [vmem:[#allocation8 + $0xac] ss:$16 sps:$4 sm:$0xff]   ;;  %v11502_v18 = vld [vmem:[#allocation8 + $0xa8] ss:$16 sps:$4 sm:$0xff]  }
 0x236   :  { %v11507_v16 = vld [vmem:[#allocation8 + $0xc4] ss:$16 sps:$4 sm:$0xff]   ;;  %v11510_v12 = vld [vmem:[#allocation8 + $0xcc] ss:$16 sps:$4 sm:$0xff]   ;;  %v11505_v62 = vld [vmem:[#allocation8 + $0xc0] ss:$16 sps:$4 sm:$0xff]  }
 0x237   :  { %3433 = vmatpush1.bf16.msra.mxu0 %v11475_v36  ;;  %v11508_v38 = vld [vmem:[#allocation8 + $0xc8] ss:$16 sps:$4 sm:$0xff]   ;;  %v11513_v54 = vld [vmem:[#allocation8 + $0xe4] ss:$16 sps:$4 sm:$0xff]   ;;  %v11516_v35 = vld [vmem:[#allocation8 + $0xec] ss:$16 sps:$4 sm:$0xff]  }
 0x238   :  { %3579 = vmatpush1.bf16.msra.mxu1 %v11478_v5  ;;  %3434 = vmatprep.subr.bf16.mxu0 %v11483_v10  ;;  %v11511_v52 = vld [vmem:[#allocation8 + $0xe0] ss:$16 sps:$4 sm:$0xff]   ;;  %v11514_v6 = vld [vmem:[#allocation8 + $0xe8] ss:$16 sps:$4 sm:$0xff]   ;;  %v11519_v58 = vld [vmem:[#allocation8 + $0x104] ss:$16 sps:$4 sm:$0xff]  }
 0x239   :  { %3580 = vmatprep.subr.bf16.mxu1 %v11486_v29  ;;  %2614 = vmatmul.mubr.bf16.gmra.mrb[36].mxu0 %v14656_v61  ;;  %v11522_v37 = vld [vmem:[#allocation8 + $0x10c] ss:$16 sps:$4 sm:$0xff]   ;;  %v11517_v2 = vld [vmem:[#allocation8 + $0x100] ss:$16 sps:$4 sm:$0xff]   ;;  %v11520_v19 = vld [vmem:[#allocation8 + $0x108] ss:$16 sps:$4 sm:$0xff]  }
 0x23a   :  { %2760 = vmatmul.mubr.bf16.gmra.mrb[36].mxu1 %v14656_v61  ;;  %2623 = vmatprep.mubr.bf16.mxu0 %v13540_v21  ;;  %v11525_v55 = vld [vmem:[#allocation8 + $0x124] ss:$16 sps:$4 sm:$0xff]   ;;  %v11528_v36 = vld [vmem:[#allocation8 + $0x12c] ss:$16 sps:$4 sm:$0xff]   ;;  %v11529_v29 = vld [vmem:[#allocation8 + $0x140] ss:$16 sps:$4 sm:$0xff]  }
 0x23b   :  { %2769 = vmatprep.mubr.bf16.mxu1 %v13540_v21  ;;  %3435 = vmatpush1.bf16.msra.mxu0 %v11481_v47  ;;  %v11499_v21 = vld [vmem:[#allocation8 + $0xa0] ss:$16 sps:$4 sm:$0xff]   ;;  %v11531_v5 = vld [vmem:[#allocation8 + $0x144] ss:$16 sps:$4 sm:$0xff]   ;;  %v11534_v10 = vld [vmem:[#allocation8 + $0x14c] ss:$16 sps:$4 sm:$0xff]  }
 0x23c   :  { %3581 = vmatpush1.bf16.msra.mxu1 %v11484_v31  ;;  %3436 = vmatprep.subr.bf16.mxu0 %v11489_v14  ;;  %v11532_v47 = vld [vmem:[#allocation8 + $0x148] ss:$16 sps:$4 sm:$0xff]   ;;  %v11537_v31 = vld [vmem:[#allocation8 + $0x164] ss:$16 sps:$4 sm:$0xff]   ;;  %v11540_v14 = vld [vmem:[#allocation8 + $0x16c] ss:$16 sps:$4 sm:$0xff]  }
 0x23d   :  { %3582 = vmatprep.subr.bf16.mxu1 %v11492_v24  ;;  %v11535_v24 = vld [vmem:[#allocation8 + $0x160] ss:$16 sps:$4 sm:$0xff]   ;;  %v11538_v61 = vld [vmem:[#allocation8 + $0x168] ss:$16 sps:$4 sm:$0xff]  }
 0x23f   :  { %3437 = vmatpush1.bf16.msra.mxu0 %v11487_v60  ;;  %v11543_v60 = vld [vmem:[#allocation8 + $0x184] ss:$16 sps:$4 sm:$0xff]  }
 0x240   :  { %3583 = vmatpush1.bf16.msra.mxu1 %v11490_v41  ;;  %3438 = vmatprep.subr.bf16.mxu0 %v11495_v45  ;;  %v11546_v41 = vld [vmem:[#allocation8 + $0x18c] ss:$16 sps:$4 sm:$0xff]   ;;  %v11541_v45 = vld [vmem:[#allocation8 + $0x180] ss:$16 sps:$4 sm:$0xff]  }
 0x241   :  { %3584 = vmatprep.subr.bf16.mxu1 %v11498_v9  ;;  %2624 = vmatmul.mubr.bf16.gmra.mrb[40].mxu0 %v13542_v25  ;;  %v11544_v9 = vld [vmem:[#allocation8 + $0x188] ss:$16 sps:$4 sm:$0xff]  }
 0x242   :  { %2770 = vmatmul.mubr.bf16.gmra.mrb[40].mxu1 %v13542_v25  ;;  %2633 = vmatprep.mubr.bf16.mxu0 %v13563_v28  ;;  %v12737_v25 = vmov 0.0  }
 0x243   :  { %2779 = vmatprep.mubr.bf16.mxu1 %v13563_v28  ;;  %3439 = vmatpush1.bf16.msra.mxu0 %v11493_v48  ;;  %v1570_v28 = vpack.c.bf16 %v14652_v22, %v12737_v25  ;;  %v11523_v22 = vld [vmem:[#allocation8 + $0x120] ss:$16 sps:$4 sm:$0xff]   ;;  %v11549_v48 = vld [vmem:[#allocation8 + $0x1a4] ss:$16 sps:$4 sm:$0xff]  }
 0x244   :  { %3585 = vmatpush1.bf16.msra.mxu1 %v11496_v8  ;;  %3440 = vmatprep.subr.bf16.mxu0 %v11501_v32  ;;  %v11552_v8 = vld [vmem:[#allocation8 + $0x1ac] ss:$16 sps:$4 sm:$0xff]   ;;  %v11547_v32 = vld [vmem:[#allocation8 + $0x1a0] ss:$16 sps:$4 sm:$0xff]  }
 0x245   :  { %3586 = vmatprep.subr.bf16.mxu1 %v11504_v20  ;;  %v11550_v20 = vld [vmem:[#allocation8 + $0x1a8] ss:$16 sps:$4 sm:$0xff]  }
 0x247   :  { %3441 = vmatpush1.bf16.msra.mxu0 %v11499_v21  ;;  %v11555_v21 = vld [vmem:[#allocation8 + $0x1c4] ss:$16 sps:$4 sm:$0xff]  }
 0x248   :  { %3587 = vmatpush1.bf16.msra.mxu1 %v11502_v18  ;;  %3442 = vmatprep.subr.bf16.mxu0 %v11507_v16  ;;  %v11558_v18 = vld [vmem:[#allocation8 + $0x1cc] ss:$16 sps:$4 sm:$0xff]   ;;  %v11553_v16 = vld [vmem:[#allocation8 + $0x1c0] ss:$16 sps:$4 sm:$0xff]  }
 0x249   :  { %3588 = vmatprep.subr.bf16.mxu1 %v11510_v12  ;;  %2634 = vmatmul.mubr.bf16.gmra.mrb[44].mxu0 %v13565_v26  ;;  %v11556_v12 = vld [vmem:[#allocation8 + $0x1c8] ss:$16 sps:$4 sm:$0xff]  }
 0x24a   :  { %2780 = vmatmul.mubr.bf16.gmra.mrb[44].mxu1 %v13565_v26  ;;  %3462 = vmatprep.mubr.bf16.mxu0 %v1570_v28  ;;  %v11526_v26 = vld [vmem:[#allocation8 + $0x128] ss:$16 sps:$4 sm:$0xff]  }
 0x24b   :  { %3608 = vmatprep.mubr.bf16.mxu1 %v1570_v28  ;;  %3443 = vmatpush1.bf16.msra.mxu0 %v11505_v62  ;;  %v11561_v62 = vld [vmem:[#allocation8 + $0x1e4] ss:$16 sps:$4 sm:$0xff]  }
 0x24c   :  { %3589 = vmatpush1.bf16.msra.mxu1 %v11508_v38  ;;  %3444 = vmatprep.subr.bf16.mxu0 %v11513_v54  ;;  %v11564_v38 = vld [vmem:[#allocation8 + $0x1ec] ss:$16 sps:$4 sm:$0xff]   ;;  %v11559_v54 = vld [vmem:[#allocation8 + $0x1e0] ss:$16 sps:$4 sm:$0xff]   ;;  %v11567_v28 = vld [vmem:[#allocation8 + $0x204] ss:$16 sps:$4 sm:$0xff]  }
 0x24d   :  { %3590 = vmatprep.subr.bf16.mxu1 %v11516_v35  ;;  %v11562_v35 = vld [vmem:[#allocation8 + $0x1e8] ss:$16 sps:$4 sm:$0xff]  }
 0x24f   :  { %3445 = vmatpush1.bf16.msra.mxu0 %v11511_v52  ;;  %v11570_v52 = vld [vmem:[#allocation8 + $0x20c] ss:$16 sps:$4 sm:$0xff]  }
 0x250   :  { %3591 = vmatpush1.bf16.msra.mxu1 %v11514_v6  ;;  %3446 = vmatprep.subr.bf16.mxu0 %v11519_v58  ;;  %v11565_v6 = vld [vmem:[#allocation8 + $0x200] ss:$16 sps:$4 sm:$0xff]   ;;  %v11568_v58 = vld [vmem:[#allocation8 + $0x208] ss:$16 sps:$4 sm:$0xff]  }
 0x251   :  { %3592 = vmatprep.subr.bf16.mxu1 %v11522_v37  ;;  %v11573_v37 = vld [vmem:[#allocation8 + $0x224] ss:$16 sps:$4 sm:$0xff]  }
 0x253   :  { %3447 = vmatpush1.bf16.msra.mxu0 %v11517_v2  ;;  %v11576_v2 = vld [vmem:[#allocation8 + $0x22c] ss:$16 sps:$4 sm:$0xff]  }
 0x254   :  { %3593 = vmatpush1.bf16.msra.mxu1 %v11520_v19  ;;  %3448 = vmatprep.subr.bf16.mxu0 %v11525_v55  ;;  %v14657_v19 = vld [vmem:[#allocation26_spill] sm:$0xff] }
 0x255   :  { %3594 = vmatprep.subr.bf16.mxu1 %v11528_v36  ;;  %v1569_v55 = vpack.c.bf16 %v14657_v19, %v12737_v25  ;;  %v11571_v36 = vld [vmem:[#allocation8 + $0x220] ss:$16 sps:$4 sm:$0xff]   ;;  %v11636_v19 = vld [vmem:[#allocation8 + $0x36c] ss:$16 sps:$4 sm:$0xff]  }
 0x257   :  { %3449 = vmatpush1.bf16.msra.mxu0 %v11523_v22  ;;  %v11574_v22 = vld [vmem:[#allocation8 + $0x228] ss:$16 sps:$4 sm:$0xff]  }
 0x258   :  { %3595 = vmatpush1.bf16.msra.mxu1 %v11526_v26  ;;  %3450 = vmatprep.subr.bf16.mxu0 %v11531_v5  ;;  %v11579_v26 = vld [vmem:[#allocation8 + $0x244] ss:$16 sps:$4 sm:$0xff]   ;;  %v11582_v5 = vld [vmem:[#allocation8 + $0x24c] ss:$16 sps:$4 sm:$0xff]  }
 0x259   :  { %3596 = vmatprep.subr.bf16.mxu1 %v11534_v10  ;;  %v11577_v10 = vld [vmem:[#allocation8 + $0x240] ss:$16 sps:$4 sm:$0xff]  }
 0x25b   :  { %3451 = vmatpush1.bf16.msra.mxu0 %v11529_v29  ;;  %v11580_v29 = vld [vmem:[#allocation8 + $0x248] ss:$16 sps:$4 sm:$0xff]  }
 0x25c   :  { %3597 = vmatpush1.bf16.msra.mxu1 %v11532_v47  ;;  %3452 = vmatprep.subr.bf16.mxu0 %v11537_v31  ;;  %v11585_v47 = vld [vmem:[#allocation8 + $0x264] ss:$16 sps:$4 sm:$0xff]   ;;  %v11588_v31 = vld [vmem:[#allocation8 + $0x26c] ss:$16 sps:$4 sm:$0xff]  }
 0x25d   :  { %3598 = vmatprep.subr.bf16.mxu1 %v11540_v14  ;;  %v11586_v14 = vld [vmem:[#allocation8 + $0x268] ss:$16 sps:$4 sm:$0xff]  }
 0x25f   :  { %3453 = vmatpush1.bf16.msra.mxu0 %v11535_v24  ;;  %v11591_v24 = vld [vmem:[#allocation8 + $0x284] ss:$16 sps:$4 sm:$0xff]  }
 0x260   :  { %3599 = vmatpush1.bf16.msra.mxu1 %v11538_v61  ;;  %3454 = vmatprep.subr.bf16.mxu0 %v11543_v60  ;;  %v11594_v61 = vld [vmem:[#allocation8 + $0x28c] ss:$16 sps:$4 sm:$0xff]   ;;  %v11589_v60 = vld [vmem:[#allocation8 + $0x280] ss:$16 sps:$4 sm:$0xff]  }
 0x261   :  { %3600 = vmatprep.subr.bf16.mxu1 %v11546_v41  ;;  %v11592_v41 = vld [vmem:[#allocation8 + $0x288] ss:$16 sps:$4 sm:$0xff]  }
 0x263   :  { %3455 = vmatpush1.bf16.msra.mxu0 %v11541_v45  ;;  %v11597_v45 = vld [vmem:[#allocation8 + $0x2a4] ss:$16 sps:$4 sm:$0xff]  }
 0x264   :  { %3601 = vmatpush1.bf16.msra.mxu1 %v11544_v9  ;;  %3456 = vmatprep.subr.bf16.mxu0 %v11549_v48  ;;  %v11600_v9 = vld [vmem:[#allocation8 + $0x2ac] ss:$16 sps:$4 sm:$0xff]   ;;  %v11603_v48 = vld [vmem:[#allocation8 + $0x2c4] ss:$16 sps:$4 sm:$0xff]  }
 0x265   :  { %3602 = vmatprep.subr.bf16.mxu1 %v11552_v8  ;;  %v11606_v8 = vld [vmem:[#allocation8 + $0x2cc] ss:$16 sps:$4 sm:$0xff]  }
 0x267   :  { %3457 = vmatpush1.bf16.msra.mxu0 %v11547_v32  ;;  %v11601_v32 = vld [vmem:[#allocation8 + $0x2c0] ss:$16 sps:$4 sm:$0xff]  }
 0x268   :  { %3603 = vmatpush1.bf16.msra.mxu1 %v11550_v20  ;;  %3458 = vmatprep.subr.bf16.mxu0 %v11555_v21  ;;  %v11604_v20 = vld [vmem:[#allocation8 + $0x2c8] ss:$16 sps:$4 sm:$0xff]   ;;  %v11609_v21 = vld [vmem:[#allocation8 + $0x2e4] ss:$16 sps:$4 sm:$0xff]  }
 0x269   :  { %3604 = vmatprep.subr.bf16.mxu1 %v11558_v18  ;;  %v11612_v18 = vld [vmem:[#allocation8 + $0x2ec] ss:$16 sps:$4 sm:$0xff]  }
 0x26b   :  { %3459 = vmatpush1.bf16.msra.mxu0 %v11553_v16  ;;  %v11610_v16 = vld [vmem:[#allocation8 + $0x2e8] ss:$16 sps:$4 sm:$0xff]  }
 0x26c   :  { %3605 = vmatpush1.bf16.msra.mxu1 %v11556_v12  ;;  %3460 = vmatprep.subr.bf16.mxu0 %v11561_v62  ;;  %v11615_v12 = vld [vmem:[#allocation8 + $0x304] ss:$16 sps:$4 sm:$0xff]   ;;  %v11618_v62 = vld [vmem:[#allocation8 + $0x30c] ss:$16 sps:$4 sm:$0xff]  }
 0x26d   :  { %3606 = vmatprep.subr.bf16.mxu1 %v11564_v38  ;;  %v11613_v38 = vld [vmem:[#allocation8 + $0x300] ss:$16 sps:$4 sm:$0xff]  }
 0x26f   :  { %3461 = vmatpush1.bf16.msra.mxu0 %v11559_v54  ;;  %v11616_v54 = vld [vmem:[#allocation8 + $0x308] ss:$16 sps:$4 sm:$0xff]  }
 0x270   :  { %3607 = vmatpush1.bf16.msra.mxu1 %v11562_v35  ;;  %3503 = vmatprep.subr.bf16.mxu0 %v11567_v28  ;;  %v11624_v35 = vld [vmem:[#allocation8 + $0x32c] ss:$16 sps:$4 sm:$0xff]   ;;  %v11622_v28 = vld [vmem:[#allocation8 + $0x328] ss:$16 sps:$4 sm:$0xff]  }
 0x271   :  { %3649 = vmatprep.subr.bf16.mxu1 %v11570_v52  ;;  %v11627_v52 = vld [vmem:[#allocation8 + $0x344] ss:$16 sps:$4 sm:$0xff]  }
 0x272   :  { %3463 = vmatmul.mubr.bf16.vlgmr.msra.gmra.mrb[32].mxu0 %v1569_v55 }
 0x273   :  { %3609 = vmatmul.mubr.bf16.vlgmr.msra.gmra.mrb[32].mxu1 %v1569_v55  ;;  %3472 = vmatprep.mubr.bf16.mxu0 %v13578_v43  ;;  %v11631_v55 = vld [vmem:[#allocation8 + $0x360] ss:$16 sps:$4 sm:$0xff]  }
 0x274   :  { %3504 = vmatpush1.bf16.msra.mxu0 %v11565_v6  ;;  %3618 = vmatprep.mubr.bf16.mxu1 %v13578_v43  ;;  %v11583_v43 = vld [vmem:[#allocation8 + $0x260] ss:$16 sps:$4 sm:$0xff]   ;;  %v11630_v6 = vld [vmem:[#allocation8 + $0x34c] ss:$16 sps:$4 sm:$0xff]  }
 0x275   :  { %3650 = vmatpush1.bf16.msra.mxu1 %v11568_v58  ;;  %3505 = vmatprep.subr.bf16.mxu0 %v11573_v37  ;;  %v11625_v58 = vld [vmem:[#allocation8 + $0x340] ss:$16 sps:$4 sm:$0xff]   ;;  %v11628_v37 = vld [vmem:[#allocation8 + $0x348] ss:$16 sps:$4 sm:$0xff]  }
 0x276   :  { %3651 = vmatprep.subr.bf16.mxu1 %v11576_v2  ;;  %v11633_v2 = vld [vmem:[#allocation8 + $0x364] ss:$16 sps:$4 sm:$0xff]  }
 0x278   :  { %3506 = vmatpush1.bf16.msra.mxu0 %v11571_v36  ;;  %v11634_v36 = vld [vmem:[#allocation8 + $0x368] ss:$16 sps:$4 sm:$0xff]  }
 0x279   :  { %3652 = vmatpush1.bf16.msra.mxu1 %v11574_v22  ;;  %3507 = vmatprep.subr.bf16.mxu0 %v11579_v26  ;;  %v11639_v22 = vld [vmem:[#allocation8 + $0x384] ss:$16 sps:$4 sm:$0xff]   ;;  %v11642_v26 = vld [vmem:[#allocation8 + $0x38c] ss:$16 sps:$4 sm:$0xff]  }
 0x27a   :  { %3653 = vmatprep.subr.bf16.mxu1 %v11582_v5  ;;  %3473 = vmatmul.mubr.bf16.gmra.mrb[36].mxu0 %v13593_v7  ;;  %v11637_v5 = vld [vmem:[#allocation8 + $0x380] ss:$16 sps:$4 sm:$0xff]  }
 0x27b   :  { %3619 = vmatmul.mubr.bf16.gmra.mrb[36].mxu1 %v13593_v7  ;;  %3482 = vmatprep.mubr.bf16.mxu0 %v13603_v49  ;;  %v11595_v7 = vld [vmem:[#allocation8 + $0x2a0] ss:$16 sps:$4 sm:$0xff]  }
 0x27c   :  { %3508 = vmatpush1.bf16.msra.mxu0 %v11577_v10  ;;  %3628 = vmatprep.mubr.bf16.mxu1 %v13603_v49  ;;  %v11598_v49 = vld [vmem:[#allocation8 + $0x2a8] ss:$16 sps:$4 sm:$0xff]  }
 0x27d   :  { %3654 = vmatpush1.bf16.msra.mxu1 %v11580_v29  ;;  %3509 = vmatprep.subr.bf16.mxu0 %v11585_v47  ;;  %v11640_v10 = vld [vmem:[#allocation8 + $0x388] ss:$16 sps:$4 sm:$0xff]   ;;  %v11645_v29 = vld [vmem:[#allocation8 + $0x3a4] ss:$16 sps:$4 sm:$0xff]   ;;  %v11648_v47 = vld [vmem:[#allocation8 + $0x3ac] ss:$16 sps:$4 sm:$0xff]  }
 0x27e   :  { %3655 = vmatprep.subr.bf16.mxu1 %v11588_v31  ;;  %v11643_v31 = vld [vmem:[#allocation8 + $0x3a0] ss:$16 sps:$4 sm:$0xff]  }
 0x280   :  { %3510 = vmatpush1.bf16.msra.mxu0 %v11583_v43  ;;  %v11646_v43 = vld [vmem:[#allocation8 + $0x3a8] ss:$16 sps:$4 sm:$0xff]  }
 0x281   :  { %3656 = vmatpush1.bf16.msra.mxu1 %v11586_v14  ;;  %3511 = vmatprep.subr.bf16.mxu0 %v11591_v24  ;;  %v11651_v14 = vld [vmem:[#allocation8 + $0x3c4] ss:$16 sps:$4 sm:$0xff]   ;;  %v11654_v24 = vld [vmem:[#allocation8 + $0x3cc] ss:$16 sps:$4 sm:$0xff]  }
 0x282   :  { %3657 = vmatprep.subr.bf16.mxu1 %v11594_v61  ;;  %3483 = vmatmul.mubr.bf16.gmra.mrb[40].mxu0 %v13619_v44  ;;  %v11649_v61 = vld [vmem:[#allocation8 + $0x3c0] ss:$16 sps:$4 sm:$0xff]  }
 0x283   :  { %3629 = vmatmul.mubr.bf16.gmra.mrb[40].mxu1 %v13619_v44  ;;  %3492 = vmatprep.mubr.bf16.mxu0 %v13621_v0  ;;  %v1572_v44 = vpack.c.bf16 %v13627_v13, %v12737_v25  ;;  %v11621_v13 = vld [vmem:[#allocation8 + $0x324] ss:$16 sps:$4 sm:$0xff]  }
 0x284   :  { %3512 = vmatpush1.bf16.msra.mxu0 %v11589_v60  ;;  %3638 = vmatprep.mubr.bf16.mxu1 %v13621_v0  ;;  %v11607_v0 = vld [vmem:[#allocation8 + $0x2e0] ss:$16 sps:$4 sm:$0xff]   ;;  %v11652_v60 = vld [vmem:[#allocation8 + $0x3c8] ss:$16 sps:$4 sm:$0xff]  }
 0x285   :  { %3658 = vmatpush1.bf16.msra.mxu1 %v11592_v41  ;;  %3513 = vmatprep.subr.bf16.mxu0 %v11597_v45  ;;  %v11657_v41 = vld [vmem:[#allocation8 + $0x3e4] ss:$16 sps:$4 sm:$0xff]   ;;  %v14658_v45 = vld [vmem:[#allocation23_spill] sm:$0xff] }
 0x286   :  { %3659 = vmatprep.subr.bf16.mxu1 %v11600_v9  ;;  %v1314_v9 = vmul.f32 0.2, %v14658_v45  ;;  %vm1250_vm8 = vcmp.gt.f32.partialorder %v14658_v45, 0.0 }
 0x288   :  { %3514 = vmatpush1.bf16.msra.mxu0 %v11595_v7  ;;  %v11660_v7 = vld [vmem:[#allocation8 + $0x3ec] ss:$16 sps:$4 sm:$0xff]  }
 0x289   :  { %3660 = vmatpush1.bf16.msra.mxu1 %v11598_v49  ;;  %3515 = vmatprep.subr.bf16.mxu0 %v11603_v48  ;;  %v11655_v49 = vld [vmem:[#allocation8 + $0x3e0] ss:$16 sps:$4 sm:$0xff]   ;;  %v11658_v48 = vld [vmem:[#allocation8 + $0x3e8] ss:$16 sps:$4 sm:$0xff]  }
 0x28a   :  { %3661 = vmatprep.subr.bf16.mxu1 %v11606_v8  ;;  %3493 = vmatmul.mubr.bf16.gmra.mrb[44].mxu0 %v13641_v17  ;;  %v11663_v8 = vld [vmem:[#allocation8 + $0x804] ss:$16 sps:$4 sm:$0xff]  }
 0x28b   :  { %3639 = vmatmul.mubr.bf16.gmra.mrb[44].mxu1 %v13641_v17  ;;  %3535 = vmatprep.mubr.bf16.mxu0 %v1572_v44  ;;  %v11619_v17 = vld [vmem:[#allocation8 + $0x320] ss:$16 sps:$4 sm:$0xff]  }
 0x28c   :  { %3516 = vmatpush1.bf16.msra.mxu0 %v11601_v32  ;;  %3681 = vmatprep.mubr.bf16.mxu1 %v1572_v44  ;;  %v13785_v32 = vsel %vm1250_vm8, %v14658_v45, %v1314_v9  ;;  %v11664_v44 = vld [vmem:[#allocation8 + $0x808] ss:$16 sps:$4 sm:$0xff]   ;;  %v11721_v45 = vld [vmem:[#allocation8 + $0x940] ss:$16 sps:$4 sm:$0xff]  }
 0x28d   :  { %3662 = vmatpush1.bf16.msra.mxu1 %v11604_v20  ;;  %3517 = vmatprep.subr.bf16.mxu0 %v11609_v21  ;;  %v11666_v20 = vld [vmem:[#allocation8 + $0x80c] ss:$16 sps:$4 sm:$0xff]   ;;  %v1571_v21 = vpack.c.bf16 %v13785_v32, %v12737_v25  ;;  %v11724_v9 = vld [vmem:[#allocation8 + $0x948] ss:$16 sps:$4 sm:$0xff]  }
 0x28e   :  { %3663 = vmatprep.subr.bf16.mxu1 %v11612_v18  ;;  %v11661_v18 = vld [vmem:[#allocation8 + $0x800] ss:$16 sps:$4 sm:$0xff]  }
 0x290   :  { %3518 = vmatpush1.bf16.msra.mxu0 %v11607_v0  ;;  %v11669_v0 = vld [vmem:[#allocation8 + $0x824] ss:$16 sps:$4 sm:$0xff]  }
 0x291   :  { %3664 = vmatpush1.bf16.msra.mxu1 %v11610_v16  ;;  %3519 = vmatprep.subr.bf16.mxu0 %v11615_v12  ;;  %v11672_v16 = vld [vmem:[#allocation8 + $0x82c] ss:$16 sps:$4 sm:$0xff]   ;;  %v11667_v12 = vld [vmem:[#allocation8 + $0x820] ss:$16 sps:$4 sm:$0xff]  }
 0x292   :  { %3665 = vmatprep.subr.bf16.mxu1 %v11618_v62  ;;  %v11670_v62 = vld [vmem:[#allocation8 + $0x828] ss:$16 sps:$4 sm:$0xff]  }
 0x294   :  { %3520 = vmatpush1.bf16.msra.mxu0 %v11613_v38  ;;  %v11675_v38 = vld [vmem:[#allocation8 + $0x844] ss:$16 sps:$4 sm:$0xff]  }
 0x295   :  { %3666 = vmatpush1.bf16.msra.mxu1 %v11616_v54  ;;  %3521 = vmatprep.subr.bf16.mxu0 %v11621_v13  ;;  %v11678_v54 = vld [vmem:[#allocation8 + $0x84c] ss:$16 sps:$4 sm:$0xff]   ;;  %v11673_v13 = vld [vmem:[#allocation8 + $0x840] ss:$16 sps:$4 sm:$0xff]  }
 0x296   :  { %3667 = vmatprep.subr.bf16.mxu1 %v11624_v35  ;;  %v11676_v35 = vld [vmem:[#allocation8 + $0x848] ss:$16 sps:$4 sm:$0xff]  }
 0x298   :  { %3522 = vmatpush1.bf16.msra.mxu0 %v11619_v17  ;;  %v11681_v17 = vld [vmem:[#allocation8 + $0x864] ss:$16 sps:$4 sm:$0xff]  }
 0x299   :  { %3668 = vmatpush1.bf16.msra.mxu1 %v11622_v28  ;;  %3523 = vmatprep.subr.bf16.mxu0 %v11627_v52  ;;  %v11684_v28 = vld [vmem:[#allocation8 + $0x86c] ss:$16 sps:$4 sm:$0xff]   ;;  %v11682_v52 = vld [vmem:[#allocation8 + $0x868] ss:$16 sps:$4 sm:$0xff]  }
 0x29a   :  { %3669 = vmatprep.subr.bf16.mxu1 %v11630_v6  ;;  %v11687_v6 = vld [vmem:[#allocation8 + $0x884] ss:$16 sps:$4 sm:$0xff]  }
 0x29c   :  { %3524 = vmatpush1.bf16.msra.mxu0 %v11625_v58  ;;  %v11690_v58 = vld [vmem:[#allocation8 + $0x88c] ss:$16 sps:$4 sm:$0xff]  }
 0x29d   :  { %3670 = vmatpush1.bf16.msra.mxu1 %v11628_v37  ;;  %3525 = vmatprep.subr.bf16.mxu0 %v11633_v2  ;;  %v11685_v37 = vld [vmem:[#allocation8 + $0x880] ss:$16 sps:$4 sm:$0xff]   ;;  %v11688_v2 = vld [vmem:[#allocation8 + $0x888] ss:$16 sps:$4 sm:$0xff]  }
 0x29e   :  { %3671 = vmatprep.subr.bf16.mxu1 %v11636_v19  ;;  %v11693_v19 = vld [vmem:[#allocation8 + $0x8a4] ss:$16 sps:$4 sm:$0xff]  }
 0x2a0   :  { %3526 = vmatpush1.bf16.msra.mxu0 %v11631_v55  ;;  %v11694_v55 = vld [vmem:[#allocation8 + $0x8a8] ss:$16 sps:$4 sm:$0xff]  }
 0x2a1   :  { %3672 = vmatpush1.bf16.msra.mxu1 %v11634_v36  ;;  %3527 = vmatprep.subr.bf16.mxu0 %v11639_v22  ;;  %v11699_v36 = vld [vmem:[#allocation8 + $0x8c4] ss:$16 sps:$4 sm:$0xff]   ;;  %v11702_v22 = vld [vmem:[#allocation8 + $0x8cc] ss:$16 sps:$4 sm:$0xff]  }
 0x2a2   :  { %3673 = vmatprep.subr.bf16.mxu1 %v11642_v26  ;;  %v11697_v26 = vld [vmem:[#allocation8 + $0x8c0] ss:$16 sps:$4 sm:$0xff]  }
 0x2a4   :  { %3528 = vmatpush1.bf16.msra.mxu0 %v11637_v5  ;;  %v11700_v5 = vld [vmem:[#allocation8 + $0x8c8] ss:$16 sps:$4 sm:$0xff]  }
 0x2a5   :  { %3674 = vmatpush1.bf16.msra.mxu1 %v11640_v10  ;;  %3529 = vmatprep.subr.bf16.mxu0 %v11645_v29  ;;  %v11705_v10 = vld [vmem:[#allocation8 + $0x8e4] ss:$16 sps:$4 sm:$0xff]   ;;  %v11706_v29 = vld [vmem:[#allocation8 + $0x8e8] ss:$16 sps:$4 sm:$0xff]  }
 0x2a6   :  { %3675 = vmatprep.subr.bf16.mxu1 %v11648_v47  ;;  %v11711_v47 = vld [vmem:[#allocation8 + $0x904] ss:$16 sps:$4 sm:$0xff]  }
 0x2a8   :  { %3530 = vmatpush1.bf16.msra.mxu0 %v11643_v31  ;;  %v11714_v31 = vld [vmem:[#allocation8 + $0x90c] ss:$16 sps:$4 sm:$0xff]  }
 0x2a9   :  { %3676 = vmatpush1.bf16.msra.mxu1 %v11646_v43  ;;  %3531 = vmatprep.subr.bf16.mxu0 %v11651_v14  ;;  %v11709_v43 = vld [vmem:[#allocation8 + $0x900] ss:$16 sps:$4 sm:$0xff]   ;;  %v11712_v14 = vld [vmem:[#allocation8 + $0x908] ss:$16 sps:$4 sm:$0xff]  }
 0x2aa   :  { %3677 = vmatprep.subr.bf16.mxu1 %v11654_v24  ;;  %v11717_v24 = vld [vmem:[#allocation8 + $0x924] ss:$16 sps:$4 sm:$0xff]  }
 0x2ac   :  { %3532 = vmatpush1.bf16.msra.mxu0 %v11649_v61  ;;  %v11715_v61 = vld [vmem:[#allocation8 + $0x920] ss:$16 sps:$4 sm:$0xff]  }
 0x2ad   :  { %3678 = vmatpush1.bf16.msra.mxu1 %v11652_v60  ;;  %3533 = vmatprep.subr.bf16.mxu0 %v11657_v41  ;;  %v11723_v60 = vld [vmem:[#allocation8 + $0x944] ss:$16 sps:$4 sm:$0xff]   ;;  %v11726_v41 = vld [vmem:[#allocation8 + $0x94c] ss:$16 sps:$4 sm:$0xff]  }
 0x2ae   :  { %3679 = vmatprep.subr.bf16.mxu1 %v11660_v7  ;;  %v11729_v7 = vld [vmem:[#allocation8 + $0x964] ss:$16 sps:$4 sm:$0xff]  }
 0x2b0   :  { %3534 = vmatpush1.bf16.msra.mxu0 %v11655_v49  ;;  %v11732_v49 = vld [vmem:[#allocation8 + $0x96c] ss:$16 sps:$4 sm:$0xff]  }
 0x2b1   :  { %3680 = vmatpush1.bf16.msra.mxu1 %v11658_v48  ;;  %4507 = vmatprep.subr.bf16.mxu0 %v11663_v8  ;;  %v11727_v48 = vld [vmem:[#allocation8 + $0x960] ss:$16 sps:$4 sm:$0xff]   ;;  %v11730_v8 = vld [vmem:[#allocation8 + $0x968] ss:$16 sps:$4 sm:$0xff]  }
 0x2b2   :  { %4653 = vmatprep.subr.bf16.mxu1 %v11666_v20  ;;  %v11735_v20 = vld [vmem:[#allocation8 + $0x984] ss:$16 sps:$4 sm:$0xff]  }
 0x2b3   :  { %3536 = vmatmul.mubr.bf16.vlgmr.msra.gmra.mrb[32].mxu0 %v1571_v21 }
 0x2b4   :  { %3682 = vmatmul.mubr.bf16.vlgmr.msra.gmra.mrb[32].mxu1 %v1571_v21  ;;  %3545 = vmatprep.mubr.bf16.mxu0 %v13658_v4  ;;  %v11738_v21 = vld [vmem:[#allocation8 + $0x98c] ss:$16 sps:$4 sm:$0xff]  }
 0x2b5   :  { %3691 = vmatprep.mubr.bf16.mxu1 %v13658_v4  ;;  %4508 = vmatpush1.bf16.msra.mxu0 %v11661_v18  ;;  %v11679_v4 = vld [vmem:[#allocation8 + $0x860] ss:$16 sps:$4 sm:$0xff]  }
 0x2b6   :  { %4654 = vmatpush1.bf16.msra.mxu1 %v11664_v44  ;;  %4509 = vmatprep.subr.bf16.mxu0 %v11669_v0  ;;  %v11733_v18 = vld [vmem:[#allocation8 + $0x980] ss:$16 sps:$4 sm:$0xff]   ;;  %v11736_v44 = vld [vmem:[#allocation8 + $0x988] ss:$16 sps:$4 sm:$0xff]   ;;  %v11741_v0 = vld [vmem:[#allocation8 + $0x9a4] ss:$16 sps:$4 sm:$0xff]  }
 0x2b7   :  { %4655 = vmatprep.subr.bf16.mxu1 %v11672_v16  ;;  %v11744_v16 = vld [vmem:[#allocation8 + $0x9ac] ss:$16 sps:$4 sm:$0xff]  }
 0x2b9   :  { %4510 = vmatpush1.bf16.msra.mxu0 %v11667_v12  ;;  %v11739_v12 = vld [vmem:[#allocation8 + $0x9a0] ss:$16 sps:$4 sm:$0xff]  }
 0x2ba   :  { %4656 = vmatpush1.bf16.msra.mxu1 %v11670_v62  ;;  %4511 = vmatprep.subr.bf16.mxu0 %v11675_v38  ;;  %v11742_v62 = vld [vmem:[#allocation8 + $0x9a8] ss:$16 sps:$4 sm:$0xff]   ;;  %v11747_v38 = vld [vmem:[#allocation8 + $0x9c4] ss:$16 sps:$4 sm:$0xff]  }
 0x2bb   :  { %3546 = vmatmul.mubr.bf16.gmra.mrb[36].mxu0 %v13661_v56  ;;  %4657 = vmatprep.subr.bf16.mxu1 %v11678_v54  ;;  %v11750_v54 = vld [vmem:[#allocation8 + $0x9cc] ss:$16 sps:$4 sm:$0xff]  }
 0x2bc   :  { %3692 = vmatmul.mubr.bf16.gmra.mrb[36].mxu1 %v13661_v56  ;;  %3555 = vmatprep.mubr.bf16.mxu0 %v13679_v23  ;;  %v11696_v56 = vld [vmem:[#allocation8 + $0x8ac] ss:$16 sps:$4 sm:$0xff]  }
 0x2bd   :  { %3701 = vmatprep.mubr.bf16.mxu1 %v13679_v23  ;;  %4512 = vmatpush1.bf16.msra.mxu0 %v11673_v13  ;;  %v11691_v23 = vld [vmem:[#allocation8 + $0x8a0] ss:$16 sps:$4 sm:$0xff]  }
 0x2be   :  { %4658 = vmatpush1.bf16.msra.mxu1 %v11676_v35  ;;  %4513 = vmatprep.subr.bf16.mxu0 %v11681_v17  ;;  %v11745_v13 = vld [vmem:[#allocation8 + $0x9c0] ss:$16 sps:$4 sm:$0xff]   ;;  %v11748_v35 = vld [vmem:[#allocation8 + $0x9c8] ss:$16 sps:$4 sm:$0xff]   ;;  %v11753_v17 = vld [vmem:[#allocation8 + $0x9e4] ss:$16 sps:$4 sm:$0xff]  }
 0x2bf   :  { %4659 = vmatprep.subr.bf16.mxu1 %v11684_v28  ;;  %v11756_v28 = vld [vmem:[#allocation8 + $0x9ec] ss:$16 sps:$4 sm:$0xff]  }
 0x2c1   :  { %4514 = vmatpush1.bf16.msra.mxu0 %v11679_v4  ;;  %v11751_v4 = vld [vmem:[#allocation8 + $0x9e0] ss:$16 sps:$4 sm:$0xff]  }
 0x2c2   :  { %4660 = vmatpush1.bf16.msra.mxu1 %v11682_v52  ;;  %4515 = vmatprep.subr.bf16.mxu0 %v11687_v6  ;;  %v11754_v52 = vld [vmem:[#allocation8 + $0x9e8] ss:$16 sps:$4 sm:$0xff]   ;;  %v11759_v6 = vld [vmem:[#allocation8 + $0xa04] ss:$16 sps:$4 sm:$0xff]  }
 0x2c3   :  { %3556 = vmatmul.mubr.bf16.gmra.mrb[40].mxu0 %v13681_v40  ;;  %4661 = vmatprep.subr.bf16.mxu1 %v11690_v58  ;;  %v11762_v58 = vld [vmem:[#allocation8 + $0xa0c] ss:$16 sps:$4 sm:$0xff]  }
 0x2c4   :  { %3702 = vmatmul.mubr.bf16.gmra.mrb[40].mxu1 %v13681_v40  ;;  %3565 = vmatprep.mubr.bf16.mxu0 %v13703_v51  ;;  %v11708_v40 = vld [vmem:[#allocation8 + $0x8ec] ss:$16 sps:$4 sm:$0xff]  }
 0x2c5   :  { %3711 = vmatprep.mubr.bf16.mxu1 %v13703_v51  ;;  %4516 = vmatpush1.bf16.msra.mxu0 %v11685_v37  ;;  %v11703_v51 = vld [vmem:[#allocation8 + $0x8e0] ss:$16 sps:$4 sm:$0xff]  }
 0x2c6   :  { %4662 = vmatpush1.bf16.msra.mxu1 %v11688_v2  ;;  %4517 = vmatprep.subr.bf16.mxu0 %v11693_v19  ;;  %v11757_v37 = vld [vmem:[#allocation8 + $0xa00] ss:$16 sps:$4 sm:$0xff]   ;;  %v11760_v2 = vld [vmem:[#allocation8 + $0xa08] ss:$16 sps:$4 sm:$0xff]   ;;  %v11765_v19 = vld [vmem:[#allocation8 + $0xa24] ss:$16 sps:$4 sm:$0xff]  }
 0x2c7   :  { %4663 = vmatprep.subr.bf16.mxu1 %v11696_v56  ;;  %v14659_v56 = vld [vmem:[#allocation27_spill] sm:$0xff] }
 0x2c9   :  { %4518 = vmatpush1.bf16.msra.mxu0 %v11691_v23  ;;  %v11768_v23 = vld [vmem:[#allocation8 + $0xa2c] ss:$16 sps:$4 sm:$0xff]  }
 0x2ca   :  { %4664 = vmatpush1.bf16.msra.mxu1 %v11694_v55  ;;  %4519 = vmatprep.subr.bf16.mxu0 %v11699_v36  ;;  %v11763_v55 = vld [vmem:[#allocation8 + $0xa20] ss:$16 sps:$4 sm:$0xff]   ;;  %v11766_v36 = vld [vmem:[#allocation8 + $0xa28] ss:$16 sps:$4 sm:$0xff]  }
 0x2cb   :  { %3566 = vmatmul.mubr.bf16.gmra.mrb[44].mxu0 %v13705_v11  ;;  %4665 = vmatprep.subr.bf16.mxu1 %v11702_v22  ;;  %v11771_v22 = vld [vmem:[#allocation8 + $0xa44] ss:$16 sps:$4 sm:$0xff]  }
 0x2cc   :  { %3712 = vmatmul.mubr.bf16.gmra.mrb[44].mxu1 %v13705_v11  ;;  %4539 = vmatprep.mubr.bf16.mxu0 %v13701_v46  ;;  %v11720_v11 = vld [vmem:[#allocation8 + $0x92c] ss:$16 sps:$4 sm:$0xff]  }
 0x2cd   :  { %4520 = vmatpush1.bf16.msra.mxu0 %v11697_v26  ;;  %4685 = vmatprep.mubr.bf16.mxu1 %v13701_v46  ;;  %v11718_v46 = vld [vmem:[#allocation8 + $0x928] ss:$16 sps:$4 sm:$0xff]   ;;  %v11774_v26 = vld [vmem:[#allocation8 + $0xa4c] ss:$16 sps:$4 sm:$0xff]  }
 0x2ce   :  { %4666 = vmatpush1.bf16.msra.mxu1 %v11700_v5  ;;  %4521 = vmatprep.subr.bf16.mxu0 %v11705_v10  ;;  %v11769_v5 = vld [vmem:[#allocation8 + $0xa40] ss:$16 sps:$4 sm:$0xff]   ;;  %v11772_v10 = vld [vmem:[#allocation8 + $0xa48] ss:$16 sps:$4 sm:$0xff]  }
 0x2cf   :  { %4667 = vmatprep.subr.bf16.mxu1 %v11708_v40  ;;  %v11777_v40 = vld [vmem:[#allocation8 + $0xa64] ss:$16 sps:$4 sm:$0xff]  }
 0x2d1   :  { %4522 = vmatpush1.bf16.msra.mxu0 %v11703_v51  ;;  %v11780_v51 = vld [vmem:[#allocation8 + $0xa6c] ss:$16 sps:$4 sm:$0xff]  }
 0x2d2   :  { %4668 = vmatpush1.bf16.msra.mxu1 %v11706_v29  ;;  %4523 = vmatprep.subr.bf16.mxu0 %v11711_v47  ;;  %v11778_v29 = vld [vmem:[#allocation8 + $0xa68] ss:$16 sps:$4 sm:$0xff]   ;;  %v11783_v47 = vld [vmem:[#allocation8 + $0xa84] ss:$16 sps:$4 sm:$0xff]  }
 0x2d3   :  { %4669 = vmatprep.subr.bf16.mxu1 %v11714_v31  ;;  %v11786_v31 = vld [vmem:[#allocation8 + $0xa8c] ss:$16 sps:$4 sm:$0xff]  }
 0x2d5   :  { %4524 = vmatpush1.bf16.msra.mxu0 %v11709_v43  ;;  %v11781_v43 = vld [vmem:[#allocation8 + $0xa80] ss:$16 sps:$4 sm:$0xff]  }
 0x2d6   :  { %4670 = vmatpush1.bf16.msra.mxu1 %v11712_v14  ;;  %4525 = vmatprep.subr.bf16.mxu0 %v11717_v24  ;;  %v11784_v14 = vld [vmem:[#allocation8 + $0xa88] ss:$16 sps:$4 sm:$0xff]   ;;  %v11789_v24 = vld [vmem:[#allocation8 + $0xaa4] ss:$16 sps:$4 sm:$0xff]  }
 0x2d7   :  { %4671 = vmatprep.subr.bf16.mxu1 %v11720_v11  ;;  %v11790_v11 = vld [vmem:[#allocation8 + $0xaa8] ss:$16 sps:$4 sm:$0xff]  }
 0x2d9   :  { %4526 = vmatpush1.bf16.msra.mxu0 %v11715_v61  ;;  %v11795_v61 = vld [vmem:[#allocation8 + $0xac4] ss:$16 sps:$4 sm:$0xff]  }
 0x2da   :  { %4672 = vmatpush1.bf16.msra.mxu1 %v11718_v46  ;;  %4527 = vmatprep.subr.bf16.mxu0 %v11723_v60  ;;  %v11798_v46 = vld [vmem:[#allocation8 + $0xacc] ss:$16 sps:$4 sm:$0xff]   ;;  %v11793_v60 = vld [vmem:[#allocation8 + $0xac0] ss:$16 sps:$4 sm:$0xff]  }
 0x2db   :  { %4673 = vmatprep.subr.bf16.mxu1 %v11726_v41  ;;  %v11796_v41 = vld [vmem:[#allocation8 + $0xac8] ss:$16 sps:$4 sm:$0xff]  }
 0x2dd   :  { %4528 = vmatpush1.bf16.msra.mxu0 %v11721_v45  ;;  %v11801_v45 = vld [vmem:[#allocation8 + $0xae4] ss:$16 sps:$4 sm:$0xff]  }
 0x2de   :  { %4674 = vmatpush1.bf16.msra.mxu1 %v11724_v9  ;;  %4529 = vmatprep.subr.bf16.mxu0 %v11729_v7  ;;  %v11802_v9 = vld [vmem:[#allocation8 + $0xae8] ss:$16 sps:$4 sm:$0xff]   ;;  %v11807_v7 = vld [vmem:[#allocation8 + $0xb04] ss:$16 sps:$4 sm:$0xff]  }
 0x2df   :  { %4675 = vmatprep.subr.bf16.mxu1 %v11732_v49  ;;  %v11810_v49 = vld [vmem:[#allocation8 + $0xb0c] ss:$16 sps:$4 sm:$0xff]  }
 0x2e1   :  { %4530 = vmatpush1.bf16.msra.mxu0 %v11727_v48  ;;  %v11805_v48 = vld [vmem:[#allocation8 + $0xb00] ss:$16 sps:$4 sm:$0xff]  }
 0x2e2   :  { %4676 = vmatpush1.bf16.msra.mxu1 %v11730_v8  ;;  %4531 = vmatprep.subr.bf16.mxu0 %v11735_v20  ;;  %v11808_v8 = vld [vmem:[#allocation8 + $0xb08] ss:$16 sps:$4 sm:$0xff]   ;;  %v11813_v20 = vld [vmem:[#allocation8 + $0xb24] ss:$16 sps:$4 sm:$0xff]  }
 0x2e3   :  { %4677 = vmatprep.subr.bf16.mxu1 %v11738_v21  ;;  %v11811_v21 = vld [vmem:[#allocation8 + $0xb20] ss:$16 sps:$4 sm:$0xff]  }
 0x2e5   :  { %4532 = vmatpush1.bf16.msra.mxu0 %v11733_v18  ;;  %v11819_v18 = vld [vmem:[#allocation8 + $0xb44] ss:$16 sps:$4 sm:$0xff]  }
 0x2e6   :  { %4678 = vmatpush1.bf16.msra.mxu1 %v11736_v44  ;;  %4533 = vmatprep.subr.bf16.mxu0 %v11741_v0  ;;  %v11822_v44 = vld [vmem:[#allocation8 + $0xb4c] ss:$16 sps:$4 sm:$0xff]   ;;  %v11817_v0 = vld [vmem:[#allocation8 + $0xb40] ss:$16 sps:$4 sm:$0xff]  }
 0x2e7   :  { %4679 = vmatprep.subr.bf16.mxu1 %v11744_v16  ;;  %v11820_v16 = vld [vmem:[#allocation8 + $0xb48] ss:$16 sps:$4 sm:$0xff]  }
 0x2e9   :  { %4534 = vmatpush1.bf16.msra.mxu0 %v11739_v12  ;;  %v11825_v12 = vld [vmem:[#allocation8 + $0xb64] ss:$16 sps:$4 sm:$0xff]  }
 0x2ea   :  { %4680 = vmatpush1.bf16.msra.mxu1 %v11742_v62  ;;  %4535 = vmatprep.subr.bf16.mxu0 %v11747_v38  ;;  %v11828_v62 = vld [vmem:[#allocation8 + $0xb6c] ss:$16 sps:$4 sm:$0xff]   ;;  %v11823_v38 = vld [vmem:[#allocation8 + $0xb60] ss:$16 sps:$4 sm:$0xff]  }
 0x2eb   :  { %4681 = vmatprep.subr.bf16.mxu1 %v11750_v54  ;;  %v11826_v54 = vld [vmem:[#allocation8 + $0xb68] ss:$16 sps:$4 sm:$0xff]  }
 0x2ed   :  { %4536 = vmatpush1.bf16.msra.mxu0 %v11745_v13  ;;  %v11831_v13 = vld [vmem:[#allocation8 + $0xb84] ss:$16 sps:$4 sm:$0xff]  }
 0x2ee   :  { %4682 = vmatpush1.bf16.msra.mxu1 %v11748_v35  ;;  %4537 = vmatprep.subr.bf16.mxu0 %v11753_v17  ;;  %v11834_v35 = vld [vmem:[#allocation8 + $0xb8c] ss:$16 sps:$4 sm:$0xff]   ;;  %v11829_v17 = vld [vmem:[#allocation8 + $0xb80] ss:$16 sps:$4 sm:$0xff]  }
 0x2ef   :  { %4683 = vmatprep.subr.bf16.mxu1 %v11756_v28  ;;  %v11832_v28 = vld [vmem:[#allocation8 + $0xb88] ss:$16 sps:$4 sm:$0xff]  }
 0x2f1   :  { %4538 = vmatpush1.bf16.msra.mxu0 %v11751_v4  ;;  %v11837_v4 = vld [vmem:[#allocation8 + $0xba4] ss:$16 sps:$4 sm:$0xff]  }
 0x2f2   :  { %4684 = vmatpush1.bf16.msra.mxu1 %v11754_v52  ;;  %4580 = vmatprep.subr.bf16.mxu0 %v11759_v6  ;;  %v11840_v52 = vld [vmem:[#allocation8 + $0xbac] ss:$16 sps:$4 sm:$0xff]   ;;  %v11835_v6 = vld [vmem:[#allocation8 + $0xba0] ss:$16 sps:$4 sm:$0xff]  }
 0x2f3   :  { %4726 = vmatprep.subr.bf16.mxu1 %v11762_v58  ;;  %v11838_v58 = vld [vmem:[#allocation8 + $0xba8] ss:$16 sps:$4 sm:$0xff]  }
 0x2f4   :  { %4540 = vmatmul.mubr.bf16.vlgmr.msra.gmra.mrb[32].mxu0 %v14659_v56 }
 0x2f5   :  { %4686 = vmatmul.mubr.bf16.vlgmr.msra.gmra.mrb[32].mxu1 %v14659_v56  ;;  %4549 = vmatprep.mubr.bf16.mxu0 %v13708_v15  ;;  %v11844_v56 = vld [vmem:[#allocation8 + $0xbc8] ss:$16 sps:$4 sm:$0xff]  }
 0x2f6   :  { %4581 = vmatpush1.bf16.msra.mxu0 %v11757_v37  ;;  %4695 = vmatprep.mubr.bf16.mxu1 %v13708_v15  ;;  %v11775_v15 = vld [vmem:[#allocation8 + $0xa60] ss:$16 sps:$4 sm:$0xff]   ;;  %v11843_v37 = vld [vmem:[#allocation8 + $0xbc4] ss:$16 sps:$4 sm:$0xff]  }
 0x2f7   :  { %4727 = vmatpush1.bf16.msra.mxu1 %v11760_v2  ;;  %4582 = vmatprep.subr.bf16.mxu0 %v11765_v19  ;;  %v11846_v2 = vld [vmem:[#allocation8 + $0xbcc] ss:$16 sps:$4 sm:$0xff]   ;;  %v11841_v19 = vld [vmem:[#allocation8 + $0xbc0] ss:$16 sps:$4 sm:$0xff]  }
 0x2f8   :  { %4728 = vmatprep.subr.bf16.mxu1 %v11768_v23  ;;  %v11849_v23 = vld [vmem:[#allocation8 + $0xbe4] ss:$16 sps:$4 sm:$0xff]  }
 0x2fa   :  { %4583 = vmatpush1.bf16.msra.mxu0 %v11763_v55  ;;  %v11852_v55 = vld [vmem:[#allocation8 + $0xbec] ss:$16 sps:$4 sm:$0xff]  }
 0x2fb   :  { %4729 = vmatpush1.bf16.msra.mxu1 %v11766_v36  ;;  %4584 = vmatprep.subr.bf16.mxu0 %v11771_v22  ;;  %v11847_v36 = vld [vmem:[#allocation8 + $0xbe0] ss:$16 sps:$4 sm:$0xff]   ;;  %v11850_v22 = vld [vmem:[#allocation8 + $0xbe8] ss:$16 sps:$4 sm:$0xff]  }
 0x2fc   :  { %4550 = vmatmul.mubr.bf16.gmra.mrb[36].mxu0 %v13710_v57  ;;  %4730 = vmatprep.subr.bf16.mxu1 %v11774_v26  ;;  %v11855_v26 = vld [vmem:[#allocation11 + $0x404] ss:$16 sps:$4 sm:$0xff]  }
 0x2fd   :  { %4696 = vmatmul.mubr.bf16.gmra.mrb[36].mxu1 %v13710_v57  ;;  %4559 = vmatprep.mubr.bf16.mxu0 %v13712_v50  ;;  %v11792_v57 = vld [vmem:[#allocation8 + $0xaac] ss:$16 sps:$4 sm:$0xff]  }
 0x2fe   :  { %4585 = vmatpush1.bf16.msra.mxu0 %v11769_v5  ;;  %4705 = vmatprep.mubr.bf16.mxu1 %v13712_v50  ;;  %v11787_v50 = vld [vmem:[#allocation8 + $0xaa0] ss:$16 sps:$4 sm:$0xff]  }
 0x2ff   :  { %4731 = vmatpush1.bf16.msra.mxu1 %v11772_v10  ;;  %4586 = vmatprep.subr.bf16.mxu0 %v11777_v40  ;;  %v11858_v5 = vld [vmem:[#allocation11 + $0x40c] ss:$16 sps:$4 sm:$0xff]   ;;  %v3724_v10 = vpack.c.bf16 %v13651_v63, %v13785_v32  ;;  %v11853_v40 = vld [vmem:[#allocation11 + $0x400] ss:$16 sps:$4 sm:$0xff]  }
 0x300   :  { %4732 = vmatprep.subr.bf16.mxu1 %v11780_v51  ;;  %v11856_v51 = vld [vmem:[#allocation11 + $0x408] ss:$16 sps:$4 sm:$0xff]   ;;  %v11870_v63 = vld [vmem:[#allocation11 + $0x44c] ss:$16 sps:$4 sm:$0xff]   ;;  %v11865_v32 = vld [vmem:[#allocation11 + $0x440] ss:$16 sps:$4 sm:$0xff]  }
 0x302   :  { %4587 = vmatpush1.bf16.msra.mxu0 %v11775_v15  ;;  %v11861_v15 = vld [vmem:[#allocation11 + $0x424] ss:$16 sps:$4 sm:$0xff]  }
 0x303   :  { %4733 = vmatpush1.bf16.msra.mxu1 %v11778_v29  ;;  %4588 = vmatprep.subr.bf16.mxu0 %v11783_v47  ;;  %v11864_v29 = vld [vmem:[#allocation11 + $0x42c] ss:$16 sps:$4 sm:$0xff]   ;;  %v11859_v47 = vld [vmem:[#allocation11 + $0x420] ss:$16 sps:$4 sm:$0xff]  }
 0x304   :  { %4560 = vmatmul.mubr.bf16.gmra.mrb[40].mxu0 %v13714_v34  ;;  %4734 = vmatprep.subr.bf16.mxu1 %v11786_v31  ;;  %v11862_v31 = vld [vmem:[#allocation11 + $0x428] ss:$16 sps:$4 sm:$0xff]  }
 0x305   :  { %4706 = vmatmul.mubr.bf16.gmra.mrb[40].mxu1 %v13714_v34  ;;  %4569 = vmatprep.mubr.bf16.mxu0 %v13720_v30  ;;  %v11804_v34 = vld [vmem:[#allocation8 + $0xaec] ss:$16 sps:$4 sm:$0xff]  }
 0x306   :  { %4589 = vmatpush1.bf16.msra.mxu0 %v11781_v43  ;;  %4715 = vmatprep.mubr.bf16.mxu1 %v13720_v30  ;;  %v11799_v30 = vld [vmem:[#allocation8 + $0xae0] ss:$16 sps:$4 sm:$0xff]   ;;  %v11867_v43 = vld [vmem:[#allocation11 + $0x444] ss:$16 sps:$4 sm:$0xff]  }
 0x307   :  { %4735 = vmatpush1.bf16.msra.mxu1 %v11784_v14  ;;  %4590 = vmatprep.subr.bf16.mxu0 %v11789_v24  ;;  %v11868_v14 = vld [vmem:[#allocation11 + $0x448] ss:$16 sps:$4 sm:$0xff]   ;;  %v11873_v24 = vld [vmem:[#allocation11 + $0x464] ss:$16 sps:$4 sm:$0xff]  }
 0x308   :  { %4736 = vmatprep.subr.bf16.mxu1 %v11792_v57  ;;  %v11876_v57 = vld [vmem:[#allocation11 + $0x46c] ss:$16 sps:$4 sm:$0xff]  }
 0x30a   :  { %4591 = vmatpush1.bf16.msra.mxu0 %v11787_v50  ;;  %v11874_v50 = vld [vmem:[#allocation11 + $0x468] ss:$16 sps:$4 sm:$0xff]  }
 0x30b   :  { %4737 = vmatpush1.bf16.msra.mxu1 %v11790_v11  ;;  %4592 = vmatprep.subr.bf16.mxu0 %v11795_v61  ;;  %v11879_v11 = vld [vmem:[#allocation11 + $0x484] ss:$16 sps:$4 sm:$0xff]   ;;  %v11882_v61 = vld [vmem:[#allocation11 + $0x48c] ss:$16 sps:$4 sm:$0xff]  }
 0x30c   :  { %4570 = vmatmul.mubr.bf16.gmra.mrb[44].mxu0 %v13729_v53  ;;  %4738 = vmatprep.subr.bf16.mxu1 %v11798_v46  ;;  %v11877_v46 = vld [vmem:[#allocation11 + $0x480] ss:$16 sps:$4 sm:$0xff]  }
 0x30d   :  { %4716 = vmatmul.mubr.bf16.gmra.mrb[44].mxu1 %v13729_v53  ;;  %4612 = vmatprep.mubr.bf16.mxu0 %v13727_v27  ;;  %v11816_v53 = vld [vmem:[#allocation8 + $0xb2c] ss:$16 sps:$4 sm:$0xff]  }
 0x30e   :  { %4593 = vmatpush1.bf16.msra.mxu0 %v11793_v60  ;;  %4758 = vmatprep.mubr.bf16.mxu1 %v13727_v27  ;;  %v11814_v27 = vld [vmem:[#allocation8 + $0xb28] ss:$16 sps:$4 sm:$0xff]   ;;  %v11880_v60 = vld [vmem:[#allocation11 + $0x488] ss:$16 sps:$4 sm:$0xff]  }
 0x30f   :  { %4739 = vmatpush1.bf16.msra.mxu1 %v11796_v41  ;;  %4594 = vmatprep.subr.bf16.mxu0 %v11801_v45  ;;  %v11885_v41 = vld [vmem:[#allocation11 + $0x4a4] ss:$16 sps:$4 sm:$0xff]   ;;  %v11886_v45 = vld [vmem:[#allocation11 + $0x4a8] ss:$16 sps:$4 sm:$0xff]  }
 0x310   :  { %4740 = vmatprep.subr.bf16.mxu1 %v11804_v34  ;;  %v11891_v34 = vld [vmem:[#allocation11 + $0x4c4] ss:$16 sps:$4 sm:$0xff]  }
 0x312   :  { %4595 = vmatpush1.bf16.msra.mxu0 %v11799_v30  ;;  %v11894_v30 = vld [vmem:[#allocation11 + $0x4cc] ss:$16 sps:$4 sm:$0xff]  }
 0x313   :  { %4741 = vmatpush1.bf16.msra.mxu1 %v11802_v9  ;;  %4596 = vmatprep.subr.bf16.mxu0 %v11807_v7  ;;  %v11889_v9 = vld [vmem:[#allocation11 + $0x4c0] ss:$16 sps:$4 sm:$0xff]   ;;  %v11892_v7 = vld [vmem:[#allocation11 + $0x4c8] ss:$16 sps:$4 sm:$0xff]  }
 0x314   :  { %4742 = vmatprep.subr.bf16.mxu1 %v11810_v49  ;;  %v11897_v49 = vld [vmem:[#allocation11 + $0x4e4] ss:$16 sps:$4 sm:$0xff]  }
 0x316   :  { %4597 = vmatpush1.bf16.msra.mxu0 %v11805_v48  ;;  %v11898_v48 = vld [vmem:[#allocation11 + $0x4e8] ss:$16 sps:$4 sm:$0xff]  }
 0x317   :  { %4743 = vmatpush1.bf16.msra.mxu1 %v11808_v8  ;;  %4598 = vmatprep.subr.bf16.mxu0 %v11813_v20  ;;  %v11903_v8 = vld [vmem:[#allocation11 + $0x504] ss:$16 sps:$4 sm:$0xff]   ;;  %v11906_v20 = vld [vmem:[#allocation11 + $0x50c] ss:$16 sps:$4 sm:$0xff]  }
 0x318   :  { %4744 = vmatprep.subr.bf16.mxu1 %v11816_v53  ;;  %v11901_v53 = vld [vmem:[#allocation11 + $0x500] ss:$16 sps:$4 sm:$0xff]  }
 0x31a   :  { %4599 = vmatpush1.bf16.msra.mxu0 %v11811_v21  ;;  %v11904_v21 = vld [vmem:[#allocation11 + $0x508] ss:$16 sps:$4 sm:$0xff]  }
 0x31b   :  { %4745 = vmatpush1.bf16.msra.mxu1 %v11814_v27  ;;  %4600 = vmatprep.subr.bf16.mxu0 %v11819_v18  ;;  %v11909_v27 = vld [vmem:[#allocation11 + $0x524] ss:$16 sps:$4 sm:$0xff]   ;;  %v11912_v18 = vld [vmem:[#allocation11 + $0x52c] ss:$16 sps:$4 sm:$0xff]  }
 0x31c   :  { %4746 = vmatprep.subr.bf16.mxu1 %v11822_v44  ;;  %v11907_v44 = vld [vmem:[#allocation11 + $0x520] ss:$16 sps:$4 sm:$0xff]  }
 0x31e   :  { %4601 = vmatpush1.bf16.msra.mxu0 %v11817_v0  ;;  %v11915_v0 = vld [vmem:[#allocation11 + $0x544] ss:$16 sps:$4 sm:$0xff]  }
 0x31f   :  { %4747 = vmatpush1.bf16.msra.mxu1 %v11820_v16  ;;  %4602 = vmatprep.subr.bf16.mxu0 %v11825_v12  ;;  %v11918_v16 = vld [vmem:[#allocation11 + $0x54c] ss:$16 sps:$4 sm:$0xff]   ;;  %v11913_v12 = vld [vmem:[#allocation11 + $0x540] ss:$16 sps:$4 sm:$0xff]  }
 0x320   :  { %4748 = vmatprep.subr.bf16.mxu1 %v11828_v62  ;;  %v11916_v62 = vld [vmem:[#allocation11 + $0x548] ss:$16 sps:$4 sm:$0xff]  }
 0x322   :  { %4603 = vmatpush1.bf16.msra.mxu0 %v11823_v38  ;;  %v11921_v38 = vld [vmem:[#allocation11 + $0x564] ss:$16 sps:$4 sm:$0xff]  }
 0x323   :  { %4749 = vmatpush1.bf16.msra.mxu1 %v11826_v54  ;;  %4604 = vmatprep.subr.bf16.mxu0 %v11831_v13  ;;  %v11924_v54 = vld [vmem:[#allocation11 + $0x56c] ss:$16 sps:$4 sm:$0xff]   ;;  %v11919_v13 = vld [vmem:[#allocation11 + $0x560] ss:$16 sps:$4 sm:$0xff]  }
 0x324   :  { %4750 = vmatprep.subr.bf16.mxu1 %v11834_v35  ;;  %v11922_v35 = vld [vmem:[#allocation11 + $0x568] ss:$16 sps:$4 sm:$0xff]  }
 0x326   :  { %4605 = vmatpush1.bf16.msra.mxu0 %v11829_v17  ;;  %v11925_v17 = vld [vmem:[#allocation11 + $0x580] ss:$16 sps:$4 sm:$0xff]  }
 0x327   :  { %4751 = vmatpush1.bf16.msra.mxu1 %v11832_v28  ;;  %4606 = vmatprep.subr.bf16.mxu0 %v11837_v4  ;;  %v11927_v28 = vld [vmem:[#allocation11 + $0x584] ss:$16 sps:$4 sm:$0xff]   ;;  %v11928_v4 = vld [vmem:[#allocation11 + $0x588] ss:$16 sps:$4 sm:$0xff]  }
 0x328   :  { %4752 = vmatprep.subr.bf16.mxu1 %v11840_v52  ;;  %v11930_v52 = vld [vmem:[#allocation11 + $0x58c] ss:$16 sps:$4 sm:$0xff]  }
 0x32a   :  { %4607 = vmatpush1.bf16.msra.mxu0 %v11835_v6  ;;  %v11931_v6 = vld [vmem:[#allocation11 + $0x5a0] ss:$16 sps:$4 sm:$0xff]  }
 0x32b   :  { %4753 = vmatpush1.bf16.msra.mxu1 %v11838_v58  ;;  %4608 = vmatprep.subr.bf16.mxu0 %v11843_v37  ;;  %v11933_v58 = vld [vmem:[#allocation11 + $0x5a4] ss:$16 sps:$4 sm:$0xff]   ;;  %v11934_v37 = vld [vmem:[#allocation11 + $0x5a8] ss:$16 sps:$4 sm:$0xff]  }
 0x32c   :  { %4754 = vmatprep.subr.bf16.mxu1 %v11846_v2  ;;  %v11936_v2 = vld [vmem:[#allocation11 + $0x5ac] ss:$16 sps:$4 sm:$0xff]  }
 0x32e   :  { %4609 = vmatpush1.bf16.msra.mxu0 %v11841_v19  ;;  %v11937_v19 = vld [vmem:[#allocation11 + $0x5c0] ss:$16 sps:$4 sm:$0xff]  }
 0x32f   :  { %4755 = vmatpush1.bf16.msra.mxu1 %v11844_v56  ;;  %4610 = vmatprep.subr.bf16.mxu0 %v11849_v23  ;;  %v11939_v56 = vld [vmem:[#allocation11 + $0x5c4] ss:$16 sps:$4 sm:$0xff]   ;;  %v11940_v23 = vld [vmem:[#allocation11 + $0x5c8] ss:$16 sps:$4 sm:$0xff]  }
 0x330   :  { %4756 = vmatprep.subr.bf16.mxu1 %v11852_v55  ;;  %v11942_v55 = vld [vmem:[#allocation11 + $0x5cc] ss:$16 sps:$4 sm:$0xff]  }
 0x332   :  { %4611 = vmatpush1.bf16.msra.mxu0 %v11847_v36  ;;  %v11945_v36 = vld [vmem:[#allocation11 + $0x5e4] ss:$16 sps:$4 sm:$0xff]  }
 0x333   :  { %4757 = vmatpush1.bf16.msra.mxu1 %v11850_v22  ;;  %5963 = vmatprep.subr.bf16.mxu0 %v11855_v26  ;;  %v11943_v22 = vld [vmem:[#allocation11 + $0x5e0] ss:$16 sps:$4 sm:$0xff]   ;;  %v11948_v26 = vld [vmem:[#allocation11 + $0x5ec] ss:$16 sps:$4 sm:$0xff]  }
 0x334   :  { %6069 = vmatprep.subr.bf16.mxu1 %v11858_v5  ;;  %v11946_v5 = vld [vmem:[#allocation11 + $0x5e8] ss:$16 sps:$4 sm:$0xff]  }
 0x335   :  { %4613 = vmatmul.mubr.bf16.vlgmr.msra.gmra.mrb[32].mxu0 %v3724_v10 }
 0x336   :  { %4759 = vmatmul.mubr.bf16.vlgmr.msra.gmra.mrb[32].mxu1 %v3724_v10  ;;  %4622 = vmatprep.mubr.bf16.mxu0 %v13731_v42  ;;  %v11951_v10 = vld [vmem:[#allocation11 + $0x604] ss:$16 sps:$4 sm:$0xff]  }
 0x337   :  { %4768 = vmatprep.mubr.bf16.mxu1 %v13731_v42  ;;  %5964 = vmatpush1.bf16.msra.mxu0 %v11853_v40  ;;  %v11871_v42 = vld [vmem:[#allocation11 + $0x460] ss:$16 sps:$4 sm:$0xff]   ;;  %v11954_v40 = vld [vmem:[#allocation11 + $0x60c] ss:$16 sps:$4 sm:$0xff]  }
 0x338   :  { %6070 = vmatpush1.bf16.msra.mxu1 %v11856_v51  ;;  %5965 = vmatprep.subr.bf16.mxu0 %v11861_v15  ;;  %v4831_v51 = vld [vmem:[#allocation9] sm:$0xf]  ;;  %v14660_v15 = vld [vmem:[#allocation19_spill] sm:$0xff] }
 0x339   :  { %6071 = vmatprep.subr.bf16.mxu1 %v11864_v29  ;;  %v13834_v29 = vrot.slane %v4831_v51, %v14660_v15 }
 0x33b   :  { %5966 = vmatpush1.bf16.msra.mxu0 %v11859_v47  ;;  %v14661_v47 = vld [vmem:[#allocation20_spill] sm:$0xff] }
 0x33c   :  { %6072 = vmatpush1.bf16.msra.mxu1 %v11862_v31  ;;  %5967 = vmatprep.subr.bf16.mxu0 %v11867_v43  ;;  %v13837_v31 = vrot.slane %v4831_v51, %v14661_v47 }
 0x33d   :  { %4623 = vmatmul.mubr.bf16.gmra.mrb[36].mxu0 %v13733_v59  ;;  %6073 = vmatprep.subr.bf16.mxu1 %v11870_v63 }
 0x33e   :  { %4769 = vmatmul.mubr.bf16.gmra.mrb[36].mxu1 %v13733_v59  ;;  %4632 = vmatprep.mubr.bf16.mxu0 %v13735_v39  ;;  %v11888_v59 = vld [vmem:[#allocation11 + $0x4ac] ss:$16 sps:$4 sm:$0xff]  }
 0x33f   :  { %4778 = vmatprep.mubr.bf16.mxu1 %v13735_v39  ;;  %5968 = vmatpush1.bf16.msra.mxu0 %v11865_v32  ;;  %v11883_v39 = vld [vmem:[#allocation11 + $0x4a0] ss:$16 sps:$4 sm:$0xff]  }
 0x340   :  { %6074 = vmatpush1.bf16.msra.mxu1 %v11868_v14  ;;  %5969 = vmatprep.subr.bf16.mxu0 %v11873_v24  ;;  %v14662_v24 = vld [vmem:[#allocation21_spill] sm:$0xff] }
 0x341   :  { %6075 = vmatprep.subr.bf16.mxu1 %v11876_v57  ;;  %v13841_v57 = vrot.slane %v4831_v51, %v14662_v24 }
 0x343   :  { %5970 = vmatpush1.bf16.msra.mxu0 %v11871_v42  ;;  %v14663_v42 = vld [vmem:[#allocation22_spill] sm:$0xff] }
 0x344   :  { %6076 = vmatpush1.bf16.msra.mxu1 %v11874_v50  ;;  %5971 = vmatprep.subr.bf16.mxu0 %v11879_v11  ;;  %v13844_v50 = vrot.slane %v4831_v51, %v14663_v42 }
 0x345   :  { %4633 = vmatmul.mubr.bf16.gmra.mrb[40].mxu0 %v13739_v33  ;;  %6077 = vmatprep.subr.bf16.mxu1 %v11882_v61 }
 0x346   :  { %4779 = vmatmul.mubr.bf16.gmra.mrb[40].mxu1 %v13739_v33  ;;  %4642 = vmatprep.mubr.bf16.mxu0 %v13750_v3  ;;  %v11900_v33 = vld [vmem:[#allocation11 + $0x4ec] ss:$16 sps:$4 sm:$0xff]  }
 0x347   :  { %4788 = vmatprep.mubr.bf16.mxu1 %v13750_v3  ;;  %5972 = vmatpush1.bf16.msra.mxu0 %v11877_v46  ;;  %v11895_v3 = vld [vmem:[#allocation11 + $0x4e0] ss:$16 sps:$4 sm:$0xff]  }
 0x348   :  { %6078 = vmatpush1.bf16.msra.mxu1 %v11880_v60  ;;  %5973 = vmatprep.subr.bf16.mxu0 %v11885_v41 }
 0x349   :  { %6079 = vmatprep.subr.bf16.mxu1 %v11888_v59 }
 0x34b   :  { %5974 = vmatpush1.bf16.msra.mxu0 %v11883_v39 }
 0x34c   :  { %6080 = vmatpush1.bf16.msra.mxu1 %v11886_v45  ;;  %5975 = vmatprep.subr.bf16.mxu0 %v11891_v34 }
 0x34d   :  { %4643 = vmatmul.mubr.bf16.gmra.mrb[44].mxu0 %v13752_v1  ;;  %6081 = vmatprep.subr.bf16.mxu1 %v11894_v30 }
 0x34e   :  { %4789 = vmatmul.mubr.bf16.gmra.mrb[44].mxu1 %v13752_v1  ;;  %v11910_v1 = vld [vmem:[#allocation11 + $0x528] ss:$16 sps:$4 sm:$0xff]  }
 0x34f   :  { %5976 = vmatpush1.bf16.msra.mxu0 %v11889_v9 }
 0x350   :  { %6082 = vmatpush1.bf16.msra.mxu1 %v11892_v7  ;;  %5977 = vmatprep.subr.bf16.mxu0 %v11897_v49 }
 0x351   :  { %6083 = vmatprep.subr.bf16.mxu1 %v11900_v33 }
 0x353   :  { %5978 = vmatpush1.bf16.msra.mxu0 %v11895_v3 }
 0x354   :  { %6084 = vmatpush1.bf16.msra.mxu1 %v11898_v48  ;;  %5979 = vmatprep.subr.bf16.mxu0 %v11903_v8 }
 0x355   :  { %6085 = vmatprep.subr.bf16.mxu1 %v11906_v20 }
 0x357   :  { %5980 = vmatpush1.bf16.msra.mxu0 %v11901_v53 }
 0x358   :  { %6086 = vmatpush1.bf16.msra.mxu1 %v11904_v21  ;;  %5981 = vmatprep.subr.bf16.mxu0 %v11909_v27 }
 0x359   :  { %6087 = vmatprep.subr.bf16.mxu1 %v11912_v18 }
 0x35b   :  { %5982 = vmatpush1.bf16.msra.mxu0 %v11907_v44 }
 0x35c   :  { %6088 = vmatpush1.bf16.msra.mxu1 %v11910_v1  ;;  %5983 = vmatprep.subr.bf16.mxu0 %v11915_v0 }
 0x35d   :  { %6089 = vmatprep.subr.bf16.mxu1 %v11918_v16 }
 0x35f   :  { %5984 = vmatpush1.bf16.msra.mxu0 %v11913_v12 }
 0x360   :  { %6090 = vmatpush1.bf16.msra.mxu1 %v11916_v62  ;;  %5985 = vmatprep.subr.bf16.mxu0 %v11921_v38 }
 0x361   :  { %6091 = vmatprep.subr.bf16.mxu1 %v11924_v54 }
 0x363   :  { %5986 = vmatpush1.bf16.msra.mxu0 %v11919_v13 }
 0x364   :  { %6092 = vmatpush1.bf16.msra.mxu1 %v11922_v35  ;;  %5987 = vmatprep.subr.bf16.mxu0 %v11927_v28 }
 0x365   :  { %6093 = vmatprep.subr.bf16.mxu1 %v11930_v52 }
 0x367   :  { %5988 = vmatpush1.bf16.msra.mxu0 %v11925_v17 }
 0x368   :  { %6094 = vmatpush1.bf16.msra.mxu1 %v11928_v4  ;;  %5989 = vmatprep.subr.bf16.mxu0 %v11933_v58 }
 0x369   :  { %6095 = vmatprep.subr.bf16.mxu1 %v11936_v2 }
 0x36b   :  { %5990 = vmatpush1.bf16.msra.mxu0 %v11931_v6 }
 0x36c   :  { %6096 = vmatpush1.bf16.msra.mxu1 %v11934_v37  ;;  %5991 = vmatprep.subr.bf16.mxu0 %v11939_v56 }
 0x36d   :  { %6097 = vmatprep.subr.bf16.mxu1 %v11942_v55 }
 0x36f   :  { %5992 = vmatpush1.bf16.msra.mxu0 %v11937_v19 }
 0x370   :  { %6098 = vmatpush1.bf16.msra.mxu1 %v11940_v23  ;;  %5993 = vmatprep.subr.bf16.mxu0 %v11945_v36 }
 0x371   :  { %6099 = vmatprep.subr.bf16.mxu1 %v11948_v26 }
 0x373   :  { %5994 = vmatpush1.bf16.msra.mxu0 %v11943_v22 }
 0x374   :  { %6100 = vmatpush1.bf16.msra.mxu1 %v11946_v5  ;;  %6016 = vmatprep.subr.bf16.mxu0 %v11951_v10 }
 0x375   :  { %6122 = vmatprep.subr.bf16.mxu1 %v11954_v40 }
 0x408   :  { %v4614_v43 = vpop.f32.mrb[32].mxu0 }
 0x409   :  { %v4853_v63 = vadd.f32 %v13834_v29, %v4614_v43  ;;  %v4760_v32 = vpop.f32.mrb[32].mxu1  ;;  %v4616_v14 = vpop.f32.mrb[33].mxu0 }
 0x40a   :  { %v4855_v11 = vadd.f32 %v13837_v31, %v4760_v32  ;;  %v4762_v61 = vpop.f32.mrb[33].mxu1  ;;  %v4618_v46 = vpop.f32.mrb[34].mxu0  ;;  %v4854_v45 = vadd.f32 %v13841_v57, %v4616_v14 }
 0x40b   :  { %v4857_v60 = vadd.f32 %v13834_v29, %v4618_v46  ;;  %v4764_v41 = vpop.f32.mrb[34].mxu1  ;;  %v4620_v59 = vpop.f32.mrb[35].mxu0  ;;  %v4917_v39 = vmul.f32 0.2, %v4853_v63  ;;  %v4856_v34 = vadd.f32 %v13844_v50, %v4762_v61  ;;  %vm4885_vm3 = vcmp.gt.f32.partialorder %v4853_v63, 0.0 }
 0x40c   :  { %v4766_v30 = vpop.f32.mrb[35].mxu1  ;;  %v13851_v9 = vadd.f32 %v13837_v31, %v4764_v41  ;;  %v13854_v7 = vadd.f32 %v13841_v57, %v4620_v59  ;;  %v4919_v49 = vmul.f32 0.2, %v4855_v11  ;;  %vm4887_vm6 = vcmp.gt.f32.partialorder %v4855_v11, 0.0  ;;  %v11949_v41 = vld [vmem:[#allocation11 + $0x600] ss:$16 sps:$4 sm:$0xff]  }
 0x40d   :  { %v13857_v33 = vadd.f32 %v13844_v50, %v4766_v30  ;;  %v4949_v48 = vsel %vm4885_vm3, %v4853_v63, %v4917_v39  ;;  %vm4886_vm2 = vcmp.gt.f32.partialorder %v4854_v45, 0.0  ;;  %v4918_v8 = vmul.f32 0.2, %v4854_v45  ;;  %v11952_v59 = vld [vmem:[#allocation11 + $0x608] ss:$16 sps:$4 sm:$0xff]  }
 0x40e   :  { %vm4888_vm9 = vcmp.gt.f32.partialorder %v4856_v34, 0.0  ;;  %v4920_v53 = vmul.f32 0.2, %v4856_v34  ;;  %vm4889_vm10 = vcmp.gt.f32.partialorder %v4857_v60, 0.0  ;;  %v4951_v1 = vsel %vm4887_vm6, %v4855_v11, %v4919_v49  ;;  %v11957_v49 = vld [vmem:[#allocation11 + $0x624] ss:$16 sps:$4 sm:$0xff]  }
 0x40f   :  { %v4921_v0 = vmul.f32 0.2, %v4857_v60  ;;  %v4950_v36 = vsel %vm4886_vm2, %v4854_v45, %v4918_v8  ;;  %vm4891_vm5 = vcmp.gt.f32.partialorder %v13851_v9, 0.0  ;;  %v4923_v5 = vmul.f32 0.2, %v13851_v9 }
 0x410   :  { %v4624_v3 = vpop.f32.mrb[36].mxu0  ;;  %v4952_v22 = vsel %vm4888_vm9, %v4856_v34, %v4920_v53  ;;  %vm4890_vm14 = vcmp.gt.f32.partialorder %v13854_v7, 0.0  ;;  %v4922_v10 = vmul.f32 0.2, %v13854_v7  ;;  %vm4892_vm2 = vcmp.gt.f32.partialorder %v13857_v33, 0.0 }
 0x411   :  { %v4770_v20 = vpop.f32.mrb[36].mxu1  ;;  %v4861_v21 = vadd.f32 %v13834_v29, %v4624_v3  ;;  %v4626_v18 = vpop.f32.mrb[37].mxu0  ;;  %v13878_v26 = vsel %vm4889_vm10, %v4857_v60, %v4921_v0  ;;  %v11960_v3 = vld [vmem:[#allocation11 + $0x62c] ss:$16 sps:$4 sm:$0xff]   ;;  %v13902_v8 = vsel %vm4891_vm5, %v13851_v9, %v4923_v5 }
 0x412   :  { %v4863_v27 = vadd.f32 %v13837_v31, %v4770_v20  ;;  %v4772_v44 = vpop.f32.mrb[37].mxu1  ;;  %v4862_v16 = vadd.f32 %v13841_v57, %v4626_v18  ;;  %v4628_v62 = vpop.f32.mrb[38].mxu0  ;;  %v13905_v20 = vmul.f32 0.2, %v13857_v33  ;;  %v13915_v9 = vsel %vm4890_vm14, %v13854_v7, %v4922_v10 }
 0x413   :  { %v4864_v12 = vadd.f32 %v13844_v50, %v4772_v44  ;;  %v4774_v38 = vpop.f32.mrb[38].mxu1  ;;  %vm4893_vm11 = vcmp.gt.f32.partialorder %v4861_v21, 0.0  ;;  %v4925_v54 = vmul.f32 0.2, %v4861_v21  ;;  %v4865_v52 = vadd.f32 %v13834_v29, %v4628_v62  ;;  %v4630_v58 = vpop.f32.mrb[39].mxu0 }
 0x414   :  { %vm4895_vm12 = vcmp.gt.f32.partialorder %v4863_v27, 0.0  ;;  %v4927_v13 = vmul.f32 0.2, %v4863_v27  ;;  %vm4894_vm1 = vcmp.gt.f32.partialorder %v4862_v16, 0.0  ;;  %v4926_v35 = vmul.f32 0.2, %v4862_v16 }
 0x415   :  { %vm4896_vm15 = vcmp.gt.f32.partialorder %v4864_v12, 0.0  ;;  %v4928_v17 = vmul.f32 0.2, %v4864_v12  ;;  %v4957_v28 = vsel %vm4893_vm11, %v4861_v21, %v4925_v54  ;;  %v13865_v6 = vadd.f32 %v13837_v31, %v4774_v38  ;;  %v4776_v37 = vpop.f32.mrb[39].mxu1  ;;  %v11955_v21 = vld [vmem:[#allocation11 + $0x620] ss:$16 sps:$4 sm:$0xff]  }
 0x416   :  { %v4959_v4 = vsel %vm4895_vm12, %v4863_v27, %v4927_v13  ;;  %v5186_v2 = vpack.c.bf16 %v4957_v28, %v4949_v48  ;;  %v13870_v56 = vadd.f32 %v13841_v57, %v4630_v58  ;;  %v13873_v23 = vadd.f32 %v13844_v50, %v4776_v37  ;;  %v11958_v27 = vld [vmem:[#allocation11 + $0x628] ss:$16 sps:$4 sm:$0xff]  }
 0x417   :  { %v13867_v19 = vpack.c.bf16 %v4959_v4, %v4951_v1  ;;  %vm4897_vm0 = vcmp.gt.f32.partialorder %v4865_v52, 0.0  ;;  %v4929_v55 = vmul.f32 0.2, %v4865_v52  ;;  %v4958_v43 = vsel %vm4894_vm1, %v4862_v16, %v4926_v35  ;;  %v11963_v1 = vld [vmem:[#allocation11 + $0x644] ss:$16 sps:$4 sm:$0xff]  }
 0x418   :  { %v4634_v40 = vpop.f32.mrb[40].mxu0  ;;  %v4960_v63 = vsel %vm4896_vm15, %v4864_v12, %v4928_v17  ;;  %v5187_v60 = vpack.c.bf16 %v4958_v43, %v4950_v36  ;;  %v4930_v53 = vmul.f32 0.2, %v13870_v56  ;;  %vm4898_vm13 = vcmp.gt.f32.partialorder %v13870_v56, 0.0  ;;  %v11966_v17 = vld [vmem:[#allocation11 + $0x64c] ss:$16 sps:$4 sm:$0xff]  }
 0x419   :  { %v4780_v51 = vpop.f32.mrb[40].mxu1  ;;  %v13886_v32 = vsel %vm4897_vm0, %v4865_v52, %v4929_v55  ;;  %v4869_v14 = vadd.f32 %v13834_v29, %v4634_v40  ;;  %v4636_v61 = vpop.f32.mrb[41].mxu0  ;;  %v13892_v39 = vpack.c.bf16 %v4960_v63, %v4952_v22  ;;  %v13924_v54 = vmul.f32 0.2, %v13865_v6  ;;  %v11961_v52 = vld [vmem:[#allocation11 + $0x640] ss:$16 sps:$4 sm:$0xff]  }
 0x41a   :  { %v13890_v11 = vadd.f32 %v13837_v31, %v4780_v51  ;;  %v4782_v46 = vpop.f32.mrb[41].mxu1  ;;  %v4870_v45 = vadd.f32 %v13841_v57, %v4636_v61  ;;  %v4638_v34 = vpop.f32.mrb[42].mxu0  ;;  %v13897_v48 = vpack.c.bf16 %v13886_v32, %v13878_v26  ;;  %5995 = vmatprep.mubr.bf16.mxu0 %v5187_v60  ;;  %6101 = vmatprep.mubr.bf16.mxu1 %v5187_v60  ;;  %v13931_v28 = vmul.f32 0.2, %v13873_v23  ;;  %v11964_v58 = vld [vmem:[#allocation11 + $0x648] ss:$16 sps:$4 sm:$0xff]  }
 0x41b   :  { %v4784_v30 = vpop.f32.mrb[42].mxu1  ;;  %v4933_v18 = vmul.f32 0.2, %v4869_v14  ;;  %v13910_v44 = vadd.f32 %v13844_v50, %v4782_v46  ;;  %5996 = vmatmul.mubr.bf16.vlgmr.msra.gmra.mrb[48].mxu0 %v5186_v2  ;;  %6102 = vmatmul.mubr.bf16.vlgmr.msra.gmra.mrb[48].mxu1 %v5186_v2  ;;  %vm4901_vm7 = vcmp.gt.f32.partialorder %v4869_v14, 0.0  ;;  %v13918_v16 = vadd.f32 %v13834_v29, %v4638_v34  ;;  %v4640_v62 = vpop.f32.mrb[43].mxu0 }
 0x41c   :  { %v4934_v0 = vmul.f32 0.2, %v4870_v45  ;;  %v13921_v12 = vadd.f32 %v13837_v31, %v4784_v30  ;;  %6017 = vmatpush1.bf16.msra.mxu0 %v11949_v41  ;;  %6123 = vmatpush1.bf16.msra.mxu1 %v11952_v59  ;;  %v4786_v38 = vpop.f32.mrb[43].mxu1  ;;  %vm4902_vm4 = vcmp.gt.f32.partialorder %v4870_v45, 0.0  ;;  %v4874_v13 = vadd.f32 %v13841_v57, %v4640_v62  ;;  %v11969_v55 = vld [vmem:[#allocation11 + $0x664] ss:$16 sps:$4 sm:$0xff]  }
 0x41d   :  { %v13928_v7 = vadd.f32 %v13844_v50, %v4786_v38  ;;  %6018 = vmatprep.subr.bf16.mxu0 %v11957_v49  ;;  %6124 = vmatprep.subr.bf16.mxu1 %v11960_v3  ;;  %vm4903_vm8 = vcmp.gt.f32.partialorder %v13890_v11, 0.0  ;;  %v13935_v4 = vmul.f32 0.2, %v13890_v11  ;;  %v13940_v37 = vsel %vm4898_vm13, %v13870_v56, %v4930_v53  ;;  %v11972_v46 = vld [vmem:[#allocation11 + $0x66c] ss:$16 sps:$4 sm:$0xff]  }
 0x41e   :  { %vm4904_vm3 = vcmp.gt.f32.partialorder %v13910_v44, 0.0  ;;  %v4936_v2 = vmul.f32 0.2, %v13910_v44  ;;  %vm4905_vm6 = vcmp.gt.f32.partialorder %v13918_v16, 0.0  ;;  %v4965_v36 = vsel %vm4901_vm7, %v4869_v14, %v4933_v18  ;;  %v11967_v49 = vld [vmem:[#allocation11 + $0x660] ss:$16 sps:$4 sm:$0xff]  }
 0x41f   :  { %vm4900_vm9 = vcmp.gt.f32.partialorder %v13873_v23, 0.0  ;;  %v13949_v22 = vmul.f32 0.2, %v13918_v16  ;;  %v4938_v5 = vmul.f32 0.2, %v4874_v13  ;;  %v4966_v51 = vsel %vm4902_vm4, %v4870_v45, %v4934_v0 }
 0x420   :  { %v4644_v35 = vpop.f32.mrb[44].mxu0  ;;  %6019 = vmatpush1.bf16.msra.mxu0 %v11955_v21  ;;  %6125 = vmatpush1.bf16.msra.mxu1 %v11958_v27  ;;  %vm4899_vm10 = vcmp.gt.f32.partialorder %v13865_v6, 0.0  ;;  %vm4907_vm11 = vcmp.gt.f32.partialorder %v13921_v12, 0.0  ;;  %vm4906_vm12 = vcmp.gt.f32.partialorder %v4874_v13, 0.0  ;;  %v13958_v60 = vmul.f32 0.2, %v13921_v12 }
 0x421   :  { %v4877_v56 = vadd.f32 %v13834_v29, %v4644_v35  ;;  %v4790_v10 = vpop.f32.mrb[44].mxu1  ;;  %v4646_v40 = vpop.f32.mrb[45].mxu0  ;;  %6020 = vmatprep.subr.bf16.mxu0 %v11963_v1  ;;  %6126 = vmatprep.subr.bf16.mxu1 %v11966_v17  ;;  %vm4908_vm1 = vcmp.gt.f32.partialorder %v13928_v7, 0.0  ;;  %v11970_v21 = vld [vmem:[#allocation11 + $0x668] ss:$16 sps:$4 sm:$0xff]   ;;  %v13966_v27 = vsel %vm4906_vm12, %v4874_v13, %v4938_v5 }
 0x422   :  { %v4879_v43 = vadd.f32 %v13837_v31, %v4790_v10  ;;  %v4878_v63 = vadd.f32 %v13841_v57, %v4646_v40  ;;  %v4792_v14 = vpop.f32.mrb[45].mxu1  ;;  %v4648_v61 = vpop.f32.mrb[46].mxu0  ;;  %v11975_v38 = vld [vmem:[#allocation11 + $0x684] ss:$16 sps:$4 sm:$0xff]   ;;  %v4940_v5 = vmul.f32 0.2, %v13928_v7 }
 0x423   :  { %v4941_v41 = vmul.f32 0.2, %v4877_v56  ;;  %v4880_v59 = vadd.f32 %v13844_v50, %v4792_v14  ;;  %v13962_v45 = vadd.f32 %v13834_v29, %v4648_v61  ;;  %v4794_v34 = vpop.f32.mrb[46].mxu1  ;;  %v4650_v30 = vpop.f32.mrb[47].mxu0  ;;  %vm4909_vm15 = vcmp.gt.f32.partialorder %v4877_v56, 0.0 }
 0x424   :  { %vm4910_vm0 = vcmp.gt.f32.partialorder %v4878_v63, 0.0  ;;  %v4942_v3 = vmul.f32 0.2, %v4878_v63  ;;  %vm4911_vm5 = vcmp.gt.f32.partialorder %v4879_v43, 0.0  ;;  %6021 = vmatpush1.bf16.msra.mxu0 %v11961_v52  ;;  %6127 = vmatpush1.bf16.msra.mxu1 %v11964_v58  ;;  %v4943_v18 = vmul.f32 0.2, %v4879_v43 }
 0x425   :  { %vm4912_vm14 = vcmp.gt.f32.partialorder %v4880_v59, 0.0  ;;  %v4944_v53 = vmul.f32 0.2, %v4880_v59  ;;  %v13969_v29 = vadd.f32 %v13837_v31, %v4794_v34  ;;  %v4882_v1 = vadd.f32 %v13841_v57, %v4650_v30  ;;  %v4796_v0 = vpop.f32.mrb[47].mxu1  ;;  %6022 = vmatprep.subr.bf16.mxu0 %v11969_v55  ;;  %6128 = vmatprep.subr.bf16.mxu1 %v11972_v46  ;;  %v11978_v52 = vld [vmem:[#allocation11 + $0x68c] ss:$16 sps:$4 sm:$0xff]  }
 0x426   :  { %v4974_v62 = vsel %vm4910_vm0, %v4878_v63, %v4942_v3  ;;  %v4884_v35 = vadd.f32 %v13844_v50, %v4796_v0  ;;  %v4973_v58 = vsel %vm4909_vm15, %v4877_v56, %v4941_v41  ;;  %vm4913_vm13 = vcmp.gt.f32.partialorder %v13962_v45, 0.0  ;;  %v11973_v31 = vld [vmem:[#allocation11 + $0x680] ss:$16 sps:$4 sm:$0xff]   ;;  %v11976_v56 = vld [vmem:[#allocation11 + $0x688] ss:$16 sps:$4 sm:$0xff]  }
 0x427   :  { %v5191_v17 = vpack.c.bf16 %v4974_v62, %v4966_v51  ;;  %v4976_v13 = vsel %vm4912_vm14, %v4880_v59, %v4944_v53  ;;  %v4968_v57 = vsel %vm4904_vm3, %v13910_v44, %v4936_v2  ;;  %v4967_v50 = vsel %vm4903_vm8, %v13890_v11, %v13935_v4  ;;  %v11981_v44 = vld [vmem:[#allocation11 + $0x6a4] ss:$16 sps:$4 sm:$0xff]   ;;  %v11984_v63 = vld [vmem:[#allocation11 + $0x6ac] ss:$16 sps:$4 sm:$0xff]   ;;  %v11982_v41 = vld [vmem:[#allocation11 + $0x6a8] ss:$16 sps:$4 sm:$0xff]  }
 0x428   :  { %v4945_v55 = vmul.f32 0.2, %v13962_v45  ;;  %vm4915_vm7 = vcmp.gt.f32.partialorder %v13969_v29, 0.0  ;;  %6023 = vmatpush1.bf16.msra.mxu0 %v11967_v49  ;;  %6129 = vmatpush1.bf16.msra.mxu1 %v11970_v21  ;;  %v5190_v10 = vpack.c.bf16 %v4973_v58, %v4965_v36  ;;  %v13986_v40 = vpack.c.bf16 %v4976_v13, %v4968_v57  ;;  %v11985_v3 = vld [vmem:[#allocation11 + $0x6c0] ss:$16 sps:$4 sm:$0xff]  }
 0x429   :  { %v4947_v51 = vmul.f32 0.2, %v13969_v29  ;;  %6005 = vmatprep.mubr.bf16.mxu0 %v5191_v17  ;;  %6024 = vmatprep.subr.bf16.mxu0 %v11975_v38  ;;  %v4975_v2 = vsel %vm4911_vm5, %v4879_v43, %v4943_v18  ;;  %v13992_v11 = vpack.c.bf16 %v13966_v27, %v13940_v37  ;;  %v4969_v4 = vsel %vm4905_vm6, %v13918_v16, %v13949_v22  ;;  %v11988_v53 = vld [vmem:[#allocation11 + $0x6c8] ss:$16 sps:$4 sm:$0xff]   ;;  %v11996_v18 = vld [vmem:[#allocation11 + $0x6ec] ss:$16 sps:$4 sm:$0xff]  }
 0x42a   :  { %vm4914_vm4 = vcmp.gt.f32.partialorder %v4882_v1, 0.0  ;;  %v4946_v36 = vmul.f32 0.2, %v4882_v1  ;;  %6111 = vmatprep.mubr.bf16.mxu1 %v5191_v17  ;;  %6130 = vmatprep.subr.bf16.mxu1 %v11978_v52  ;;  %v13998_v14 = vpack.c.bf16 %v4975_v2, %v4967_v50  ;;  %v14001_v61 = vpack.c.bf16 %v4969_v4, %v13886_v32  ;;  %v11979_v32 = vld [vmem:[#allocation11 + $0x6a0] ss:$16 sps:$4 sm:$0xff]  }
 0x42b   :  { %v4948_v43 = vmul.f32 0.2, %v4884_v35  ;;  %6006 = vmatmul.mubr.bf16.gmra.mrb[52].mxu0 %v5190_v10  ;;  %6112 = vmatmul.mubr.bf16.gmra.mrb[52].mxu1 %v5190_v10  ;;  %v14007_v46 = vsel %vm4892_vm2, %v13857_v33, %v13905_v20  ;;  %v4964_v16 = vsel %vm4900_vm9, %v13873_v23, %v13931_v28  ;;  %v4972_v22 = vsel %vm4908_vm1, %v13928_v7, %v4940_v5  ;;  %v11987_v20 = vld [vmem:[#allocation11 + $0x6c4] ss:$16 sps:$4 sm:$0xff]   ;;  %v11990_v7 = vld [vmem:[#allocation11 + $0x6cc] ss:$16 sps:$4 sm:$0xff]  }
 0x42c   :  { %vm4916_vm8 = vcmp.gt.f32.partialorder %v4884_v35, 0.0  ;;  %6025 = vmatpush1.bf16.msra.mxu0 %v11973_v31  ;;  %6131 = vmatpush1.bf16.msra.mxu1 %v11976_v56  ;;  %v14016_v59 = vpack.c.bf16 %v4972_v22, %v4964_v16  ;;  %v4963_v33 = vsel %vm4899_vm10, %v13865_v6, %v13924_v54  ;;  %v4971_v23 = vsel %vm4907_vm11, %v13921_v12, %v13958_v60  ;;  %v11994_v0 = vld [vmem:[#allocation11 + $0x6e8] ss:$16 sps:$4 sm:$0xff]   ;;  %v11999_v62 = vld [vmem:[#allocation11 + $0x704] ss:$16 sps:$4 sm:$0xff]  }
 0x42d   :  { %6048 = vmatprep.mubr.bf16.mxu0 %v13892_v39  ;;  %6154 = vmatprep.mubr.bf16.mxu1 %v13892_v39  ;;  %v14028_v28 = vpack.c.bf16 %v4971_v23, %v4963_v33  ;;  %v14031_v34 = vpack.c.bf16 %v4963_v33, %v13902_v8  ;;  %v14035_v30 = vpack.c.bf16 %v13940_v37, %v13915_v9  ;;  %v11997_v38 = vld [vmem:[#allocation11 + $0x700] ss:$16 sps:$4 sm:$0xff]   ;;  %v12005_v17 = vld [vmem:[#allocation11 + $0x724] ss:$16 sps:$4 sm:$0xff]   ;;  %v12008_v52 = vld [vmem:[#allocation11 + $0x72c] ss:$16 sps:$4 sm:$0xff]  }
 0x42e   :  { %6026 = vmatprep.subr.bf16.mxu0 %v11981_v44  ;;  %6132 = vmatprep.subr.bf16.mxu1 %v11984_v63  ;;  %v4978_v6 = vsel %vm4914_vm4, %v4882_v1, %v4946_v36  ;;  %v4977_v12 = vsel %vm4913_vm13, %v13962_v45, %v4945_v55  ;;  %v14042_v39 = vpack.c.bf16 %v4964_v16, %v14007_v46  ;;  %v11991_v1 = vld [vmem:[#allocation11 + $0x6e0] ss:$16 sps:$4 sm:$0xff]   ;;  %v12006_v13 = vld [vmem:[#allocation11 + $0x728] ss:$16 sps:$4 sm:$0xff]   ;;  %v12011_v5 = vld [vmem:[#allocation11 + $0x744] ss:$16 sps:$4 sm:$0xff]  }
 0x42f   :  { %v14045_v54 = vpack.c.bf16 %v4978_v6, %v13966_v27  ;;  %v14047_v60 = vpack.c.bf16 %v4977_v12, %v4969_v4  ;;  %v4980_v49 = vsel %vm4916_vm8, %v4884_v35, %v4948_v43  ;;  %v4979_v37 = vsel %vm4915_vm7, %v13969_v29, %v4947_v51  ;;  %v11993_v27 = vld [vmem:[#allocation11 + $0x6e4] ss:$16 sps:$4 sm:$0xff]   ;;  %v12002_v29 = vld [vmem:[#allocation11 + $0x70c] ss:$16 sps:$4 sm:$0xff]   ;;  %v12000_v35 = vld [vmem:[#allocation11 + $0x708] ss:$16 sps:$4 sm:$0xff]  }
 0x430   :  { %6027 = vmatpush1.bf16.msra.mxu0 %v11979_v32  ;;  %6133 = vmatpush1.bf16.msra.mxu1 %v11982_v41  ;;  %v14053_v21 = vpack.c.bf16 %v4980_v49, %v4972_v22  ;;  %v14055_v45 = vpack.c.bf16 %v4979_v37, %v4971_v23  ;;  %v12003_v58 = vld [vmem:[#allocation11 + $0x720] ss:$16 sps:$4 sm:$0xff]   ;;  %v12014_v31 = vld [vmem:[#allocation11 + $0x74c] ss:$16 sps:$4 sm:$0xff]   ;;  %v12012_v50 = vld [vmem:[#allocation11 + $0x748] ss:$16 sps:$4 sm:$0xff]  }
 0x431   :  { %6028 = vmatprep.subr.bf16.mxu0 %v11987_v20  ;;  %6134 = vmatprep.subr.bf16.mxu1 %v11990_v7  ;;  %v12009_v57 = vld [vmem:[#allocation11 + $0x740] ss:$16 sps:$4 sm:$0xff]   ;;  %v12017_v55 = vld [vmem:[#allocation11 + $0x764] ss:$16 sps:$4 sm:$0xff]   ;;  %v12020_v56 = vld [vmem:[#allocation11 + $0x76c] ss:$16 sps:$4 sm:$0xff]  }
 0x432   :  { %v12015_v10 = vld [vmem:[#allocation11 + $0x760] ss:$16 sps:$4 sm:$0xff]   ;;  %v12018_v51 = vld [vmem:[#allocation11 + $0x768] ss:$16 sps:$4 sm:$0xff]   ;;  %v12023_v44 = vld [vmem:[#allocation11 + $0x784] ss:$16 sps:$4 sm:$0xff]  }
 0x433   :  { %v12026_v2 = vld [vmem:[#allocation11 + $0x78c] ss:$16 sps:$4 sm:$0xff]   ;;  %v12021_v4 = vld [vmem:[#allocation11 + $0x780] ss:$16 sps:$4 sm:$0xff]   ;;  %v12024_v36 = vld [vmem:[#allocation11 + $0x788] ss:$16 sps:$4 sm:$0xff]  }
 0x434   :  { %6029 = vmatpush1.bf16.msra.mxu0 %v11985_v3  ;;  %6135 = vmatpush1.bf16.msra.mxu1 %v11988_v53  ;;  %v12029_v63 = vld [vmem:[#allocation11 + $0x7a4] ss:$16 sps:$4 sm:$0xff]   ;;  %v12032_v43 = vld [vmem:[#allocation11 + $0x7ac] ss:$16 sps:$4 sm:$0xff]   ;;  %v12027_v16 = vld [vmem:[#allocation11 + $0x7a0] ss:$16 sps:$4 sm:$0xff]  }
 0x435   :  { %6030 = vmatprep.subr.bf16.mxu0 %v11993_v27  ;;  %6136 = vmatprep.subr.bf16.mxu1 %v11996_v18  ;;  %v12030_v22 = vld [vmem:[#allocation11 + $0x7a8] ss:$16 sps:$4 sm:$0xff]   ;;  %v12035_v32 = vld [vmem:[#allocation11 + $0x7c4] ss:$16 sps:$4 sm:$0xff]   ;;  %v12038_v41 = vld [vmem:[#allocation11 + $0x7cc] ss:$16 sps:$4 sm:$0xff]  }
 0x436   :  { %v12033_v33 = vld [vmem:[#allocation11 + $0x7c0] ss:$16 sps:$4 sm:$0xff]   ;;  %v12036_v23 = vld [vmem:[#allocation11 + $0x7c8] ss:$16 sps:$4 sm:$0xff]   ;;  %v12041_v20 = vld [vmem:[#allocation11 + $0x7e4] ss:$16 sps:$4 sm:$0xff]  }
 0x437   :  { %v12044_v7 = vld [vmem:[#allocation11 + $0x7ec] ss:$16 sps:$4 sm:$0xff]   ;;  %v12039_v6 = vld [vmem:[#allocation11 + $0x7e0] ss:$16 sps:$4 sm:$0xff]   ;;  %v12042_v12 = vld [vmem:[#allocation11 + $0x7e8] ss:$16 sps:$4 sm:$0xff]  }
 0x438   :  { %6031 = vmatpush1.bf16.msra.mxu0 %v11991_v1  ;;  %6137 = vmatpush1.bf16.msra.mxu1 %v11994_v0  ;;  %v12047_v49 = vld [vmem:[#allocation11 + $0x4] ss:$16 sps:$4 sm:$0xff]   ;;  %v12050_v37 = vld [vmem:[#allocation11 + $0xc] ss:$16 sps:$4 sm:$0xff]   ;;  %v12045_v3 = vld [vmem:[#allocation11] ss:$16 sps:$4 sm:$0xff]  }
 0x439   :  { %6032 = vmatprep.subr.bf16.mxu0 %v11999_v62  ;;  %6138 = vmatprep.subr.bf16.mxu1 %v12002_v29  ;;  %v12048_v53 = vld [vmem:[#allocation11 + $0x8] ss:$16 sps:$4 sm:$0xff]   ;;  %v12053_v27 = vld [vmem:[#allocation11 + $0x24] ss:$16 sps:$4 sm:$0xff]   ;;  %v12056_v18 = vld [vmem:[#allocation11 + $0x2c] ss:$16 sps:$4 sm:$0xff]  }
 0x43a   :  { %v12051_v1 = vld [vmem:[#allocation11 + $0x20] ss:$16 sps:$4 sm:$0xff]   ;;  %v12054_v0 = vld [vmem:[#allocation11 + $0x28] ss:$16 sps:$4 sm:$0xff]   ;;  %v12059_v62 = vld [vmem:[#allocation11 + $0x44] ss:$16 sps:$4 sm:$0xff]  }
 0x43b   :  { %v12062_v29 = vld [vmem:[#allocation11 + $0x4c] ss:$16 sps:$4 sm:$0xff]  }
 0x43c   :  { %6033 = vmatpush1.bf16.msra.mxu0 %v11997_v38  ;;  %6139 = vmatpush1.bf16.msra.mxu1 %v12000_v35  ;;  %v12057_v38 = vld [vmem:[#allocation11 + $0x40] ss:$16 sps:$4 sm:$0xff]   ;;  %v12060_v35 = vld [vmem:[#allocation11 + $0x48] ss:$16 sps:$4 sm:$0xff]  }
 0x43d   :  { %6034 = vmatprep.subr.bf16.mxu0 %v12005_v17  ;;  %6140 = vmatprep.subr.bf16.mxu1 %v12008_v52  ;;  %v12065_v17 = vld [vmem:[#allocation11 + $0x64] ss:$16 sps:$4 sm:$0xff]   ;;  %v12068_v52 = vld [vmem:[#allocation11 + $0x6c] ss:$16 sps:$4 sm:$0xff]  }
 0x440   :  { %6035 = vmatpush1.bf16.msra.mxu0 %v12003_v58  ;;  %6141 = vmatpush1.bf16.msra.mxu1 %v12006_v13  ;;  %v12066_v58 = vld [vmem:[#allocation11 + $0x68] ss:$16 sps:$4 sm:$0xff]   ;;  %v12071_v13 = vld [vmem:[#allocation11 + $0x84] ss:$16 sps:$4 sm:$0xff]  }
 0x441   :  { %6036 = vmatprep.subr.bf16.mxu0 %v12011_v5  ;;  %6142 = vmatprep.subr.bf16.mxu1 %v12014_v31  ;;  %v12074_v5 = vld [vmem:[#allocation11 + $0x8c] ss:$16 sps:$4 sm:$0xff]   ;;  %v12069_v31 = vld [vmem:[#allocation11 + $0x80] ss:$16 sps:$4 sm:$0xff]  }
 0x444   :  { %6037 = vmatpush1.bf16.msra.mxu0 %v12009_v57  ;;  %6143 = vmatpush1.bf16.msra.mxu1 %v12012_v50  ;;  %v12077_v57 = vld [vmem:[#allocation11 + $0xa4] ss:$16 sps:$4 sm:$0xff]   ;;  %v12080_v50 = vld [vmem:[#allocation11 + $0xac] ss:$16 sps:$4 sm:$0xff]  }
 0x445   :  { %6038 = vmatprep.subr.bf16.mxu0 %v12017_v55  ;;  %6144 = vmatprep.subr.bf16.mxu1 %v12020_v56  ;;  %v12078_v55 = vld [vmem:[#allocation11 + $0xa8] ss:$16 sps:$4 sm:$0xff]   ;;  %v12083_v56 = vld [vmem:[#allocation11 + $0xc4] ss:$16 sps:$4 sm:$0xff]  }
 0x448   :  { %6039 = vmatpush1.bf16.msra.mxu0 %v12015_v10  ;;  %6145 = vmatpush1.bf16.msra.mxu1 %v12018_v51  ;;  %v12086_v10 = vld [vmem:[#allocation11 + $0xcc] ss:$16 sps:$4 sm:$0xff]   ;;  %v12081_v51 = vld [vmem:[#allocation11 + $0xc0] ss:$16 sps:$4 sm:$0xff]  }
 0x449   :  { %6040 = vmatprep.subr.bf16.mxu0 %v12023_v44  ;;  %6146 = vmatprep.subr.bf16.mxu1 %v12026_v2  ;;  %v12084_v44 = vld [vmem:[#allocation11 + $0xc8] ss:$16 sps:$4 sm:$0xff]   ;;  %v12089_v2 = vld [vmem:[#allocation11 + $0xe4] ss:$16 sps:$4 sm:$0xff]  }
 0x44c   :  { %6041 = vmatpush1.bf16.msra.mxu0 %v12021_v4  ;;  %6147 = vmatpush1.bf16.msra.mxu1 %v12024_v36  ;;  %v12092_v4 = vld [vmem:[#allocation11 + $0xec] ss:$16 sps:$4 sm:$0xff]   ;;  %v12087_v36 = vld [vmem:[#allocation11 + $0xe0] ss:$16 sps:$4 sm:$0xff]  }
 0x44d   :  { %6042 = vmatprep.subr.bf16.mxu0 %v12029_v63  ;;  %6148 = vmatprep.subr.bf16.mxu1 %v12032_v43  ;;  %v12090_v63 = vld [vmem:[#allocation11 + $0xe8] ss:$16 sps:$4 sm:$0xff]   ;;  %v12095_v43 = vld [vmem:[#allocation11 + $0x104] ss:$16 sps:$4 sm:$0xff]  }
 0x450   :  { %6043 = vmatpush1.bf16.msra.mxu0 %v12027_v16  ;;  %6149 = vmatpush1.bf16.msra.mxu1 %v12030_v22  ;;  %v12098_v16 = vld [vmem:[#allocation11 + $0x10c] ss:$16 sps:$4 sm:$0xff]   ;;  %v12093_v22 = vld [vmem:[#allocation11 + $0x100] ss:$16 sps:$4 sm:$0xff]  }
 0x451   :  { %6044 = vmatprep.subr.bf16.mxu0 %v12035_v32  ;;  %6150 = vmatprep.subr.bf16.mxu1 %v12038_v41  ;;  %v12096_v32 = vld [vmem:[#allocation11 + $0x108] ss:$16 sps:$4 sm:$0xff]   ;;  %v12101_v41 = vld [vmem:[#allocation11 + $0x124] ss:$16 sps:$4 sm:$0xff]  }
 0x454   :  { %6045 = vmatpush1.bf16.msra.mxu0 %v12033_v33  ;;  %6151 = vmatpush1.bf16.msra.mxu1 %v12036_v23  ;;  %v12104_v33 = vld [vmem:[#allocation11 + $0x12c] ss:$16 sps:$4 sm:$0xff]   ;;  %v12099_v23 = vld [vmem:[#allocation11 + $0x120] ss:$16 sps:$4 sm:$0xff]  }
 0x455   :  { %6046 = vmatprep.subr.bf16.mxu0 %v12041_v20  ;;  %6152 = vmatprep.subr.bf16.mxu1 %v12044_v7  ;;  %v12102_v20 = vld [vmem:[#allocation11 + $0x128] ss:$16 sps:$4 sm:$0xff]   ;;  %v12107_v7 = vld [vmem:[#allocation11 + $0x144] ss:$16 sps:$4 sm:$0xff]  }
 0x458   :  { %6047 = vmatpush1.bf16.msra.mxu0 %v12039_v6  ;;  %6153 = vmatpush1.bf16.msra.mxu1 %v12042_v12  ;;  %v12110_v6 = vld [vmem:[#allocation11 + $0x14c] ss:$16 sps:$4 sm:$0xff]   ;;  %v12105_v12 = vld [vmem:[#allocation11 + $0x140] ss:$16 sps:$4 sm:$0xff]  }
 0x459   :  { %6815 = vmatprep.subr.bf16.mxu0 %v12047_v49  ;;  %6921 = vmatprep.subr.bf16.mxu1 %v12050_v37  ;;  %v12108_v49 = vld [vmem:[#allocation11 + $0x148] ss:$16 sps:$4 sm:$0xff]   ;;  %v12113_v37 = vld [vmem:[#allocation11 + $0x164] ss:$16 sps:$4 sm:$0xff]  }
 0x45b   :  { %6049 = vmatmul.mubr.bf16.vlgmr.msra.gmra.mrb[48].mxu0 %v13867_v19  ;;  %6155 = vmatmul.mubr.bf16.vlgmr.msra.gmra.mrb[48].mxu1 %v13867_v19  ;;  %v5051_v19 = vpack.c.bf16 %v13915_v9, %v12737_v25  ;;  %v12072_v9 = vld [vmem:[#allocation11 + $0x88] ss:$16 sps:$4 sm:$0xff]  }
 0x45c   :  { %6058 = vmatprep.mubr.bf16.mxu0 %v13986_v40  ;;  %6164 = vmatprep.mubr.bf16.mxu1 %v13986_v40  ;;  %v12063_v40 = vld [vmem:[#allocation11 + $0x60] ss:$16 sps:$4 sm:$0xff]  }
 0x45d   :  { %6816 = vmatpush1.bf16.msra.mxu0 %v12045_v3  ;;  %6922 = vmatpush1.bf16.msra.mxu1 %v12048_v53  ;;  %v12116_v3 = vld [vmem:[#allocation11 + $0x16c] ss:$16 sps:$4 sm:$0xff]   ;;  %v12111_v53 = vld [vmem:[#allocation11 + $0x160] ss:$16 sps:$4 sm:$0xff]  }
 0x45e   :  { %6817 = vmatprep.subr.bf16.mxu0 %v12053_v27  ;;  %6923 = vmatprep.subr.bf16.mxu1 %v12056_v18  ;;  %v12114_v27 = vld [vmem:[#allocation11 + $0x168] ss:$16 sps:$4 sm:$0xff]   ;;  %v12119_v18 = vld [vmem:[#allocation11 + $0x184] ss:$16 sps:$4 sm:$0xff]  }
 0x461   :  { %6818 = vmatpush1.bf16.msra.mxu0 %v12051_v1  ;;  %6924 = vmatpush1.bf16.msra.mxu1 %v12054_v0  ;;  %v12122_v1 = vld [vmem:[#allocation11 + $0x18c] ss:$16 sps:$4 sm:$0xff]   ;;  %v12117_v0 = vld [vmem:[#allocation11 + $0x180] ss:$16 sps:$4 sm:$0xff]  }
 0x462   :  { %6819 = vmatprep.subr.bf16.mxu0 %v12059_v62  ;;  %6925 = vmatprep.subr.bf16.mxu1 %v12062_v29  ;;  %v12120_v62 = vld [vmem:[#allocation11 + $0x188] ss:$16 sps:$4 sm:$0xff]   ;;  %v12125_v29 = vld [vmem:[#allocation11 + $0x1a4] ss:$16 sps:$4 sm:$0xff]  }
 0x463   :  { %6059 = vmatmul.mubr.bf16.gmra.mrb[52].mxu0 %v13998_v14  ;;  %6165 = vmatmul.mubr.bf16.gmra.mrb[52].mxu1 %v13998_v14  ;;  %v12075_v14 = vld [vmem:[#allocation11 + $0xa0] ss:$16 sps:$4 sm:$0xff]  }
 0x464   :  { %6847 = vmatprep.mubr.bf16.mxu0 %v5051_v19  ;;  %6953 = vmatprep.mubr.bf16.mxu1 %v5051_v19  ;;  %v12126_v19 = vld [vmem:[#allocation11 + $0x1a8] ss:$16 sps:$4 sm:$0xff]  }
 0x465   :  { %6820 = vmatpush1.bf16.msra.mxu0 %v12057_v38  ;;  %6926 = vmatpush1.bf16.msra.mxu1 %v12060_v35  ;;  %v12128_v38 = vld [vmem:[#allocation11 + $0x1ac] ss:$16 sps:$4 sm:$0xff]   ;;  %v12123_v35 = vld [vmem:[#allocation11 + $0x1a0] ss:$16 sps:$4 sm:$0xff]  }
 0x466   :  { %6821 = vmatprep.subr.bf16.mxu0 %v12065_v17  ;;  %6927 = vmatprep.subr.bf16.mxu1 %v12068_v52  ;;  %v12131_v17 = vld [vmem:[#allocation11 + $0x1c4] ss:$16 sps:$4 sm:$0xff]   ;;  %v12134_v52 = vld [vmem:[#allocation11 + $0x1cc] ss:$16 sps:$4 sm:$0xff]  }
 0x469   :  { %6822 = vmatpush1.bf16.msra.mxu0 %v12063_v40  ;;  %6928 = vmatpush1.bf16.msra.mxu1 %v12066_v58  ;;  %v12129_v40 = vld [vmem:[#allocation11 + $0x1c0] ss:$16 sps:$4 sm:$0xff]   ;;  %v12132_v58 = vld [vmem:[#allocation11 + $0x1c8] ss:$16 sps:$4 sm:$0xff]  }
 0x46a   :  { %6823 = vmatprep.subr.bf16.mxu0 %v12071_v13  ;;  %6929 = vmatprep.subr.bf16.mxu1 %v12074_v5  ;;  %v12137_v13 = vld [vmem:[#allocation11 + $0x1e4] ss:$16 sps:$4 sm:$0xff]   ;;  %v12140_v5 = vld [vmem:[#allocation11 + $0x1ec] ss:$16 sps:$4 sm:$0xff]  }
 0x46d   :  { %6824 = vmatpush1.bf16.msra.mxu0 %v12069_v31  ;;  %6930 = vmatpush1.bf16.msra.mxu1 %v12072_v9  ;;  %v12135_v31 = vld [vmem:[#allocation11 + $0x1e0] ss:$16 sps:$4 sm:$0xff]   ;;  %v12138_v9 = vld [vmem:[#allocation11 + $0x1e8] ss:$16 sps:$4 sm:$0xff]  }
 0x46e   :  { %6825 = vmatprep.subr.bf16.mxu0 %v12077_v57  ;;  %6931 = vmatprep.subr.bf16.mxu1 %v12080_v50  ;;  %v12143_v57 = vld [vmem:[#allocation11 + $0x204] ss:$16 sps:$4 sm:$0xff]   ;;  %v12146_v50 = vld [vmem:[#allocation11 + $0x20c] ss:$16 sps:$4 sm:$0xff]  }
 0x471   :  { %6826 = vmatpush1.bf16.msra.mxu0 %v12075_v14  ;;  %6932 = vmatpush1.bf16.msra.mxu1 %v12078_v55  ;;  %v12141_v14 = vld [vmem:[#allocation11 + $0x200] ss:$16 sps:$4 sm:$0xff]   ;;  %v5050_v55 = vpack.c.bf16 %v13878_v26, %v12737_v25 }
 0x472   :  { %6827 = vmatprep.subr.bf16.mxu0 %v12083_v56  ;;  %6933 = vmatprep.subr.bf16.mxu1 %v12086_v10  ;;  %v12144_v56 = vld [vmem:[#allocation11 + $0x208] ss:$16 sps:$4 sm:$0xff]   ;;  %v12149_v10 = vld [vmem:[#allocation11 + $0x224] ss:$16 sps:$4 sm:$0xff]   ;;  %v12153_v26 = vld [vmem:[#allocation11 + $0x240] ss:$16 sps:$4 sm:$0xff]  }
 0x475   :  { %6828 = vmatpush1.bf16.msra.mxu0 %v12081_v51  ;;  %6934 = vmatpush1.bf16.msra.mxu1 %v12084_v44  ;;  %v12152_v51 = vld [vmem:[#allocation11 + $0x22c] ss:$16 sps:$4 sm:$0xff]   ;;  %v12147_v44 = vld [vmem:[#allocation11 + $0x220] ss:$16 sps:$4 sm:$0xff]  }
 0x476   :  { %6829 = vmatprep.subr.bf16.mxu0 %v12089_v2  ;;  %6935 = vmatprep.subr.bf16.mxu1 %v12092_v4  ;;  %v12150_v2 = vld [vmem:[#allocation11 + $0x228] ss:$16 sps:$4 sm:$0xff]   ;;  %v12155_v4 = vld [vmem:[#allocation11 + $0x244] ss:$16 sps:$4 sm:$0xff]  }
 0x479   :  { %6830 = vmatpush1.bf16.msra.mxu0 %v12087_v36  ;;  %6936 = vmatpush1.bf16.msra.mxu1 %v12090_v63  ;;  %v12158_v36 = vld [vmem:[#allocation11 + $0x24c] ss:$16 sps:$4 sm:$0xff]   ;;  %v12156_v63 = vld [vmem:[#allocation11 + $0x248] ss:$16 sps:$4 sm:$0xff]  }
 0x47a   :  { %6831 = vmatprep.subr.bf16.mxu0 %v12095_v43  ;;  %6937 = vmatprep.subr.bf16.mxu1 %v12098_v16  ;;  %v5053_v43 = vpack.c.bf16 %v14007_v46, %v12737_v25  ;;  %v12161_v16 = vld [vmem:[#allocation11 + $0x264] ss:$16 sps:$4 sm:$0xff]   ;;  %v12168_v46 = vld [vmem:[#allocation11 + $0x288] ss:$16 sps:$4 sm:$0xff]  }
 0x47d   :  { %6832 = vmatpush1.bf16.msra.mxu0 %v12093_v22  ;;  %6938 = vmatpush1.bf16.msra.mxu1 %v12096_v32  ;;  %v12164_v22 = vld [vmem:[#allocation11 + $0x26c] ss:$16 sps:$4 sm:$0xff]   ;;  %v12162_v32 = vld [vmem:[#allocation11 + $0x268] ss:$16 sps:$4 sm:$0xff]  }
 0x47e   :  { %6833 = vmatprep.subr.bf16.mxu0 %v12101_v41  ;;  %6939 = vmatprep.subr.bf16.mxu1 %v12104_v33  ;;  %v12167_v41 = vld [vmem:[#allocation11 + $0x284] ss:$16 sps:$4 sm:$0xff]   ;;  %v12170_v33 = vld [vmem:[#allocation11 + $0x28c] ss:$16 sps:$4 sm:$0xff]  }
 0x481   :  { %6834 = vmatpush1.bf16.msra.mxu0 %v12099_v23  ;;  %6940 = vmatpush1.bf16.msra.mxu1 %v12102_v20  ;;  %v12165_v23 = vld [vmem:[#allocation11 + $0x280] ss:$16 sps:$4 sm:$0xff]   ;;  %v12173_v20 = vld [vmem:[#allocation11 + $0x2a4] ss:$16 sps:$4 sm:$0xff]  }
 0x482   :  { %6835 = vmatprep.subr.bf16.mxu0 %v12107_v7  ;;  %6941 = vmatprep.subr.bf16.mxu1 %v12110_v6  ;;  %v12176_v7 = vld [vmem:[#allocation11 + $0x2ac] ss:$16 sps:$4 sm:$0xff]   ;;  %v12174_v6 = vld [vmem:[#allocation11 + $0x2a8] ss:$16 sps:$4 sm:$0xff]  }
 0x485   :  { %6836 = vmatpush1.bf16.msra.mxu0 %v12105_v12  ;;  %6942 = vmatpush1.bf16.msra.mxu1 %v12108_v49  ;;  %v12179_v12 = vld [vmem:[#allocation11 + $0x2c4] ss:$16 sps:$4 sm:$0xff]   ;;  %v12182_v49 = vld [vmem:[#allocation11 + $0x2cc] ss:$16 sps:$4 sm:$0xff]  }
 0x486   :  { %6837 = vmatprep.subr.bf16.mxu0 %v12113_v37  ;;  %6943 = vmatprep.subr.bf16.mxu1 %v12116_v3  ;;  %v12177_v37 = vld [vmem:[#allocation11 + $0x2c0] ss:$16 sps:$4 sm:$0xff]   ;;  %v12180_v3 = vld [vmem:[#allocation11 + $0x2c8] ss:$16 sps:$4 sm:$0xff]  }
 0x489   :  { %6838 = vmatpush1.bf16.msra.mxu0 %v12111_v53  ;;  %6944 = vmatpush1.bf16.msra.mxu1 %v12114_v27  ;;  %v12185_v53 = vld [vmem:[#allocation11 + $0x2e4] ss:$16 sps:$4 sm:$0xff]   ;;  %v12188_v27 = vld [vmem:[#allocation11 + $0x2ec] ss:$16 sps:$4 sm:$0xff]  }
 0x48a   :  { %6839 = vmatprep.subr.bf16.mxu0 %v12119_v18  ;;  %6945 = vmatprep.subr.bf16.mxu1 %v12122_v1  ;;  %v12183_v18 = vld [vmem:[#allocation11 + $0x2e0] ss:$16 sps:$4 sm:$0xff]   ;;  %v12186_v1 = vld [vmem:[#allocation11 + $0x2e8] ss:$16 sps:$4 sm:$0xff]  }
 0x48d   :  { %6840 = vmatpush1.bf16.msra.mxu0 %v12117_v0  ;;  %6946 = vmatpush1.bf16.msra.mxu1 %v12120_v62  ;;  %v12191_v0 = vld [vmem:[#allocation11 + $0x304] ss:$16 sps:$4 sm:$0xff]   ;;  %v12194_v62 = vld [vmem:[#allocation11 + $0x30c] ss:$16 sps:$4 sm:$0xff]  }
 0x48e   :  { %6841 = vmatprep.subr.bf16.mxu0 %v12125_v29  ;;  %6947 = vmatprep.subr.bf16.mxu1 %v12128_v38  ;;  %v12189_v29 = vld [vmem:[#allocation11 + $0x300] ss:$16 sps:$4 sm:$0xff]   ;;  %v12192_v38 = vld [vmem:[#allocation11 + $0x308] ss:$16 sps:$4 sm:$0xff]  }
 0x491   :  { %6842 = vmatpush1.bf16.msra.mxu0 %v12123_v35  ;;  %6948 = vmatpush1.bf16.msra.mxu1 %v12126_v19  ;;  %v12197_v35 = vld [vmem:[#allocation11 + $0x324] ss:$16 sps:$4 sm:$0xff]   ;;  %v12200_v19 = vld [vmem:[#allocation11 + $0x32c] ss:$16 sps:$4 sm:$0xff]  }
 0x492   :  { %6843 = vmatprep.subr.bf16.mxu0 %v12131_v17  ;;  %6949 = vmatprep.subr.bf16.mxu1 %v12134_v52  ;;  %v12195_v17 = vld [vmem:[#allocation11 + $0x320] ss:$16 sps:$4 sm:$0xff]   ;;  %v12198_v52 = vld [vmem:[#allocation11 + $0x328] ss:$16 sps:$4 sm:$0xff]  }
 0x495   :  { %6844 = vmatpush1.bf16.msra.mxu0 %v12129_v40  ;;  %6950 = vmatpush1.bf16.msra.mxu1 %v12132_v58  ;;  %v12203_v40 = vld [vmem:[#allocation11 + $0x344] ss:$16 sps:$4 sm:$0xff]   ;;  %v12206_v58 = vld [vmem:[#allocation11 + $0x34c] ss:$16 sps:$4 sm:$0xff]  }
 0x496   :  { %6845 = vmatprep.subr.bf16.mxu0 %v12137_v13  ;;  %6951 = vmatprep.subr.bf16.mxu1 %v12140_v5  ;;  %v12201_v13 = vld [vmem:[#allocation11 + $0x340] ss:$16 sps:$4 sm:$0xff]   ;;  %v12204_v5 = vld [vmem:[#allocation11 + $0x348] ss:$16 sps:$4 sm:$0xff]  }
 0x499   :  { %6846 = vmatpush1.bf16.msra.mxu0 %v12135_v31  ;;  %6952 = vmatpush1.bf16.msra.mxu1 %v12138_v9  ;;  %v12209_v31 = vld [vmem:[#allocation11 + $0x364] ss:$16 sps:$4 sm:$0xff]   ;;  %v12212_v9 = vld [vmem:[#allocation11 + $0x36c] ss:$16 sps:$4 sm:$0xff]  }
 0x49a   :  { %6868 = vmatprep.subr.bf16.mxu0 %v12143_v57  ;;  %6974 = vmatprep.subr.bf16.mxu1 %v12146_v50  ;;  %v12207_v57 = vld [vmem:[#allocation11 + $0x360] ss:$16 sps:$4 sm:$0xff]   ;;  %v12210_v50 = vld [vmem:[#allocation11 + $0x368] ss:$16 sps:$4 sm:$0xff]  }
 0x49c   :  { %6848 = vmatmul.mubr.bf16.vlgmr.msra.gmra.mrb[48].mxu0 %v5050_v55  ;;  %6954 = vmatmul.mubr.bf16.vlgmr.msra.gmra.mrb[48].mxu1 %v5050_v55  ;;  %v12218_v55 = vld [vmem:[#allocation11 + $0x38c] ss:$16 sps:$4 sm:$0xff]  }
 0x49d   :  { %6857 = vmatprep.mubr.bf16.mxu0 %v13992_v11  ;;  %6869 = vmatpush1.bf16.msra.mxu0 %v12141_v14  ;;  %v12215_v14 = vld [vmem:[#allocation11 + $0x384] ss:$16 sps:$4 sm:$0xff]  }
 0x49e   :  { %6963 = vmatprep.mubr.bf16.mxu1 %v13992_v11  ;;  %6975 = vmatpush1.bf16.msra.mxu1 %v12144_v56  ;;  %v12159_v11 = vld [vmem:[#allocation11 + $0x260] ss:$16 sps:$4 sm:$0xff]  }
 0x49f   :  { %6870 = vmatprep.subr.bf16.mxu0 %v12149_v10  ;;  %6976 = vmatprep.subr.bf16.mxu1 %v12152_v51  ;;  %v12213_v56 = vld [vmem:[#allocation11 + $0x380] ss:$16 sps:$4 sm:$0xff]   ;;  %v12216_v10 = vld [vmem:[#allocation11 + $0x388] ss:$16 sps:$4 sm:$0xff]   ;;  %v12221_v51 = vld [vmem:[#allocation11 + $0x3a4] ss:$16 sps:$4 sm:$0xff]  }
 0x4a1   :  { %6871 = vmatpush1.bf16.msra.mxu0 %v12147_v44  ;;  %v12224_v44 = vld [vmem:[#allocation11 + $0x3ac] ss:$16 sps:$4 sm:$0xff]  }
 0x4a2   :  { %6977 = vmatpush1.bf16.msra.mxu1 %v12150_v2  ;;  %6872 = vmatprep.subr.bf16.mxu0 %v12155_v4  ;;  %v12219_v2 = vld [vmem:[#allocation11 + $0x3a0] ss:$16 sps:$4 sm:$0xff]   ;;  %v12222_v4 = vld [vmem:[#allocation11 + $0x3a8] ss:$16 sps:$4 sm:$0xff]  }
 0x4a3   :  { %6978 = vmatprep.subr.bf16.mxu1 %v12158_v36  ;;  %v12227_v36 = vld [vmem:[#allocation11 + $0x3c4] ss:$16 sps:$4 sm:$0xff]  }
 0x4a4   :  { %6858 = vmatmul.mubr.bf16.gmra.mrb[52].mxu0 %v14001_v61  ;;  %6964 = vmatmul.mubr.bf16.gmra.mrb[52].mxu1 %v14001_v61  ;;  %v12171_v61 = vld [vmem:[#allocation11 + $0x2a0] ss:$16 sps:$4 sm:$0xff]  }
 0x4a5   :  { %6873 = vmatpush1.bf16.msra.mxu0 %v12153_v26  ;;  %6900 = vmatprep.mubr.bf16.mxu0 %v5053_v43  ;;  %v12230_v26 = vld [vmem:[#allocation11 + $0x3cc] ss:$16 sps:$4 sm:$0xff]  }
 0x4a6   :  { %6979 = vmatpush1.bf16.msra.mxu1 %v12156_v63  ;;  %7006 = vmatprep.mubr.bf16.mxu1 %v5053_v43  ;;  %v12225_v63 = vld [vmem:[#allocation11 + $0x3c0] ss:$16 sps:$4 sm:$0xff]   ;;  %v12228_v43 = vld [vmem:[#allocation11 + $0x3c8] ss:$16 sps:$4 sm:$0xff]  }
 0x4a7   :  { %6874 = vmatprep.subr.bf16.mxu0 %v12161_v16  ;;  %6980 = vmatprep.subr.bf16.mxu1 %v12164_v22  ;;  %v12233_v16 = vld [vmem:[#allocation11 + $0x3e4] ss:$16 sps:$4 sm:$0xff]   ;;  %v12236_v22 = vld [vmem:[#allocation11 + $0x3ec] ss:$16 sps:$4 sm:$0xff]  }
 0x4a9   :  { %6875 = vmatpush1.bf16.msra.mxu0 %v12159_v11  ;;  %v12231_v11 = vld [vmem:[#allocation11 + $0x3e0] ss:$16 sps:$4 sm:$0xff]  }
 0x4aa   :  { %6981 = vmatpush1.bf16.msra.mxu1 %v12162_v32  ;;  %6876 = vmatprep.subr.bf16.mxu0 %v12167_v41  ;;  %v12234_v32 = vld [vmem:[#allocation11 + $0x3e8] ss:$16 sps:$4 sm:$0xff]   ;;  %v12239_v41 = vld [vmem:[#allocation11 + $0x804] ss:$16 sps:$4 sm:$0xff]  }
 0x4ab   :  { %6982 = vmatprep.subr.bf16.mxu1 %v12170_v33  ;;  %v12242_v33 = vld [vmem:[#allocation11 + $0x80c] ss:$16 sps:$4 sm:$0xff]  }
 0x4ad   :  { %6877 = vmatpush1.bf16.msra.mxu0 %v12165_v23  ;;  %v5052_v23 = vpack.c.bf16 %v13902_v8, %v12737_v25  ;;  %v12254_v25 = vld [vmem:[#allocation11 + $0x84c] ss:$16 sps:$4 sm:$0xff]   ;;  %v12249_v8 = vld [vmem:[#allocation11 + $0x840] ss:$16 sps:$4 sm:$0xff]  }
 0x4ae   :  { %6983 = vmatpush1.bf16.msra.mxu1 %v12168_v46  ;;  %6878 = vmatprep.subr.bf16.mxu0 %v12173_v20  ;;  %v12237_v46 = vld [vmem:[#allocation11 + $0x800] ss:$16 sps:$4 sm:$0xff]   ;;  %v12240_v20 = vld [vmem:[#allocation11 + $0x808] ss:$16 sps:$4 sm:$0xff]  }
 0x4af   :  { %6984 = vmatprep.subr.bf16.mxu1 %v12176_v7  ;;  %v12245_v7 = vld [vmem:[#allocation11 + $0x824] ss:$16 sps:$4 sm:$0xff]  }
 0x4b1   :  { %6879 = vmatpush1.bf16.msra.mxu0 %v12171_v61  ;;  %v12248_v61 = vld [vmem:[#allocation11 + $0x82c] ss:$16 sps:$4 sm:$0xff]  }
 0x4b2   :  { %6985 = vmatpush1.bf16.msra.mxu1 %v12174_v6  ;;  %6880 = vmatprep.subr.bf16.mxu0 %v12179_v12  ;;  %v12243_v6 = vld [vmem:[#allocation11 + $0x820] ss:$16 sps:$4 sm:$0xff]   ;;  %v12246_v12 = vld [vmem:[#allocation11 + $0x828] ss:$16 sps:$4 sm:$0xff]  }
 0x4b3   :  { %6986 = vmatprep.subr.bf16.mxu1 %v12182_v49  ;;  %v12251_v49 = vld [vmem:[#allocation11 + $0x844] ss:$16 sps:$4 sm:$0xff]  }
 0x4b5   :  { %6881 = vmatpush1.bf16.msra.mxu0 %v12177_v37  ;;  %v12252_v37 = vld [vmem:[#allocation11 + $0x848] ss:$16 sps:$4 sm:$0xff]  }
 0x4b6   :  { %6987 = vmatpush1.bf16.msra.mxu1 %v12180_v3  ;;  %6882 = vmatprep.subr.bf16.mxu0 %v12185_v53  ;;  %v12257_v3 = vld [vmem:[#allocation11 + $0x864] ss:$16 sps:$4 sm:$0xff]   ;;  %v12260_v53 = vld [vmem:[#allocation11 + $0x86c] ss:$16 sps:$4 sm:$0xff]  }
 0x4b7   :  { %6988 = vmatprep.subr.bf16.mxu1 %v12188_v27  ;;  %v12258_v27 = vld [vmem:[#allocation11 + $0x868] ss:$16 sps:$4 sm:$0xff]  }
 0x4b9   :  { %6883 = vmatpush1.bf16.msra.mxu0 %v12183_v18  ;;  %v12263_v18 = vld [vmem:[#allocation11 + $0x884] ss:$16 sps:$4 sm:$0xff]  }
 0x4ba   :  { %6989 = vmatpush1.bf16.msra.mxu1 %v12186_v1  ;;  %6884 = vmatprep.subr.bf16.mxu0 %v12191_v0  ;;  %v12266_v1 = vld [vmem:[#allocation11 + $0x88c] ss:$16 sps:$4 sm:$0xff]   ;;  %v12261_v0 = vld [vmem:[#allocation11 + $0x880] ss:$16 sps:$4 sm:$0xff]  }
 0x4bb   :  { %6990 = vmatprep.subr.bf16.mxu1 %v12194_v62  ;;  %v12264_v62 = vld [vmem:[#allocation11 + $0x888] ss:$16 sps:$4 sm:$0xff]  }
 0x4bd   :  { %6885 = vmatpush1.bf16.msra.mxu0 %v12189_v29  ;;  %v12269_v29 = vld [vmem:[#allocation11 + $0x8a4] ss:$16 sps:$4 sm:$0xff]  }
 0x4be   :  { %6991 = vmatpush1.bf16.msra.mxu1 %v12192_v38  ;;  %6886 = vmatprep.subr.bf16.mxu0 %v12197_v35  ;;  %v12267_v38 = vld [vmem:[#allocation11 + $0x8a0] ss:$16 sps:$4 sm:$0xff]   ;;  %v12275_v35 = vld [vmem:[#allocation11 + $0x8c4] ss:$16 sps:$4 sm:$0xff]  }
 0x4bf   :  { %6992 = vmatprep.subr.bf16.mxu1 %v12200_v19  ;;  %v12278_v19 = vld [vmem:[#allocation11 + $0x8cc] ss:$16 sps:$4 sm:$0xff]  }
 0x4c1   :  { %6887 = vmatpush1.bf16.msra.mxu0 %v12195_v17  ;;  %v12273_v17 = vld [vmem:[#allocation11 + $0x8c0] ss:$16 sps:$4 sm:$0xff]  }
 0x4c2   :  { %6993 = vmatpush1.bf16.msra.mxu1 %v12198_v52  ;;  %6888 = vmatprep.subr.bf16.mxu0 %v12203_v40  ;;  %v12276_v52 = vld [vmem:[#allocation11 + $0x8c8] ss:$16 sps:$4 sm:$0xff]   ;;  %v12281_v40 = vld [vmem:[#allocation11 + $0x8e4] ss:$16 sps:$4 sm:$0xff]  }
 0x4c3   :  { %6994 = vmatprep.subr.bf16.mxu1 %v12206_v58  ;;  %v12284_v58 = vld [vmem:[#allocation11 + $0x8ec] ss:$16 sps:$4 sm:$0xff]  }
 0x4c5   :  { %6889 = vmatpush1.bf16.msra.mxu0 %v12201_v13  ;;  %v12279_v13 = vld [vmem:[#allocation11 + $0x8e0] ss:$16 sps:$4 sm:$0xff]  }
 0x4c6   :  { %6995 = vmatpush1.bf16.msra.mxu1 %v12204_v5  ;;  %6890 = vmatprep.subr.bf16.mxu0 %v12209_v31  ;;  %v12282_v5 = vld [vmem:[#allocation11 + $0x8e8] ss:$16 sps:$4 sm:$0xff]   ;;  %v12287_v31 = vld [vmem:[#allocation11 + $0x904] ss:$16 sps:$4 sm:$0xff]  }
 0x4c7   :  { %6996 = vmatprep.subr.bf16.mxu1 %v12212_v9  ;;  %v12290_v9 = vld [vmem:[#allocation11 + $0x90c] ss:$16 sps:$4 sm:$0xff]  }
 0x4c9   :  { %6891 = vmatpush1.bf16.msra.mxu0 %v12207_v57  ;;  %v12285_v57 = vld [vmem:[#allocation11 + $0x900] ss:$16 sps:$4 sm:$0xff]  }
 0x4ca   :  { %6997 = vmatpush1.bf16.msra.mxu1 %v12210_v50  ;;  %6892 = vmatprep.subr.bf16.mxu0 %v12215_v14  ;;  %v12288_v50 = vld [vmem:[#allocation11 + $0x908] ss:$16 sps:$4 sm:$0xff]   ;;  %v12293_v14 = vld [vmem:[#allocation11 + $0x924] ss:$16 sps:$4 sm:$0xff]  }
 0x4cb   :  { %6998 = vmatprep.subr.bf16.mxu1 %v12218_v55  ;;  %v12296_v55 = vld [vmem:[#allocation11 + $0x92c] ss:$16 sps:$4 sm:$0xff]  }
 0x4cd   :  { %6893 = vmatpush1.bf16.msra.mxu0 %v12213_v56  ;;  %v12291_v56 = vld [vmem:[#allocation11 + $0x920] ss:$16 sps:$4 sm:$0xff]  }
 0x4ce   :  { %6999 = vmatpush1.bf16.msra.mxu1 %v12216_v10  ;;  %6894 = vmatprep.subr.bf16.mxu0 %v12221_v51  ;;  %v12294_v10 = vld [vmem:[#allocation11 + $0x928] ss:$16 sps:$4 sm:$0xff]   ;;  %v12299_v51 = vld [vmem:[#allocation11 + $0x944] ss:$16 sps:$4 sm:$0xff]  }
 0x4cf   :  { %7000 = vmatprep.subr.bf16.mxu1 %v12224_v44  ;;  %v12302_v44 = vld [vmem:[#allocation11 + $0x94c] ss:$16 sps:$4 sm:$0xff]  }
 0x4d1   :  { %6895 = vmatpush1.bf16.msra.mxu0 %v12219_v2  ;;  %v12297_v2 = vld [vmem:[#allocation11 + $0x940] ss:$16 sps:$4 sm:$0xff]  }
 0x4d2   :  { %7001 = vmatpush1.bf16.msra.mxu1 %v12222_v4  ;;  %6896 = vmatprep.subr.bf16.mxu0 %v12227_v36  ;;  %v12300_v4 = vld [vmem:[#allocation11 + $0x948] ss:$16 sps:$4 sm:$0xff]   ;;  %v12305_v36 = vld [vmem:[#allocation11 + $0x964] ss:$16 sps:$4 sm:$0xff]  }
 0x4d3   :  { %7002 = vmatprep.subr.bf16.mxu1 %v12230_v26  ;;  %v12308_v26 = vld [vmem:[#allocation11 + $0x96c] ss:$16 sps:$4 sm:$0xff]  }
 0x4d5   :  { %6897 = vmatpush1.bf16.msra.mxu0 %v12225_v63  ;;  %v12303_v63 = vld [vmem:[#allocation11 + $0x960] ss:$16 sps:$4 sm:$0xff]  }
 0x4d6   :  { %7003 = vmatpush1.bf16.msra.mxu1 %v12228_v43  ;;  %6898 = vmatprep.subr.bf16.mxu0 %v12233_v16  ;;  %v12306_v43 = vld [vmem:[#allocation11 + $0x968] ss:$16 sps:$4 sm:$0xff]   ;;  %v12311_v16 = vld [vmem:[#allocation11 + $0x984] ss:$16 sps:$4 sm:$0xff]  }
 0x4d7   :  { %7004 = vmatprep.subr.bf16.mxu1 %v12236_v22  ;;  %v12314_v22 = vld [vmem:[#allocation11 + $0x98c] ss:$16 sps:$4 sm:$0xff]  }
 0x4d9   :  { %6899 = vmatpush1.bf16.msra.mxu0 %v12231_v11  ;;  %v12309_v11 = vld [vmem:[#allocation11 + $0x980] ss:$16 sps:$4 sm:$0xff]  }
 0x4da   :  { %7005 = vmatpush1.bf16.msra.mxu1 %v12234_v32  ;;  %7804 = vmatprep.subr.bf16.mxu0 %v12239_v41  ;;  %v12312_v32 = vld [vmem:[#allocation11 + $0x988] ss:$16 sps:$4 sm:$0xff]   ;;  %v12317_v41 = vld [vmem:[#allocation11 + $0x9a4] ss:$16 sps:$4 sm:$0xff]  }
 0x4db   :  { %7910 = vmatprep.subr.bf16.mxu1 %v12242_v33  ;;  %v12320_v33 = vld [vmem:[#allocation11 + $0x9ac] ss:$16 sps:$4 sm:$0xff]  }
 0x4dc   :  { %6901 = vmatmul.mubr.bf16.vlgmr.msra.gmra.mrb[48].mxu0 %v5052_v23 }
 0x4dd   :  { %7007 = vmatmul.mubr.bf16.vlgmr.msra.gmra.mrb[48].mxu1 %v5052_v23  ;;  %6910 = vmatprep.mubr.bf16.mxu0 %v14016_v59  ;;  %v12315_v23 = vld [vmem:[#allocation11 + $0x9a0] ss:$16 sps:$4 sm:$0xff]  }
 0x4de   :  { %7016 = vmatprep.mubr.bf16.mxu1 %v14016_v59  ;;  %7805 = vmatpush1.bf16.msra.mxu0 %v12237_v46  ;;  %v12255_v59 = vld [vmem:[#allocation11 + $0x860] ss:$16 sps:$4 sm:$0xff]   ;;  %v12318_v46 = vld [vmem:[#allocation11 + $0x9a8] ss:$16 sps:$4 sm:$0xff]  }
 0x4df   :  { %7911 = vmatpush1.bf16.msra.mxu1 %v12240_v20  ;;  %7806 = vmatprep.subr.bf16.mxu0 %v12245_v7  ;;  %v12323_v20 = vld [vmem:[#allocation11 + $0x9c4] ss:$16 sps:$4 sm:$0xff]   ;;  %v12326_v7 = vld [vmem:[#allocation11 + $0x9cc] ss:$16 sps:$4 sm:$0xff]  }
 0x4e0   :  { %7912 = vmatprep.subr.bf16.mxu1 %v12248_v61  ;;  %v12321_v61 = vld [vmem:[#allocation11 + $0x9c0] ss:$16 sps:$4 sm:$0xff]  }
 0x4e2   :  { %7807 = vmatpush1.bf16.msra.mxu0 %v12243_v6  ;;  %v12324_v6 = vld [vmem:[#allocation11 + $0x9c8] ss:$16 sps:$4 sm:$0xff]  }
 0x4e3   :  { %7913 = vmatpush1.bf16.msra.mxu1 %v12246_v12  ;;  %7808 = vmatprep.subr.bf16.mxu0 %v12251_v49  ;;  %v12329_v12 = vld [vmem:[#allocation11 + $0x9e4] ss:$16 sps:$4 sm:$0xff]   ;;  %v12332_v49 = vld [vmem:[#allocation11 + $0x9ec] ss:$16 sps:$4 sm:$0xff]  }
 0x4e4   :  { %6911 = vmatmul.mubr.bf16.gmra.mrb[52].mxu0 %v14028_v28  ;;  %7914 = vmatprep.subr.bf16.mxu1 %v12254_v25  ;;  %v12327_v25 = vld [vmem:[#allocation11 + $0x9e0] ss:$16 sps:$4 sm:$0xff]  }
 0x4e5   :  { %7017 = vmatmul.mubr.bf16.gmra.mrb[52].mxu1 %v14028_v28  ;;  %7836 = vmatprep.mubr.bf16.mxu0 %v14035_v30  ;;  %v12272_v28 = vld [vmem:[#allocation11 + $0x8ac] ss:$16 sps:$4 sm:$0xff]  }
 0x4e6   :  { %7809 = vmatpush1.bf16.msra.mxu0 %v12249_v8  ;;  %7942 = vmatprep.mubr.bf16.mxu1 %v14035_v30  ;;  %v12270_v30 = vld [vmem:[#allocation11 + $0x8a8] ss:$16 sps:$4 sm:$0xff]  }
 0x4e7   :  { %7915 = vmatpush1.bf16.msra.mxu1 %v12252_v37  ;;  %7810 = vmatprep.subr.bf16.mxu0 %v12257_v3  ;;  %v12330_v8 = vld [vmem:[#allocation11 + $0x9e8] ss:$16 sps:$4 sm:$0xff]   ;;  %v12335_v37 = vld [vmem:[#allocation11 + $0xa04] ss:$16 sps:$4 sm:$0xff]   ;;  %v12338_v3 = vld [vmem:[#allocation11 + $0xa0c] ss:$16 sps:$4 sm:$0xff]  }
 0x4e8   :  { %7916 = vmatprep.subr.bf16.mxu1 %v12260_v53  ;;  %v12333_v53 = vld [vmem:[#allocation11 + $0xa00] ss:$16 sps:$4 sm:$0xff]  }
 0x4ea   :  { %7811 = vmatpush1.bf16.msra.mxu0 %v12255_v59  ;;  %v12336_v59 = vld [vmem:[#allocation11 + $0xa08] ss:$16 sps:$4 sm:$0xff]  }
 0x4eb   :  { %7917 = vmatpush1.bf16.msra.mxu1 %v12258_v27  ;;  %7812 = vmatprep.subr.bf16.mxu0 %v12263_v18  ;;  %v12341_v27 = vld [vmem:[#allocation11 + $0xa24] ss:$16 sps:$4 sm:$0xff]   ;;  %v12344_v18 = vld [vmem:[#allocation11 + $0xa2c] ss:$16 sps:$4 sm:$0xff]  }
 0x4ec   :  { %7918 = vmatprep.subr.bf16.mxu1 %v12266_v1  ;;  %v12339_v1 = vld [vmem:[#allocation11 + $0xa20] ss:$16 sps:$4 sm:$0xff]  }
 0x4ee   :  { %7813 = vmatpush1.bf16.msra.mxu0 %v12261_v0  ;;  %v12342_v0 = vld [vmem:[#allocation11 + $0xa28] ss:$16 sps:$4 sm:$0xff]  }
 0x4ef   :  { %7919 = vmatpush1.bf16.msra.mxu1 %v12264_v62  ;;  %7814 = vmatprep.subr.bf16.mxu0 %v12269_v29  ;;  %v12347_v62 = vld [vmem:[#allocation11 + $0xa44] ss:$16 sps:$4 sm:$0xff]   ;;  %v12350_v29 = vld [vmem:[#allocation11 + $0xa4c] ss:$16 sps:$4 sm:$0xff]  }
 0x4f0   :  { %7920 = vmatprep.subr.bf16.mxu1 %v12272_v28  ;;  %v12345_v28 = vld [vmem:[#allocation11 + $0xa40] ss:$16 sps:$4 sm:$0xff]  }
 0x4f2   :  { %7815 = vmatpush1.bf16.msra.mxu0 %v12267_v38  ;;  %v12348_v38 = vld [vmem:[#allocation11 + $0xa48] ss:$16 sps:$4 sm:$0xff]  }
 0x4f3   :  { %7921 = vmatpush1.bf16.msra.mxu1 %v12270_v30  ;;  %7816 = vmatprep.subr.bf16.mxu0 %v12275_v35  ;;  %v12353_v30 = vld [vmem:[#allocation11 + $0xa64] ss:$16 sps:$4 sm:$0xff]   ;;  %v12354_v35 = vld [vmem:[#allocation11 + $0xa68] ss:$16 sps:$4 sm:$0xff]  }
 0x4f4   :  { %7922 = vmatprep.subr.bf16.mxu1 %v12278_v19  ;;  %v12359_v19 = vld [vmem:[#allocation11 + $0xa84] ss:$16 sps:$4 sm:$0xff]  }
 0x4f6   :  { %7817 = vmatpush1.bf16.msra.mxu0 %v12273_v17  ;;  %v12362_v17 = vld [vmem:[#allocation11 + $0xa8c] ss:$16 sps:$4 sm:$0xff]  }
 0x4f7   :  { %7923 = vmatpush1.bf16.msra.mxu1 %v12276_v52  ;;  %7818 = vmatprep.subr.bf16.mxu0 %v12281_v40  ;;  %v12357_v52 = vld [vmem:[#allocation11 + $0xa80] ss:$16 sps:$4 sm:$0xff]   ;;  %v12360_v40 = vld [vmem:[#allocation11 + $0xa88] ss:$16 sps:$4 sm:$0xff]  }
 0x4f8   :  { %7924 = vmatprep.subr.bf16.mxu1 %v12284_v58  ;;  %v12365_v58 = vld [vmem:[#allocation11 + $0xaa4] ss:$16 sps:$4 sm:$0xff]  }
 0x4fa   :  { %7819 = vmatpush1.bf16.msra.mxu0 %v12279_v13  ;;  %v12363_v13 = vld [vmem:[#allocation11 + $0xaa0] ss:$16 sps:$4 sm:$0xff]  }
 0x4fb   :  { %7925 = vmatpush1.bf16.msra.mxu1 %v12282_v5  ;;  %7820 = vmatprep.subr.bf16.mxu0 %v12287_v31  ;;  %v12371_v5 = vld [vmem:[#allocation11 + $0xac4] ss:$16 sps:$4 sm:$0xff]   ;;  %v12374_v31 = vld [vmem:[#allocation11 + $0xacc] ss:$16 sps:$4 sm:$0xff]  }
 0x4fc   :  { %7926 = vmatprep.subr.bf16.mxu1 %v12290_v9  ;;  %v12369_v9 = vld [vmem:[#allocation11 + $0xac0] ss:$16 sps:$4 sm:$0xff]  }
 0x4fe   :  { %7821 = vmatpush1.bf16.msra.mxu0 %v12285_v57  ;;  %v12372_v57 = vld [vmem:[#allocation11 + $0xac8] ss:$16 sps:$4 sm:$0xff]  }
 0x4ff   :  { %7927 = vmatpush1.bf16.msra.mxu1 %v12288_v50  ;;  %7822 = vmatprep.subr.bf16.mxu0 %v12293_v14  ;;  %v12377_v50 = vld [vmem:[#allocation11 + $0xae4] ss:$16 sps:$4 sm:$0xff]   ;;  %v12380_v14 = vld [vmem:[#allocation11 + $0xaec] ss:$16 sps:$4 sm:$0xff]  }
 0x500   :  { %7928 = vmatprep.subr.bf16.mxu1 %v12296_v55  ;;  %v12375_v55 = vld [vmem:[#allocation11 + $0xae0] ss:$16 sps:$4 sm:$0xff]  }
 0x502   :  { %7823 = vmatpush1.bf16.msra.mxu0 %v12291_v56  ;;  %v12378_v56 = vld [vmem:[#allocation11 + $0xae8] ss:$16 sps:$4 sm:$0xff]  }
 0x503   :  { %7929 = vmatpush1.bf16.msra.mxu1 %v12294_v10  ;;  %7824 = vmatprep.subr.bf16.mxu0 %v12299_v51  ;;  %v12383_v10 = vld [vmem:[#allocation11 + $0xb04] ss:$16 sps:$4 sm:$0xff]   ;;  %v12386_v51 = vld [vmem:[#allocation11 + $0xb0c] ss:$16 sps:$4 sm:$0xff]  }
 0x504   :  { %7930 = vmatprep.subr.bf16.mxu1 %v12302_v44  ;;  %v12381_v44 = vld [vmem:[#allocation11 + $0xb00] ss:$16 sps:$4 sm:$0xff]  }
 0x506   :  { %7825 = vmatpush1.bf16.msra.mxu0 %v12297_v2  ;;  %v12384_v2 = vld [vmem:[#allocation11 + $0xb08] ss:$16 sps:$4 sm:$0xff]  }
 0x507   :  { %7931 = vmatpush1.bf16.msra.mxu1 %v12300_v4  ;;  %7826 = vmatprep.subr.bf16.mxu0 %v12305_v36  ;;  %v12389_v4 = vld [vmem:[#allocation11 + $0xb24] ss:$16 sps:$4 sm:$0xff]   ;;  %v12392_v36 = vld [vmem:[#allocation11 + $0xb2c] ss:$16 sps:$4 sm:$0xff]  }
 0x508   :  { %7932 = vmatprep.subr.bf16.mxu1 %v12308_v26  ;;  %v12387_v26 = vld [vmem:[#allocation11 + $0xb20] ss:$16 sps:$4 sm:$0xff]  }
 0x50a   :  { %7827 = vmatpush1.bf16.msra.mxu0 %v12303_v63  ;;  %v12390_v63 = vld [vmem:[#allocation11 + $0xb28] ss:$16 sps:$4 sm:$0xff]  }
 0x50b   :  { %7933 = vmatpush1.bf16.msra.mxu1 %v12306_v43  ;;  %7828 = vmatprep.subr.bf16.mxu0 %v12311_v16  ;;  %v12395_v43 = vld [vmem:[#allocation11 + $0xb44] ss:$16 sps:$4 sm:$0xff]   ;;  %v12398_v16 = vld [vmem:[#allocation11 + $0xb4c] ss:$16 sps:$4 sm:$0xff]  }
 0x50c   :  { %7934 = vmatprep.subr.bf16.mxu1 %v12314_v22  ;;  %v12393_v22 = vld [vmem:[#allocation11 + $0xb40] ss:$16 sps:$4 sm:$0xff]  }
 0x50e   :  { %7829 = vmatpush1.bf16.msra.mxu0 %v12309_v11  ;;  %v12396_v11 = vld [vmem:[#allocation11 + $0xb48] ss:$16 sps:$4 sm:$0xff]  }
 0x50f   :  { %7935 = vmatpush1.bf16.msra.mxu1 %v12312_v32  ;;  %7830 = vmatprep.subr.bf16.mxu0 %v12317_v41  ;;  %v12401_v32 = vld [vmem:[#allocation11 + $0xb64] ss:$16 sps:$4 sm:$0xff]   ;;  %v12404_v41 = vld [vmem:[#allocation11 + $0xb6c] ss:$16 sps:$4 sm:$0xff]  }
 0x510   :  { %7936 = vmatprep.subr.bf16.mxu1 %v12320_v33  ;;  %v12399_v33 = vld [vmem:[#allocation11 + $0xb60] ss:$16 sps:$4 sm:$0xff]  }
 0x512   :  { %7831 = vmatpush1.bf16.msra.mxu0 %v12315_v23  ;;  %v12402_v23 = vld [vmem:[#allocation11 + $0xb68] ss:$16 sps:$4 sm:$0xff]  }
 0x513   :  { %7937 = vmatpush1.bf16.msra.mxu1 %v12318_v46  ;;  %7832 = vmatprep.subr.bf16.mxu0 %v12323_v20  ;;  %v12407_v46 = vld [vmem:[#allocation11 + $0xb84] ss:$16 sps:$4 sm:$0xff]   ;;  %v12410_v20 = vld [vmem:[#allocation11 + $0xb8c] ss:$16 sps:$4 sm:$0xff]  }
 0x514   :  { %7938 = vmatprep.subr.bf16.mxu1 %v12326_v7  ;;  %v12405_v7 = vld [vmem:[#allocation11 + $0xb80] ss:$16 sps:$4 sm:$0xff]  }
 0x516   :  { %7833 = vmatpush1.bf16.msra.mxu0 %v12321_v61  ;;  %v12408_v61 = vld [vmem:[#allocation11 + $0xb88] ss:$16 sps:$4 sm:$0xff]  }
 0x517   :  { %7939 = vmatpush1.bf16.msra.mxu1 %v12324_v6  ;;  %7834 = vmatprep.subr.bf16.mxu0 %v12329_v12  ;;  %v12413_v6 = vld [vmem:[#allocation11 + $0xba4] ss:$16 sps:$4 sm:$0xff]   ;;  %v12416_v12 = vld [vmem:[#allocation11 + $0xbac] ss:$16 sps:$4 sm:$0xff]  }
 0x518   :  { %7940 = vmatprep.subr.bf16.mxu1 %v12332_v49  ;;  %v12411_v49 = vld [vmem:[#allocation11 + $0xba0] ss:$16 sps:$4 sm:$0xff]  }
 0x51a   :  { %7835 = vmatpush1.bf16.msra.mxu0 %v12327_v25  ;;  %v12414_v25 = vld [vmem:[#allocation11 + $0xba8] ss:$16 sps:$4 sm:$0xff]  }
 0x51b   :  { %7941 = vmatpush1.bf16.msra.mxu1 %v12330_v8  ;;  %7857 = vmatprep.subr.bf16.mxu0 %v12335_v37  ;;  %v12419_v8 = vld [vmem:[#allocation11 + $0xbc4] ss:$16 sps:$4 sm:$0xff]   ;;  %v12422_v37 = vld [vmem:[#allocation11 + $0xbcc] ss:$16 sps:$4 sm:$0xff]  }
 0x51c   :  { %7963 = vmatprep.subr.bf16.mxu1 %v12338_v3  ;;  %v12417_v3 = vld [vmem:[#allocation11 + $0xbc0] ss:$16 sps:$4 sm:$0xff]  }
 0x51d   :  { %7837 = vmatmul.mubr.bf16.vlgmr.msra.gmra.mrb[48].mxu0 %v13897_v48 }
 0x51e   :  { %7943 = vmatmul.mubr.bf16.vlgmr.msra.gmra.mrb[48].mxu1 %v13897_v48  ;;  %7846 = vmatprep.mubr.bf16.mxu0 %v14045_v54  ;;  %v12356_v48 = vld [vmem:[#allocation11 + $0xa6c] ss:$16 sps:$4 sm:$0xff]  }
 0x51f   :  { %7858 = vmatpush1.bf16.msra.mxu0 %v12333_v53  ;;  %7952 = vmatprep.mubr.bf16.mxu1 %v14045_v54  ;;  %v12351_v54 = vld [vmem:[#allocation11 + $0xa60] ss:$16 sps:$4 sm:$0xff]   ;;  %v12420_v53 = vld [vmem:[#allocation11 + $0xbc8] ss:$16 sps:$4 sm:$0xff]  }
 0x520   :  { %7964 = vmatpush1.bf16.msra.mxu1 %v12336_v59  ;;  %7859 = vmatprep.subr.bf16.mxu0 %v12341_v27  ;;  %v12425_v59 = vld [vmem:[#allocation11 + $0xbe4] ss:$16 sps:$4 sm:$0xff]   ;;  %v12428_v27 = vld [vmem:[#allocation11 + $0xbec] ss:$16 sps:$4 sm:$0xff]  }
 0x521   :  { %7965 = vmatprep.subr.bf16.mxu1 %v12344_v18  ;;  %v12423_v18 = vld [vmem:[#allocation11 + $0xbe0] ss:$16 sps:$4 sm:$0xff]  }
 0x523   :  { %7860 = vmatpush1.bf16.msra.mxu0 %v12339_v1  ;;  %v12426_v1 = vld [vmem:[#allocation11 + $0xbe8] ss:$16 sps:$4 sm:$0xff]  }
 0x524   :  { %7966 = vmatpush1.bf16.msra.mxu1 %v12342_v0  ;;  %7861 = vmatprep.subr.bf16.mxu0 %v12347_v62  ;;  %v12429_v0 = vld [vmem:[%s14562_s7 + $0x140] sm:$0xff]  }
 0x525   :  { %7847 = vmatmul.mubr.bf16.gmra.mrb[52].mxu0 %v14047_v60  ;;  %7967 = vmatprep.subr.bf16.mxu1 %v12350_v29  ;;  %v12430_v62 = vld [vmem:[%s14562_s7 + $0x1c0] sm:$0xff]  }
 0x526   :  { %7953 = vmatmul.mubr.bf16.gmra.mrb[52].mxu1 %v14047_v60  ;;  %7889 = vmatprep.mubr.bf16.mxu0 %v14042_v39  ;;  %v12368_v60 = vld [vmem:[#allocation11 + $0xaac] ss:$16 sps:$4 sm:$0xff]  }
 0x527   :  { %7862 = vmatpush1.bf16.msra.mxu0 %v12345_v28  ;;  %7995 = vmatprep.mubr.bf16.mxu1 %v14042_v39  ;;  %v12366_v39 = vld [vmem:[#allocation11 + $0xaa8] ss:$16 sps:$4 sm:$0xff]  }
 0x528   :  { %7968 = vmatpush1.bf16.msra.mxu1 %v12348_v38  ;;  %7863 = vmatprep.subr.bf16.mxu0 %v12353_v30  ;;  %v12431_v29 = vld [vmem:[%s14562_s7 + $0x100] sm:$0xff]   ;;  %v12433_v38 = vld [vmem:[%s14562_s7 + $0x148] sm:$0xff]  }
 0x529   :  { %7969 = vmatprep.subr.bf16.mxu1 %v12356_v48  ;;  %v12432_v28 = vld [vmem:[%s14562_s7 + $0x180] sm:$0xff]   ;;  %v12434_v30 = vld [vmem:[%s14562_s7 + $0x1c8] sm:$0xff]  }
 0x52a   :  { %v12435_v48 = vld [vmem:[%s14562_s7 + $0x108] sm:$0xff]  }
 0x52b   :  { %7864 = vmatpush1.bf16.msra.mxu0 %v12351_v54  ;;  %v12436_v54 = vld [vmem:[%s14562_s7 + $0x188] sm:$0xff]  }
 0x52c   :  { %7970 = vmatpush1.bf16.msra.mxu1 %v12354_v35  ;;  %7865 = vmatprep.subr.bf16.mxu0 %v12359_v19  ;;  %v12437_v35 = vld [vmem:[%s14562_s7 + $0x150] sm:$0xff]  }
 0x52d   :  { %7971 = vmatprep.subr.bf16.mxu1 %v12362_v17  ;;  %v12440_v19 = vld [vmem:[%s14562_s7 + $0x190] sm:$0xff]   ;;  %v12441_v17 = vld [vmem:[%s14562_s7 + $0x158] sm:$0xff]  }
 0x52f   :  { %7866 = vmatpush1.bf16.msra.mxu0 %v12357_v52  ;;  %v12442_v52 = vld [vmem:[%s14562_s7 + $0x1d8] sm:$0xff]  }
 0x530   :  { %7972 = vmatpush1.bf16.msra.mxu1 %v12360_v40  ;;  %7867 = vmatprep.subr.bf16.mxu0 %v12365_v58  ;;  %v12443_v40 = vld [vmem:[%s14562_s7 + $0x118] sm:$0xff]  }
 0x531   :  { %7973 = vmatprep.subr.bf16.mxu1 %v12368_v60  ;;  %v12444_v58 = vld [vmem:[%s14562_s7 + $0x198] sm:$0xff]   ;;  %v12445_v60 = vld [vmem:[%s14562_s7 + $0x160] sm:$0xff]  }
 0x533   :  { %7868 = vmatpush1.bf16.msra.mxu0 %v12363_v13  ;;  %v12447_v13 = vld [vmem:[%s14562_s7 + $0x120] sm:$0xff]  }
 0x534   :  { %7974 = vmatpush1.bf16.msra.mxu1 %v12366_v39  ;;  %7869 = vmatprep.subr.bf16.mxu0 %v12371_v5  ;;  %v12448_v39 = vld [vmem:[%s14562_s7 + $0x1a0] sm:$0xff]   ;;  %v12449_v5 = vld [vmem:[%s14562_s7 + $0x168] sm:$0xff]  }
 0x535   :  { %7975 = vmatprep.subr.bf16.mxu1 %v12374_v31  ;;  %v12450_v31 = vld [vmem:[%s14562_s7 + $0x1e8] sm:$0xff]  }
 0x537   :  { %7870 = vmatpush1.bf16.msra.mxu0 %v12369_v9  ;;  %v12451_v9 = vld [vmem:[%s14562_s7 + $0x128] sm:$0xff]  }
 0x538   :  { %7976 = vmatpush1.bf16.msra.mxu1 %v12372_v57  ;;  %7871 = vmatprep.subr.bf16.mxu0 %v12377_v50  ;;  %v12452_v57 = vld [vmem:[%s14562_s7 + $0x1a8] sm:$0xff]   ;;  %v12453_v50 = vld [vmem:[%s14562_s7 + $0x170] sm:$0xff]  }
 0x539   :  { %7977 = vmatprep.subr.bf16.mxu1 %v12380_v14  ;;  %v12454_v14 = vld [vmem:[%s14562_s7 + $0x1f0] sm:$0xff]  }
 0x53b   :  { %7872 = vmatpush1.bf16.msra.mxu0 %v12375_v55  ;;  %v12455_v55 = vld [vmem:[%s14562_s7 + $0x130] sm:$0xff]  }
 0x53c   :  { %7978 = vmatpush1.bf16.msra.mxu1 %v12378_v56  ;;  %7873 = vmatprep.subr.bf16.mxu0 %v12383_v10  ;;  %v12456_v56 = vld [vmem:[%s14562_s7 + $0x1b0] sm:$0xff]   ;;  %v12457_v10 = vld [vmem:[%s14562_s7 + $0x178] sm:$0xff]  }
 0x53d   :  { %7979 = vmatprep.subr.bf16.mxu1 %v12386_v51  ;;  %v12458_v51 = vld [vmem:[%s14562_s7 + $0x1f8] sm:$0xff]  }
 0x53f   :  { %7874 = vmatpush1.bf16.msra.mxu0 %v12381_v44  ;;  %v12459_v44 = vld [vmem:[%s14562_s7 + $0x138] sm:$0xff]  }
 0x540   :  { %7980 = vmatpush1.bf16.msra.mxu1 %v12384_v2  ;;  %7875 = vmatprep.subr.bf16.mxu0 %v12389_v4  ;;  %v12460_v2 = vld [vmem:[%s14562_s7 + $0x1b8] sm:$0xff]   ;;  %v12461_v4 = vld [vmem:[%s14562_s7 + $0x40] sm:$0xff]  }
 0x541   :  { %7981 = vmatprep.subr.bf16.mxu1 %v12392_v36  ;;  %v12462_v36 = vld [vmem:[%s14562_s7 + $0xc0] sm:$0xff]  }
 0x543   :  { %7876 = vmatpush1.bf16.msra.mxu0 %v12387_v26 }
 0x544   :  { %7982 = vmatpush1.bf16.msra.mxu1 %v12390_v63  ;;  %7877 = vmatprep.subr.bf16.mxu0 %v12395_v43 }
 0x545   :  { %7983 = vmatprep.subr.bf16.mxu1 %v12398_v16 }
 0x547   :  { %7878 = vmatpush1.bf16.msra.mxu0 %v12393_v22 }
 0x548   :  { %7984 = vmatpush1.bf16.msra.mxu1 %v12396_v11  ;;  %7879 = vmatprep.subr.bf16.mxu0 %v12401_v32  ;;  %v8032_v11 = vld [vmem:[#allocation12] sm:$0xf] }
 0x549   :  { %7985 = vmatprep.subr.bf16.mxu1 %v12404_v41 }
 0x54b   :  { %7880 = vmatpush1.bf16.msra.mxu0 %v12399_v33 }
 0x54c   :  { %7986 = vmatpush1.bf16.msra.mxu1 %v12402_v23  ;;  %7881 = vmatprep.subr.bf16.mxu0 %v12407_v46  ;;  %v14202_v23 = vrot.slane %v8032_v11, %v14660_v15  ;;  %v14205_v46 = vrot.slane %v8032_v11, %v14662_v24 }
 0x54d   :  { %7987 = vmatprep.subr.bf16.mxu1 %v12410_v20  ;;  %v14208_v20 = vrot.slane %v8032_v11, %v14663_v42 }
 0x54f   :  { %7882 = vmatpush1.bf16.msra.mxu0 %v12405_v7  ;;  %v14211_v7 = vrot.slane %v8032_v11, %v14661_v47  ;;  %v12479_v11 = vld [vmem:[%s14562_s7 + $0x20] sm:$0xff]  }
 0x550   :  { %7988 = vmatpush1.bf16.msra.mxu1 %v12408_v61  ;;  %7883 = vmatprep.subr.bf16.mxu0 %v12413_v6 }
 0x551   :  { %7989 = vmatprep.subr.bf16.mxu1 %v12416_v12 }
 0x553   :  { %7884 = vmatpush1.bf16.msra.mxu0 %v12411_v49 }
 0x554   :  { %7990 = vmatpush1.bf16.msra.mxu1 %v12414_v25  ;;  %7885 = vmatprep.subr.bf16.mxu0 %v12419_v8 }
 0x555   :  { %7991 = vmatprep.subr.bf16.mxu1 %v12422_v37 }
 0x557   :  { %7886 = vmatpush1.bf16.msra.mxu0 %v12417_v3 }
 0x558   :  { %7992 = vmatpush1.bf16.msra.mxu1 %v12420_v53  ;;  %7887 = vmatprep.subr.bf16.mxu0 %v12425_v59 }
 0x559   :  { %7993 = vmatprep.subr.bf16.mxu1 %v12428_v27 }
 0x55b   :  { %7888 = vmatpush1.bf16.msra.mxu0 %v12423_v18 }
 0x55c   :  { %7994 = vmatpush1.bf16.msra.mxu1 %v12426_v1  ;;  %10686 = vmatprep.subr.bf16.mxu0 %v12429_v0 }
 0x55d   :  { %10708 = vmatprep.subr.bf16.mxu1 %v12430_v62 }
 0x55e   :  { %7890 = vmatmul.mubr.bf16.vlgmr.msra.gmra.mrb[48].mxu0 %v14031_v34 }
 0x55f   :  { %7996 = vmatmul.mubr.bf16.vlgmr.msra.gmra.mrb[48].mxu1 %v14031_v34  ;;  %7899 = vmatprep.mubr.bf16.mxu0 %v14053_v21  ;;  %v12438_v34 = vld [vmem:[%s14562_s7 + $0x1d0] sm:$0xff]  }
 0x560   :  { %8005 = vmatprep.mubr.bf16.mxu1 %v14053_v21  ;;  %10687 = vmatpush3.bf16.msra.mxu0 %v12431_v29  ;;  %v12439_v21 = vld [vmem:[%s14562_s7 + $0x110] sm:$0xff]  }
 0x561   :  { %10709 = vmatpush3.bf16.msra.mxu1 %v12432_v28  ;;  %10688 = vmatprep.subr.bf16.mxu0 %v12433_v38 }
 0x562   :  { %10710 = vmatprep.subr.bf16.mxu1 %v12434_v30 }
 0x564   :  { %10689 = vmatpush3.bf16.msra.mxu0 %v12435_v48 }
 0x565   :  { %10711 = vmatpush3.bf16.msra.mxu1 %v12436_v54  ;;  %10690 = vmatprep.subr.bf16.mxu0 %v12437_v35 }
 0x566   :  { %7900 = vmatmul.mubr.bf16.gmra.mrb[52].mxu0 %v14055_v45  ;;  %10712 = vmatprep.subr.bf16.mxu1 %v12438_v34 }
 0x567   :  { %8006 = vmatmul.mubr.bf16.gmra.mrb[52].mxu1 %v14055_v45  ;;  %v12446_v45 = vld [vmem:[%s14562_s7 + $0x1e0] sm:$0xff]  }
 0x568   :  { %10691 = vmatpush3.bf16.msra.mxu0 %v12439_v21 }
 0x569   :  { %10713 = vmatpush3.bf16.msra.mxu1 %v12440_v19  ;;  %10692 = vmatprep.subr.bf16.mxu0 %v12441_v17 }
 0x56a   :  { %10714 = vmatprep.subr.bf16.mxu1 %v12442_v52 }
 0x56c   :  { %10693 = vmatpush3.bf16.msra.mxu0 %v12443_v40  ;;  %v12463_v40 = vld [vmem:[%s14562_s7] sm:$0xff]  }
 0x56d   :  { %10715 = vmatpush3.bf16.msra.mxu1 %v12444_v58  ;;  %10694 = vmatprep.subr.bf16.mxu0 %v12445_v60 }
 0x56e   :  { %10716 = vmatprep.subr.bf16.mxu1 %v12446_v45 }
 0x570   :  { %10695 = vmatpush3.bf16.msra.mxu0 %v12447_v13  ;;  %v12464_v13 = vld [vmem:[%s14562_s7 + $0x80] sm:$0xff]  }
 0x571   :  { %10717 = vmatpush3.bf16.msra.mxu1 %v12448_v39  ;;  %10696 = vmatprep.subr.bf16.mxu0 %v12449_v5 }
 0x572   :  { %10718 = vmatprep.subr.bf16.mxu1 %v12450_v31  ;;  %v12465_v31 = vld [vmem:[%s14562_s7 + $0x48] sm:$0xff]  }
 0x574   :  { %10697 = vmatpush3.bf16.msra.mxu0 %v12451_v9 }
 0x575   :  { %10719 = vmatpush3.bf16.msra.mxu1 %v12452_v57  ;;  %10698 = vmatprep.subr.bf16.mxu0 %v12453_v50  ;;  %v12466_v57 = vld [vmem:[%s14562_s7 + $0xc8] sm:$0xff]  }
 0x576   :  { %10720 = vmatprep.subr.bf16.mxu1 %v12454_v14  ;;  %v12467_v14 = vld [vmem:[%s14562_s7 + $0x8] sm:$0xff]  }
 0x578   :  { %10699 = vmatpush3.bf16.msra.mxu0 %v12455_v55  ;;  %v12468_v55 = vld [vmem:[%s14562_s7 + $0x88] sm:$0xff]  }
 0x579   :  { %10721 = vmatpush3.bf16.msra.mxu1 %v12456_v56  ;;  %10700 = vmatprep.subr.bf16.mxu0 %v12457_v10  ;;  %v12469_v56 = vld [vmem:[%s14562_s7 + $0x50] sm:$0xff]  }
 0x57a   :  { %10722 = vmatprep.subr.bf16.mxu1 %v12458_v51  ;;  %v12470_v10 = vld [vmem:[%s14562_s7 + $0xd0] sm:$0xff]  }
 0x57b   :  { %v12471_v51 = vld [vmem:[%s14562_s7 + $0x10] sm:$0xff]  }
 0x57c   :  { %10701 = vmatpush3.bf16.msra.mxu0 %v12459_v44  ;;  %v12472_v44 = vld [vmem:[%s14562_s7 + $0x90] sm:$0xff]  }
 0x57d   :  { %10723 = vmatpush3.bf16.msra.mxu1 %v12460_v2  ;;  %10730 = vmatprep.subr.bf16.mxu0 %v12461_v4  ;;  %v12473_v2 = vld [vmem:[%s14562_s7 + $0x58] sm:$0xff]  }
 0x57e   :  { %10752 = vmatprep.subr.bf16.mxu1 %v12462_v36  ;;  %v12474_v4 = vld [vmem:[%s14562_s7 + $0xd8] sm:$0xff]  }
 0x57f   :  { %v12475_v36 = vld [vmem:[%s14562_s7 + $0x18] sm:$0xff]  }
 0x631   :  { %v14197_v26 = vpop.f32.mrb[48].mxu0 }
 0x632   :  { %v14199_v63 = vpop.f32.mrb[48].mxu1  ;;  %v7893_v43 = vpop.f32.mrb[49].mxu0 }
 0x633   :  { %v7999_v16 = vpop.f32.mrb[49].mxu1  ;;  %v7895_v22 = vpop.f32.mrb[50].mxu0  ;;  %v8055_v24 = vadd.f32 %v14205_v46, %v7893_v43  ;;  %v12476_v43 = vld [vmem:[%s14562_s7 + $0x98] sm:$0xff]  }
 0x634   :  { %v8001_v32 = vpop.f32.mrb[50].mxu1  ;;  %v7897_v41 = vpop.f32.mrb[51].mxu0  ;;  %v8058_v61 = vadd.f32 %v14202_v23, %v7895_v22  ;;  %v8057_v53 = vadd.f32 %v14208_v20, %v7999_v16  ;;  %v12477_v16 = vld [vmem:[%s14562_s7 + $0x60] sm:$0xff]  }
 0x635   :  { %v8003_v33 = vpop.f32.mrb[51].mxu1  ;;  %v8059_v6 = vadd.f32 %v14205_v46, %v7897_v41  ;;  %v8060_v25 = vadd.f32 %v14211_v7, %v8001_v32  ;;  %vm8071_vm9 = vcmp.gt.f32.partialorder %v8055_v24, 0.0  ;;  %v8087_v28 = vmul.f32 0.2, %v8055_v24  ;;  %v12478_v22 = vld [vmem:[%s14562_s7 + $0xe0] sm:$0xff]   ;;  %v12481_v41 = vld [vmem:[%s14562_s7 + $0x68] sm:$0xff]  }
 0x636   :  { %v8061_v12 = vadd.f32 %v14208_v20, %v8003_v33  ;;  %v8090_v1 = vmul.f32 0.2, %v8058_v61  ;;  %vm8074_vm3 = vcmp.gt.f32.partialorder %v8058_v61, 0.0  ;;  %vm8073_vm11 = vcmp.gt.f32.partialorder %v8057_v53, 0.0  ;;  %v12480_v32 = vld [vmem:[%s14562_s7 + $0xa0] sm:$0xff]   ;;  %v12482_v33 = vld [vmem:[%s14562_s7 + $0xe8] sm:$0xff]  }
 0x637   :  { %v8091_v0 = vmul.f32 0.2, %v8059_v6  ;;  %v8092_v29 = vmul.f32 0.2, %v8060_v25  ;;  %vm8075_vm6 = vcmp.gt.f32.partialorder %v8059_v6, 0.0  ;;  %vm8076_vm10 = vcmp.gt.f32.partialorder %v8060_v25, 0.0 }
 0x638   :  { %v8093_v62 = vmul.f32 0.2, %v8061_v12  ;;  %vm8077_vm2 = vcmp.gt.f32.partialorder %v8061_v12, 0.0  ;;  %v8089_v30 = vmul.f32 0.2, %v8057_v53  ;;  %v8106_v35 = vsel %vm8074_vm3, %v8058_v61, %v8090_v1  ;;  %v12483_v61 = vld [vmem:[%s14562_s7 + $0x28] sm:$0xff]  }
 0x639   :  { %v7901_v49 = vpop.f32.mrb[52].mxu0  ;;  %v8107_v21 = vsel %vm8075_vm6, %v8059_v6, %v8091_v0  ;;  %v8108_v17 = vsel %vm8076_vm10, %v8060_v25, %v8092_v29  ;;  %v8103_v58 = vsel %vm8071_vm9, %v8055_v24, %v8087_v28  ;;  %v8186_v60 = vpack.c.bf16 %v8106_v35, %v8106_v35  ;;  %v12484_v6 = vld [vmem:[%s14562_s7 + $0xa8] sm:$0xff]   ;;  %v12486_v25 = vld [vmem:[%s14562_s7 + $0xf0] sm:$0xff]   ;;  %v12494_v0 = vld [vmem:[%s14562_s7 + $0x2c0] sm:$0xff]  }
 0x63a   :  { %v8007_v15 = vpop.f32.mrb[52].mxu1  ;;  %v14217_v8 = vpop.f32.mrb[53].mxu0  ;;  %v14221_v42 = vadd.f32 %v14202_v23, %v7901_v49  ;;  %v8109_v19 = vsel %vm8077_vm2, %v8061_v12, %v8093_v62  ;;  %v8187_v52 = vpack.c.bf16 %v8107_v21, %v8107_v21  ;;  %v8105_v39 = vsel %vm8073_vm11, %v8057_v53, %v8089_v30  ;;  %v12485_v12 = vld [vmem:[%s14562_s7 + $0x70] sm:$0xff]   ;;  %v12495_v29 = vld [vmem:[%s14562_s7 + $0x200] sm:$0xff]  }
 0x63b   :  { %v14224_v47 = vadd.f32 %v14211_v7, %v8007_v15  ;;  %v14226_v37 = vpop.f32.mrb[53].mxu1  ;;  %v7905_v3 = vpop.f32.mrb[54].mxu0  ;;  %v8189_v45 = vpack.c.bf16 %v8109_v19, %v8109_v19  ;;  %v8188_v5 = vpack.c.bf16 %v8108_v17, %v8108_v17  ;;  %v8119_v9 = vpack.c.bf16 %v8103_v58, %v8103_v58  ;;  %v12496_v30 = vld [vmem:[%s14562_s7 + $0x280] sm:$0xff]   ;;  %v12497_v19 = vld [vmem:[%s14562_s7 + $0x248] sm:$0xff]  }
 0x63c   :  { %v14230_v59 = vadd.f32 %v14202_v23, %v7905_v3  ;;  %v8011_v27 = vpop.f32.mrb[54].mxu1  ;;  %v7907_v18 = vpop.f32.mrb[55].mxu0  ;;  %8479 = vmatprep.mubr.bf16.mxu0 %v8187_v52  ;;  %v8121_v50 = vpack.c.bf16 %v8105_v39, %v8105_v39  ;;  %v8054_v49 = vadd.f32 %v14202_v23, %v14197_v26  ;;  %v8056_v15 = vadd.f32 %v14211_v7, %v14199_v63  ;;  %v12487_v3 = vld [vmem:[%s14562_s7 + $0x30] sm:$0xff]   ;;  %v12489_v63 = vld [vmem:[%s14562_s7 + $0x78] sm:$0xff]   ;;  %v12498_v52 = vld [vmem:[%s14562_s7 + $0x2c8] sm:$0xff]  }
 0x63d   :  { %v8013_v38 = vpop.f32.mrb[55].mxu1  ;;  %v14233_v48 = vadd.f32 %v14211_v7, %v8011_v27  ;;  %v14236_v54 = vadd.f32 %v14205_v46, %v7907_v18  ;;  %8519 = vmatprep.mubr.bf16.mxu1 %v8189_v45  ;;  %8480 = vmatmul.mubr.bf16.vlgmr.msra.gmra.mrb[56].mxu0 %v8186_v60  ;;  %v8063_v24 = vadd.f32 %v14205_v46, %v14217_v8  ;;  %v12488_v26 = vld [vmem:[%s14562_s7 + $0xb0] sm:$0xff]   ;;  %v12490_v46 = vld [vmem:[%s14562_s7 + $0xf8] sm:$0xff]   ;;  %v12493_v18 = vld [vmem:[%s14562_s7 + $0x240] sm:$0xff]   ;;  %vm8078_vm5 = vcmp.gt.f32.partialorder %v14221_v42, 0.0 }
 0x63e   :  { %v14239_v34 = vadd.f32 %v14208_v20, %v8013_v38  ;;  %8520 = vmatmul.mubr.bf16.vlgmr.msra.gmra.mrb[56].mxu1 %v8188_v5  ;;  %10731 = vmatpush3.bf16.msra.mxu0 %v12463_v40  ;;  %v8065_v53 = vadd.f32 %v14208_v20, %v14226_v37  ;;  %v8086_v23 = vmul.f32 0.2, %v8054_v49  ;;  %vm8070_vm12 = vcmp.gt.f32.partialorder %v8054_v49, 0.0  ;;  %v12491_v8 = vld [vmem:[%s14562_s7 + $0x38] sm:$0xff]   ;;  %v12499_v58 = vld [vmem:[%s14562_s7 + $0x208] sm:$0xff]   ;;  %v12501_v45 = vld [vmem:[%s14562_s7 + $0x250] sm:$0xff]  }
 0x63f   :  { %10753 = vmatpush3.bf16.msra.mxu1 %v12464_v13  ;;  %8751 = vmatprep.mubr.bf16.mxu0 %v8119_v9  ;;  %v8088_v7 = vmul.f32 0.2, %v8056_v15  ;;  %vm8072_vm1 = vcmp.gt.f32.partialorder %v8056_v15, 0.0  ;;  %v8095_v20 = vmul.f32 0.2, %v8063_v24  ;;  %vm8079_vm15 = vcmp.gt.f32.partialorder %v8063_v24, 0.0 }
 0x640   :  { %8791 = vmatprep.mubr.bf16.mxu1 %v8121_v50  ;;  %10732 = vmatprep.subr.bf16.mxu0 %v12465_v31  ;;  %v8097_v37 = vmul.f32 0.2, %v8065_v53  ;;  %v12492_v27 = vld [vmem:[%s14562_s7 + $0xb8] sm:$0xff]   ;;  %v8102_v1 = vsel %vm8070_vm12, %v8054_v49, %v8086_v23  ;;  %vm8081_vm0 = vcmp.gt.f32.partialorder %v8065_v53, 0.0  ;;  %v12500_v60 = vld [vmem:[%s14562_s7 + $0x288] sm:$0xff]   ;;  %v12502_v13 = vld [vmem:[%s14562_s7 + $0x2d0] sm:$0xff]  }
 0x641   :  { %10754 = vmatprep.subr.bf16.mxu1 %v12466_v57  ;;  %v8104_v62 = vsel %vm8072_vm1, %v8056_v15, %v8088_v7  ;;  %v8111_v28 = vsel %vm8079_vm15, %v8063_v24, %v8095_v20  ;;  %v8118_v38 = vpack.c.bf16 %v8102_v1, %v8102_v1  ;;  %v12503_v39 = vld [vmem:[%s14562_s7 + $0x210] sm:$0xff]   ;;  %v12505_v31 = vld [vmem:[%s14562_s7 + $0x258] sm:$0xff]   ;;  %vm8080_vm14 = vcmp.gt.f32.partialorder %v14224_v47, 0.0  ;;  %v12526_v24 = vld [vmem:[%s14562_s7 + $0x3c0] sm:$0xff]  }
 0x642   :  { %10733 = vmatpush3.bf16.msra.mxu0 %v12467_v14  ;;  %v8113_v35 = vsel %vm8081_vm0, %v8065_v53, %v8097_v37  ;;  %v8120_v21 = vpack.c.bf16 %v8104_v62, %v8104_v62  ;;  %v8800_v17 = vpack.c.bf16 %v8111_v28, %v8111_v28  ;;  %v12504_v5 = vld [vmem:[%s14562_s7 + $0x290] sm:$0xff]   ;;  %v12506_v9 = vld [vmem:[%s14562_s7 + $0x2d8] sm:$0xff]   ;;  %v12509_v14 = vld [vmem:[%s14562_s7 + $0x260] sm:$0xff]   ;;  %vm8083_vm13 = vcmp.gt.f32.partialorder %v14236_v54, 0.0 }
 0x643   :  { %10755 = vmatpush3.bf16.msra.mxu1 %v12468_v55  ;;  %10734 = vmatprep.subr.bf16.mxu0 %v12469_v56  ;;  %v8802_v40 = vpack.c.bf16 %v8113_v35, %v8113_v35  ;;  %v12507_v57 = vld [vmem:[%s14562_s7 + $0x218] sm:$0xff]   ;;  %v12510_v55 = vld [vmem:[%s14562_s7 + $0x2e0] sm:$0xff]   ;;  %vm8085_vm7 = vcmp.gt.f32.partialorder %v14239_v34, 0.0  ;;  %v12533_v37 = vld [vmem:[%s14562_s7 + $0x350] sm:$0xff]   ;;  %vm8082_vm4 = vcmp.gt.f32.partialorder %v14230_v59, 0.0  ;;  %vm8084_vm8 = vcmp.gt.f32.partialorder %v14233_v48, 0.0 }
 0x644   :  { %10756 = vmatprep.subr.bf16.mxu1 %v12470_v10  ;;  %v12508_v50 = vld [vmem:[%s14562_s7 + $0x298] sm:$0xff]   ;;  %v12511_v56 = vld [vmem:[%s14562_s7 + $0x220] sm:$0xff]   ;;  %v12536_v1 = vld [vmem:[%s14562_s7 + $0x390] sm:$0xff]   ;;  %vm9491_vm3 = vcmask 80896   ;;  %vm9511_vm6 = vcmask 7168  }
 0x645   :  { %v12512_v10 = vld [vmem:[%s14562_s7 + $0x2a0] sm:$0xff]   ;;  %v12524_v49 = vld [vmem:[%s14562_s7 + $0x2b8] sm:$0xff]  }
 0x646   :  { %10735 = vmatpush3.bf16.msra.mxu0 %v12471_v51  ;;  %v12513_v51 = vld [vmem:[%s14562_s7 + $0x268] sm:$0xff]   ;;  %v12527_v53 = vld [vmem:[%s14562_s7 + $0x300] sm:$0xff]   ;;  %v12538_v62 = vld [vmem:[%s14562_s7 + $0x3d8] sm:$0xff]  }
 0x647   :  { %10757 = vmatpush3.bf16.msra.mxu1 %v12472_v44  ;;  %10736 = vmatprep.subr.bf16.mxu0 %v12473_v2  ;;  %v12514_v44 = vld [vmem:[%s14562_s7 + $0x2e8] sm:$0xff]   ;;  %v12540_v28 = vld [vmem:[%s14562_s7 + $0x398] sm:$0xff]   ;;  %v12543_v35 = vld [vmem:[%s14562_s7 + $0x320] sm:$0xff]  }
 0x648   :  { %10758 = vmatprep.subr.bf16.mxu1 %v12474_v4  ;;  %v12515_v2 = vld [vmem:[%s14562_s7 + $0x228] sm:$0xff]  }
 0x649   :  { %v12516_v4 = vld [vmem:[%s14562_s7 + $0x2a8] sm:$0xff]  }
 0x64a   :  { %10737 = vmatpush3.bf16.msra.mxu0 %v12475_v36  ;;  %v12517_v36 = vld [vmem:[%s14562_s7 + $0x270] sm:$0xff]  }
 0x64b   :  { %10759 = vmatpush3.bf16.msra.mxu1 %v12476_v43  ;;  %10738 = vmatprep.subr.bf16.mxu0 %v12477_v16  ;;  %v12518_v43 = vld [vmem:[%s14562_s7 + $0x2f0] sm:$0xff]  }
 0x64c   :  { %10760 = vmatprep.subr.bf16.mxu1 %v12478_v22  ;;  %v12519_v16 = vld [vmem:[%s14562_s7 + $0x230] sm:$0xff]  }
 0x64d   :  { %v12520_v22 = vld [vmem:[%s14562_s7 + $0x2b0] sm:$0xff]  }
 0x64e   :  { %10739 = vmatpush3.bf16.msra.mxu0 %v12479_v11  ;;  %v12521_v11 = vld [vmem:[%s14562_s7 + $0x278] sm:$0xff]  }
 0x64f   :  { %10761 = vmatpush3.bf16.msra.mxu1 %v12480_v32  ;;  %10740 = vmatprep.subr.bf16.mxu0 %v12481_v41  ;;  %v8094_v32 = vmul.f32 0.2, %v14221_v42  ;;  %v12522_v41 = vld [vmem:[%s14562_s7 + $0x2f8] sm:$0xff]  }
 0x650   :  { %10762 = vmatprep.subr.bf16.mxu1 %v12482_v33  ;;  %v8096_v33 = vmul.f32 0.2, %v14224_v47 }
 0x651   :  { %v8110_v15 = vsel %vm8078_vm5, %v14221_v42, %v8094_v32  ;;  %v12528_v42 = vld [vmem:[%s14562_s7 + $0x380] sm:$0xff]  }
 0x652   :  { %10741 = vmatpush3.bf16.msra.mxu0 %v12483_v61  ;;  %v8099_v61 = vmul.f32 0.2, %v14236_v54 }
 0x653   :  { %10763 = vmatpush3.bf16.msra.mxu1 %v12484_v6  ;;  %10742 = vmatprep.subr.bf16.mxu0 %v12485_v12  ;;  %v12523_v6 = vld [vmem:[%s14562_s7 + $0x238] sm:$0xff]   ;;  %v8101_v12 = vmul.f32 0.2, %v14239_v34 }
 0x654   :  { %10764 = vmatprep.subr.bf16.mxu1 %v12486_v25  ;;  %v12525_v25 = vld [vmem:[%s14562_s7 + $0x340] sm:$0xff]  }
 0x655   :  { %v8117_v23 = vsel %vm8085_vm7, %v14239_v34, %v8101_v12  ;;  %v12532_v34 = vld [vmem:[%s14562_s7 + $0x388] sm:$0xff]  }
 0x656   :  { %10743 = vmatpush3.bf16.msra.mxu0 %v12487_v3  ;;  %v8112_v3 = vsel %vm8080_vm14, %v14224_v47, %v8096_v33  ;;  %v12529_v47 = vld [vmem:[%s14562_s7 + $0x348] sm:$0xff]   ;;  %v9144_v20 = vpack.c.bf16 %v8117_v23, %v8117_v23 }
 0x657   :  { %10765 = vmatpush3.bf16.msra.mxu1 %v12488_v26  ;;  %10744 = vmatprep.subr.bf16.mxu0 %v12489_v63  ;;  %v8115_v26 = vsel %vm8083_vm13, %v14236_v54, %v8099_v61  ;;  %v8799_v63 = vpack.c.bf16 %v8110_v15, %v8110_v15  ;;  %v12530_v54 = vld [vmem:[%s14562_s7 + $0x3c8] sm:$0xff]  }
 0x658   :  { %10766 = vmatprep.subr.bf16.mxu1 %v12490_v46  ;;  %v8801_v46 = vpack.c.bf16 %v8112_v3, %v8112_v3  ;;  %v9142_v7 = vpack.c.bf16 %v8115_v26, %v8115_v26 }
 0x65a   :  { %10745 = vmatpush3.bf16.msra.mxu0 %v12491_v8  ;;  %v12531_v8 = vld [vmem:[%s14562_s7 + $0x308] sm:$0xff]  }
 0x65b   :  { %10767 = vmatpush3.bf16.msra.mxu1 %v12492_v27  ;;  %10774 = vmatprep.subr.bf16.mxu0 %v12493_v18  ;;  %v12534_v27 = vld [vmem:[%s14562_s7 + $0x3d0] sm:$0xff]  }
 0x65c   :  { %10796 = vmatprep.subr.bf16.mxu1 %v12494_v0  ;;  %v12535_v18 = vld [vmem:[%s14562_s7 + $0x310] sm:$0xff]   ;;  %v12537_v0 = vld [vmem:[%s14562_s7 + $0x358] sm:$0xff]  }
 0x65d   :  { %8752 = vmatmul.mubr.bf16.vlgmr.msra.gmra.mrb[60].mxu0 %v8118_v38  ;;  %v12541_v38 = vld [vmem:[%s14562_s7 + $0x360] sm:$0xff]  }
 0x65e   :  { %8792 = vmatmul.mubr.bf16.vlgmr.msra.gmra.mrb[60].mxu1 %v8120_v21  ;;  %10775 = vmatpush3.bf16.msra.mxu0 %v12495_v29  ;;  %v12539_v29 = vld [vmem:[%s14562_s7 + $0x318] sm:$0xff]   ;;  %v12544_v21 = vld [vmem:[%s14562_s7 + $0x3a0] sm:$0xff]  }
 0x65f   :  { %9092 = vmatprep.mubr.bf16.mxu0 %v8800_v17  ;;  %10797 = vmatpush3.bf16.msra.mxu1 %v12496_v30  ;;  %v12542_v30 = vld [vmem:[%s14562_s7 + $0x3e0] sm:$0xff]   ;;  %v12546_v17 = vld [vmem:[%s14562_s7 + $0x3e8] sm:$0xff]  }
 0x660   :  { %9132 = vmatprep.mubr.bf16.mxu1 %v8802_v40  ;;  %10776 = vmatprep.subr.bf16.mxu0 %v12497_v19  ;;  %v12545_v19 = vld [vmem:[%s14562_s7 + $0x368] sm:$0xff]  }
 0x661   :  { %10798 = vmatprep.subr.bf16.mxu1 %v12498_v52  ;;  %v12547_v52 = vld [vmem:[%s14562_s7 + $0x328] sm:$0xff]  }
 0x662   :  { %10777 = vmatpush3.bf16.msra.mxu0 %v12499_v58  ;;  %v12548_v40 = vld [vmem:[%s14562_s7 + $0x3a8] sm:$0xff]   ;;  %v12549_v58 = vld [vmem:[%s14562_s7 + $0x370] sm:$0xff]  }
 0x663   :  { %10799 = vmatpush3.bf16.msra.mxu1 %v12500_v60  ;;  %10778 = vmatprep.subr.bf16.mxu0 %v12501_v45  ;;  %v12550_v60 = vld [vmem:[%s14562_s7 + $0x3f0] sm:$0xff]  }
 0x664   :  { %10800 = vmatprep.subr.bf16.mxu1 %v12502_v13  ;;  %v12551_v45 = vld [vmem:[%s14562_s7 + $0x330] sm:$0xff]  }
 0x665   :  { %v12552_v13 = vld [vmem:[%s14562_s7 + $0x3b0] sm:$0xff]  }
 0x666   :  { %10779 = vmatpush3.bf16.msra.mxu0 %v12503_v39  ;;  %v12553_v39 = vld [vmem:[%s14562_s7 + $0x378] sm:$0xff]  }
 0x667   :  { %10801 = vmatpush3.bf16.msra.mxu1 %v12504_v5  ;;  %10780 = vmatprep.subr.bf16.mxu0 %v12505_v31  ;;  %v8098_v5 = vmul.f32 0.2, %v14230_v59  ;;  %v12554_v31 = vld [vmem:[%s14562_s7 + $0x3f8] sm:$0xff]  }
 0x668   :  { %10802 = vmatprep.subr.bf16.mxu1 %v12506_v9  ;;  %v8100_v9 = vmul.f32 0.2, %v14233_v48 }
 0x66a   :  { %10781 = vmatpush3.bf16.msra.mxu0 %v12507_v57  ;;  %v12555_v57 = vld [vmem:[%s14562_s7 + $0x338] sm:$0xff]  }
 0x66b   :  { %10803 = vmatpush3.bf16.msra.mxu1 %v12508_v50  ;;  %10782 = vmatprep.subr.bf16.mxu0 %v12509_v14  ;;  %v12556_v50 = vld [vmem:[%s14562_s7 + $0x3b8] sm:$0xff]   ;;  %v8114_v14 = vsel %vm8082_vm4, %v14230_v59, %v8098_v5 }
 0x66c   :  { %10804 = vmatprep.subr.bf16.mxu1 %v12510_v55  ;;  %v8116_v55 = vsel %vm8084_vm8, %v14233_v48, %v8100_v9 }
 0x66e   :  { %10783 = vmatpush3.bf16.msra.mxu0 %v12511_v56  ;;  %v9141_v56 = vpack.c.bf16 %v8114_v14, %v8114_v14 }
 0x66f   :  { %10805 = vmatpush3.bf16.msra.mxu1 %v12512_v10  ;;  %10784 = vmatprep.subr.bf16.mxu0 %v12513_v51  ;;  %v9143_v10 = vpack.c.bf16 %v8116_v55, %v8116_v55 }
 0x670   :  { %10806 = vmatprep.subr.bf16.mxu1 %v12514_v44 }
 0x672   :  { %10785 = vmatpush3.bf16.msra.mxu0 %v12515_v2 }
 0x673   :  { %10807 = vmatpush3.bf16.msra.mxu1 %v12516_v4  ;;  %10786 = vmatprep.subr.bf16.mxu0 %v12517_v36 }
 0x674   :  { %10808 = vmatprep.subr.bf16.mxu1 %v12518_v43 }
 0x676   :  { %10787 = vmatpush3.bf16.msra.mxu0 %v12519_v16 }
 0x677   :  { %10809 = vmatpush3.bf16.msra.mxu1 %v12520_v22  ;;  %10788 = vmatprep.subr.bf16.mxu0 %v12521_v11 }
 0x678   :  { %10810 = vmatprep.subr.bf16.mxu1 %v12522_v41 }
 0x67a   :  { %10789 = vmatpush3.bf16.msra.mxu0 %v12523_v6 }
 0x67b   :  { %10811 = vmatpush3.bf16.msra.mxu1 %v12524_v49  ;;  %10818 = vmatprep.subr.bf16.mxu0 %v12525_v25 }
 0x67c   :  { %10840 = vmatprep.subr.bf16.mxu1 %v12526_v24 }
 0x67d   :  { %9093 = vmatmul.mubr.bf16.vlgmr.msra.gmra.mrb[64].mxu0 %v8799_v63 }
 0x67e   :  { %9133 = vmatmul.mubr.bf16.vlgmr.msra.gmra.mrb[64].mxu1 %v8801_v46  ;;  %10819 = vmatpush3.bf16.msra.mxu0 %v12527_v53 }
 0x67f   :  { %9434 = vmatprep.mubr.bf16.mxu0 %v9142_v7  ;;  %10841 = vmatpush3.bf16.msra.mxu1 %v12528_v42 }
 0x680   :  { %9474 = vmatprep.mubr.bf16.mxu1 %v9144_v20  ;;  %10820 = vmatprep.subr.bf16.mxu0 %v12529_v47 }
 0x681   :  { %10842 = vmatprep.subr.bf16.mxu1 %v12530_v54 }
 0x682   :  { %10821 = vmatpush3.bf16.msra.mxu0 %v12531_v8 }
 0x683   :  { %10843 = vmatpush3.bf16.msra.mxu1 %v12532_v34  ;;  %10822 = vmatprep.subr.bf16.mxu0 %v12533_v37 }
 0x684   :  { %10844 = vmatprep.subr.bf16.mxu1 %v12534_v27 }
 0x686   :  { %10823 = vmatpush3.bf16.msra.mxu0 %v12535_v18 }
 0x687   :  { %10845 = vmatpush3.bf16.msra.mxu1 %v12536_v1  ;;  %10824 = vmatprep.subr.bf16.mxu0 %v12537_v0 }
 0x688   :  { %10846 = vmatprep.subr.bf16.mxu1 %v12538_v62 }
 0x68a   :  { %10825 = vmatpush3.bf16.msra.mxu0 %v12539_v29 }
 0x68b   :  { %10847 = vmatpush3.bf16.msra.mxu1 %v12540_v28  ;;  %10826 = vmatprep.subr.bf16.mxu0 %v12541_v38 }
 0x68c   :  { %10848 = vmatprep.subr.bf16.mxu1 %v12542_v30 }
 0x68e   :  { %10827 = vmatpush3.bf16.msra.mxu0 %v12543_v35 }
 0x68f   :  { %10849 = vmatpush3.bf16.msra.mxu1 %v12544_v21  ;;  %10828 = vmatprep.subr.bf16.mxu0 %v12545_v19  ;;  %v10685_v19 = vld [vmem:[#allocation14] ss:$0 sm:$0xff] }
 0x690   :  { %10850 = vmatprep.subr.bf16.mxu1 %v12546_v17 }
 0x692   :  { %10829 = vmatpush3.bf16.msra.mxu0 %v12547_v52 }
 0x693   :  { %10851 = vmatpush3.bf16.msra.mxu1 %v12548_v40  ;;  %10830 = vmatprep.subr.bf16.mxu0 %v12549_v58 }
 0x694   :  { %10852 = vmatprep.subr.bf16.mxu1 %v12550_v60 }
 0x696   :  { %10831 = vmatpush3.bf16.msra.mxu0 %v12551_v45 }
 0x697   :  { %10853 = vmatpush3.bf16.msra.mxu1 %v12552_v13  ;;  %10832 = vmatprep.subr.bf16.mxu0 %v12553_v39 }
 0x698   :  { %10854 = vmatprep.subr.bf16.mxu1 %v12554_v31 }
 0x69a   :  { %10833 = vmatpush3.bf16.msra.mxu0 %v12555_v57 }
 0x69b   :  { %10855 = vmatpush3.bf16.msra.mxu1 %v12556_v50 }
 0x69d   :  { %9435 = vmatmul.mubr.bf16.vlgmr.msra.gmra.mrb[68].mxu0 %v9141_v56 }
 0x69e   :  { %9475 = vmatmul.mubr.bf16.vlgmr.msra.gmra.mrb[68].mxu1 %v9143_v10 }
 0x710   :  { %v10702_v51 = vpop.f32.mrb[56].mxu0 }
 0x711   :  { %v10724_v44 = vpop.f32.mrb[56].mxu1  ;;  %v10703_v2 = vpop.f32.mrb[57].mxu0 }
 0x712   :  { %v10704_v4 = vadd.f32 %v10703_v2, %v10702_v51  ;;  %v10725_v36 = vpop.f32.mrb[57].mxu1  ;;  %v10705_v43 = vpop.f32.mrb[58].mxu0 }
 0x713   :  { %v10726_v16 = vadd.f32 %v10725_v36, %v10724_v44  ;;  %v10727_v22 = vpop.f32.mrb[58].mxu1  ;;  %v10706_v11 = vpop.f32.mrb[59].mxu0 }
 0x714   :  { %v10728_v32 = vpop.f32.mrb[59].mxu1 }
 0x715   :  { %v8522_v59 = vadd.f32 %v10726_v16, %v10704_v4 }
 0x730   :  { %v10746_v41 = vpop.f32.mrb[60].mxu0 }
 0x731   :  { %v10768_v33 = vpop.f32.mrb[60].mxu1  ;;  %v10747_v48 = vpop.f32.mrb[61].mxu0 }
 0x732   :  { %v10748_v61 = vadd.f32 %v10747_v48, %v10746_v41  ;;  %v10769_v6 = vpop.f32.mrb[61].mxu1  ;;  %v10749_v12 = vpop.f32.mrb[62].mxu0 }
 0x733   :  { %v10770_v49 = vadd.f32 %v10769_v6, %v10768_v33  ;;  %v10771_v25 = vpop.f32.mrb[62].mxu1  ;;  %v10750_v15 = vpop.f32.mrb[63].mxu0 }
 0x734   :  { %v8754_v24 = vadd.f32 %v10748_v61, %v8522_v59  ;;  %v10772_v3 = vpop.f32.mrb[63].mxu1 }
 0x736   :  { %v8794_v53 = vadd.f32 %v10770_v49, %v8754_v24 }
 0x750   :  { %v10790_v26 = vpop.f32.mrb[64].mxu0 }
 0x751   :  { %v10812_v63 = vpop.f32.mrb[64].mxu1  ;;  %v10791_v42 = vpop.f32.mrb[65].mxu0 }
 0x752   :  { %v10792_v23 = vadd.f32 %v10791_v42, %v10790_v26  ;;  %v10813_v46 = vpop.f32.mrb[65].mxu1  ;;  %v10793_v47 = vpop.f32.mrb[66].mxu0 }
 0x753   :  { %v10814_v7 = vadd.f32 %v10813_v46, %v10812_v63  ;;  %v10815_v54 = vpop.f32.mrb[66].mxu1  ;;  %v10794_v20 = vpop.f32.mrb[67].mxu0 }
 0x754   :  { %v10816_v8 = vpop.f32.mrb[67].mxu1 }
 0x755   :  { %v9135_v34 = vadd.f32 %v10814_v7, %v10792_v23 }
 0x757   :  { %v9140_v37 = vadd.f32 %v9135_v34, %v8794_v53 }
 0x770   :  { %v10834_v27 = vpop.f32.mrb[68].mxu0 }
 0x771   :  { %v10856_v18 = vpop.f32.mrb[68].mxu1  ;;  %v10835_v1 = vpop.f32.mrb[69].mxu0 }
 0x772   :  { %v10836_v0 = vadd.f32 %v10835_v1, %v10834_v27  ;;  %v10857_v62 = vpop.f32.mrb[69].mxu1  ;;  %v10837_v29 = vpop.f32.mrb[70].mxu0 }
 0x773   :  { %v10858_v28 = vadd.f32 %v10857_v62, %v10856_v18  ;;  %v10859_v38 = vpop.f32.mrb[70].mxu1  ;;  %v10838_v30 = vpop.f32.mrb[71].mxu0 }
 0x774   :  { %v10860_v35 = vpop.f32.mrb[71].mxu1 }
 0x775   :  { %v9477_v21 = vadd.f32 %v10858_v28, %v10836_v0 }
 0x777   :  { %v9482_v17 = vadd.f32 %v9477_v21, %v9140_v37 }
 0x779   :  { %v9490_v52 = vadd.f32 %v10685_v19, %v9482_v17 }
 0x77b   :  { %v9493_v40 = vsel %vm9491_vm3, %v9490_v52, -inf  ;;  %9492 = vst.msk [vmem:[%s14564_s9] sm:$0xff] %vm9491_vm3, %v9490_v52 }
 0x77c   :  { %9494 = vmax.xlane.f32.xlu0 %v9493_v40 }
 0x809   :  { %v9495_v58 = vpop.xlane.xlu0 %9494 }
 0x80a   :  { %v9496_v60 = vsub.f32 %v9490_v52, %v9495_v58 }
 0x80c   :  { %v9497_v45 = vmul.f32 1.442695, %v9496_v60 }
 0x80e   :  { %12557 = vpow2.f32 %v9497_v45 }
 0x818   :  { %v12558_v13 = vpop.eup %12557 }
 0x819   :  { %v9499_v39 = vsel %vm9491_vm3, %v12558_v13, 0.0 }
 0x81a   :  { %9500 = vadd.xlane.f32.xlu0 %v9499_v39 }
 0x8a7   :  { %v9501_v5 = vpop.xlane.xlu0 %9500 }
 0x8a8   :  { %12559 = vlog2.f32 %v9501_v5 }
 0x8b2   :  { %v12560_v31 = vpop.eup %12559 }
 0x8b3   :  { %v9503_v9 = vmul.f32 0.6931472, %v12560_v31 }
 0x8b5   :  { %v9504_v57 = vadd.f32 %v9503_v9, %v9495_v58 }
 0x8b7   :  { %v9505_v50 = vsub.f32 0.0, %v9504_v57 }
 0x8b9   :  { %v9506_v14 = vmul.f32 1.442695, %v9505_v50 }
 0x8bb   :  { %12561 = vpow2.f32 %v9506_v14 }
 0x8c5   :  { %v12562_v55 = vpop.eup %12561 }
 0x8c6   :  { %v9508_v56 = vadd.f32 1.0, %v12562_v55 }
 0x8c8   :  { %12563 = vrcp.f32 %v9508_v56 }
 0x8d2   :  { %v12564_v10 = vpop.eup %12563 }
 0x8d3   :  { %9512 = vst.msk [vmem:[%s14565_s10] sm:$0xff] %vm9511_vm6, %v12564_v10 }
 0x8d4   :  { %9521 = vsyncpa [#allocation5], 1 }
 0x8d5   :  { %9522 = vsyncpa [#allocation7], 1 }
 0x8d6   :  { %9523 = vsyncpa [#allocation10], 1 }
 0x8d7   :  { %9524 = vsyncpa [#allocation13], 1 }

</bundles_post_ra>
